<compile_context>
chip_gen: v7x
topology: tpu7x:2x2x1
jax: 0.10.0
libtpu: 0.0.40
codegen_flags: <defaults>
</compile_context>

<pallas_src>
import numpy as np
import jax
import jax.numpy as jnp
from jax import lax
from jax.experimental import pallas as pl
from jax.experimental.pallas import tpu as pltpu

_NUM_SQUARINGS = 12     # (K+sI)^(2^12): equivalent to 4096 power iterations
_POLISH_MATVECS = 2
_UNIT = 8 * 128         # one full vreg of batch elements (8 sublanes x 128 lanes)


def _build_selection_matrix():
    """S of shape (100, 16) with A_from_16_vec(v).reshape(100) == S @ v."""
    S = np.zeros((100, 16), dtype=np.float32)
    pairs = [(0, 0), (0, 1), (0, 2), (1, 1), (1, 2), (2, 2)]   # triu_indices(3,3)
    for k, (p, r) in enumerate(pairs):                  # A[:9,:9] = kron(M, I3)
        for q in range(3):
            S[10 * (3 * p + q) + (3 * r + q), k] = 1.0
            S[10 * (3 * r + q) + (3 * p + q), k] = 1.0
    for i in range(9):                                  # A[:9,9] = A[9,:9] = v[6:15]
        S[10 * i + 9, 6 + i] = 1.0
        S[90 + i, 6 + i] = 1.0
    S[99, 15] = 1.0                                     # A[9,9] = v[15]
    return jnp.asarray(S)


def a_from_16_vec(a_vec):
    """Pure-JAX A_from_16_vec: a static row selection of a_vec (kept in the
    XLA wrapper -- writing A from the kernel was 78% of its HBM traffic)."""
    S = _build_selection_matrix()
    return (a_vec @ S.T).reshape(a_vec.shape[0], 10, 10)


def _square_once(m):
    """One step of M <- (M @ M) / tr(M @ M) for a symmetric 4x4 (10 uniques).

    The 6 off-diagonal squares are hoisted into named temporaries (each is
    reused twice on the diagonal of M @ M)."""
    m00, m01, m02, m03, m11, m12, m13, m22, m23, m33 = m
    q01 = m01 * m01
    q02 = m02 * m02
    q03 = m03 * m03
    q12 = m12 * m12
    q13 = m13 * m13
    q23 = m23 * m23
    n00 = m00 * m00 + q01 + q02 + q03
    n01 = m00 * m01 + m01 * m11 + m02 * m12 + m03 * m13
    n02 = m00 * m02 + m01 * m12 + m02 * m22 + m03 * m23
    n03 = m00 * m03 + m01 * m13 + m02 * m23 + m03 * m33
    n11 = q01 + m11 * m11 + q12 + q13
    n12 = m01 * m02 + m11 * m12 + m12 * m22 + m13 * m23
    n13 = m01 * m03 + m11 * m13 + m12 * m23 + m13 * m33
    n22 = q02 + q12 + m22 * m22 + q23
    n23 = m02 * m03 + m12 * m13 + m22 * m23 + m23 * m33
    n33 = q03 + q13 + q23 + m33 * m33
    inv_tr = pl.reciprocal(n00 + n11 + n22 + n33 + 1e-30, approx=True)
    return tuple(v * inv_tr for v in
                 (n00, n01, n02, n03, n11, n12, n13, n22, n23, n33))


def _rotmat_sdp_kernel(bm_ref, rot_ref):
    bm = bm_ref[...]                                    # (9, 8, L), sublane+lane dense

    # ---- SDP solve ---------------------------------------------------------
    # TODO(synk): CvxpyLayer(self.prob)(A) (diffcp SDP solve) has no Pallas
    # equivalent; replaced by the mathematically-equivalent tight Wahba /
    # Davenport quaternion solution described in the header (assumes the usual
    # rotation_matrix_constraints vec convention implied by the module's own
    # post-processing `r_vec.view(3,3).transpose(1,2)`).
    def row(k):                                         # (8, L) full-vreg per-batch scalar
        return bm[k]

    b = [[row(3 * i + j) for j in range(3)] for i in range(3)]

    # Davenport K for C = -Bm^T  (maximize <R, C>_F  ==  minimize tr(Bm R)).
    k00 = -(b[0][0] + b[1][1] + b[2][2])
    k01 = b[2][1] - b[1][2]
    k02 = b[0][2] - b[2][0]
    k03 = b[1][0] - b[0][1]
    k11 = -b[0][0] + b[1][1] + b[2][2]
    k12 = -(b[1][0] + b[0][1])
    k13 = -(b[2][0] + b[0][2])
    k22 = b[0][0] - b[1][1] + b[2][2]
    k23 = -(b[2][1] + b[1][2])
    k33 = b[0][0] + b[1][1] - b[2][2]

    # Gershgorin shift: s >= -lambda_min(K) so K + s*I is PSD (tighter than the
    # Frobenius-norm shift -> larger relative eigen-gap).
    a01, a02, a03 = jnp.abs(k01), jnp.abs(k02), jnp.abs(k03)
    a12, a13, a23 = jnp.abs(k12), jnp.abs(k13), jnp.abs(k23)
    lam_lb = jnp.minimum(jnp.minimum(k00 - (a01 + a02 + a03),
                                     k11 - (a01 + a12 + a13)),
                         jnp.minimum(k22 - (a02 + a12 + a23),
                                     k33 - (a03 + a13 + a23)))
    s = jnp.maximum(-lam_lb, 0.0)

    # Trace-normalize so all entries are in [-1, 1] (no overflow in squaring).
    inv_tr = pl.reciprocal((k00 + s) + (k11 + s) + (k22 + s) + (k33 + s) + 1e-30,
                           approx=True)
    m = tuple(v * inv_tr for v in
              (k00 + s, k01, k02, k03, k11 + s, k12, k13, k22 + s, k23, k33 + s))

    # Repeated squaring: M -> dominant-eigenvector projector v v^T.
    for _ in range(_NUM_SQUARINGS):
        m = _square_once(m)
    m00, m01, m02, m03, m11, m12, m13, m22, m23, m33 = m

    # Data-dependent eigenvector estimate: the column of the (near rank-1)
    # projector with the largest diagonal (column j of v v^T is v_j * v).
    d01 = m00 >= m11
    w_a = jnp.where(d01, m00, m01)
    x_a = jnp.where(d01, m01, m11)
    y_a = jnp.where(d01, m02, m12)
    z_a = jnp.where(d01, m03, m13)
    s_a = jnp.where(d01, m00, m11)
    d23 = m22 >= m33
    w_b = jnp.where(d23, m02, m03)
    x_b = jnp.where(d23, m12, m13)
    y_b = jnp.where(d23, m22, m23)
    z_b = jnp.where(d23, m23, m33)
    s_b = jnp.where(d23, m22, m33)
    dab = s_a >= s_b
    w = jnp.where(dab, w_a, w_b)
    x = jnp.where(dab, x_a, x_b)
    y = jnp.where(dab, y_a, y_b)
    z = jnp.where(dab, z_a, z_b)

    # Two polish mat-vecs with the converged projector (norm stays O(1), so no
    # per-step renormalization is needed).
    for _ in range(_POLISH_MATVECS):
        nw = m00 * w + m01 * x + m02 * y + m03 * z
        nx = m01 * w + m11 * x + m12 * y + m13 * z
        ny = m02 * w + m12 * x + m22 * y + m23 * z
        nz = m03 * w + m13 * x + m23 * y + m33 * z
        w, x, y, z = nw, nx, ny, nz

    # Exact final normalization (degenerate K == 0 falls back to identity).
    # rsqrt lands on the EUP slot (free alongside the VALU work).
    w = w + 1e-12
    inv = lax.rsqrt(w * w + x * x + y * y + z * z + 1e-30)
    w, x, y, z = w * inv, x * inv, y * inv, z * inv

    # Rotation matrix from the unit quaternion (scalar-first).  The rank-1 SDP
    # solution is x* = [vec(R^T); 1]; x_from_xxT followed by .view(3,3).T is
    # the identity on R, so R is written directly, row-major, as nine
    # full-vreg (8, L) stores (no concatenate / zero rows).
    ww, xx, yy, zz = w * w, x * x, y * y, z * z
    wx, wy, wz = w * x, w * y, w * z
    xy, xz, yz = x * y, x * z, y * z

    rot_ref[0, :, :] = ww + xx - yy - zz
    rot_ref[1, :, :] = 2.0 * (xy - wz)
    rot_ref[2, :, :] = 2.0 * (xz + wy)
    rot_ref[3, :, :] = 2.0 * (xy + wz)
    rot_ref[4, :, :] = ww - xx + yy - zz
    rot_ref[5, :, :] = 2.0 * (yz - wx)
    rot_ref[6, :, :] = 2.0 * (xz - wy)
    rot_ref[7, :, :] = 2.0 * (yz + wx)
    rot_ref[8, :, :] = ww - xx - yy + zz


def rotmat_sdp_solver(a_vec, *, batch_tile=None):
    """Pallas port of RotMatSDPSolver.forward (16-vec A parameterization).

    Returns (rotmat, A): rotmat matches the module's `rotmat.squeeze()` output,
    A == A_from_16_vec(a_vec) (the SDP cost matrix, computed in the wrapper)
    for verification.
    """
    a_vec = jnp.asarray(a_vec, dtype=jnp.float32)
    if a_vec.ndim < 2:
        a_vec = a_vec[None, :]
    assert a_vec.shape[1] == 16, "only the 16-vec path is implemented"
    # TODO(synk): the 55-vec branch (convert_Avec_to_A) was not provided.
    B = a_vec.shape[0]

    if batch_tile is None:
        if B <= _UNIT:
            batch_tile = _UNIT          # one full-vreg tile
        elif B <= 2 * _UNIT:
            batch_tile = _UNIT          # nb == 2 -> both v7x TensorCores busy
        else:
            batch_tile = 2 * _UNIT      # 2048: vreg-resident chain, amortized grid overhead
    assert batch_tile % _UNIT == 0, "batch_tile must be a multiple of 1024 (8 sublanes x 128 lanes)"
    TB = batch_tile
    L = TB // 8
    nb = pl.cdiv(B, TB)
    b_pad = nb * TB

    # Only the 9 linear-term entries (Bm = a_vec[:, 6:15]) enter the solve: the
    # quadratic term r^T (M kron I3) r == tr(M) is constant on SO(3) and v[15]
    # is a constant offset.  Batch b -> (sublane-row b // L, lane b % L).
    bm_pad = jnp.zeros((b_pad, 9), jnp.float32).at[:B].set(a_vec[:, 6:15])
    bm_3d = bm_pad.T.reshape(9, nb * 8, L)

    rot_3d = pl.pallas_call(
        _rotmat_sdp_kernel,
        grid=(nb,),
        in_specs=[pl.BlockSpec((9, 8, L), lambda i: (0, i, 0))],
        out_specs=pl.BlockSpec((9, 8, L), lambda i: (0, i, 0)),
        out_shape=jax.ShapeDtypeStruct((9, nb * 8, L), jnp.float32),
        compiler_params=pltpu.CompilerParams(
            dimension_semantics=("parallel",)),
    )(bm_3d)

    rotmat = rot_3d.reshape(9, b_pad)[:, :B].T.reshape(B, 3, 3)
    A = a_from_16_vec(a_vec)                        # == A_from_16_vec(a_vec)
    if B == 1:
        rotmat = rotmat[0]
    return rotmat, A


if __name__ == "__main__":
    key = jax.random.PRNGKey(0)
    a_vec = jax.random.normal(key, (2, 16), dtype=jnp.float32)

    rotmat, A = rotmat_sdp_solver(a_vec)
    jax.block_until_ready((rotmat, A))

    assert rotmat.shape == (2, 3, 3) and A.shape == (2, 10, 10)

    # A must equal A_from_16_vec(a_vec).
    v = np.asarray(a_vec)
    A_ref = np.zeros((2, 10, 10), np.float32)
    pairs = [(0, 0), (0, 1), (0, 2), (1, 1), (1, 2), (2, 2)]
    for n in range(2):
        M = np.zeros((3, 3), np.float32)
        for k, (p, r) in enumerate(pairs):
            M[p, r] = v[n, k]
            M[r, p] = v[n, k]
        A_ref[n, :9, :9] = np.kron(M, np.eye(3, dtype=np.float32))
        A_ref[n, :9, 9] = v[n, 6:15]
        A_ref[n, 9, :9] = v[n, 6:15]
        A_ref[n, 9, 9] = v[n, 15]
    assert np.allclose(np.asarray(A), A_ref, atol=1e-5)

    # rotmat must be a proper rotation matrix ...
    R = np.asarray(rotmat)
    rtr = np.einsum('bij,bkj->bik', R, R)
    assert np.all(np.abs(rtr - np.eye(3, dtype=np.float32)) < 1e-4)
    assert np.all(np.abs(np.linalg.det(R) - 1.0) < 1e-4)

    # ... and must minimize tr(Bm R) (the SDP objective up to a constant),
    # matching the SVD (Kabsch) solution of the equivalent Wahba problem.
    Bm = v[:, 6:15].reshape(2, 3, 3)
    obj = np.einsum('bij,bji->b', Bm, R)
    N = -np.transpose(Bm, (0, 2, 1))
    U, _, Vt = np.linalg.svd(N)
    det = np.linalg.det(np.einsum('bij,bjk->bik', U, Vt))
    D = np.stack([np.diag([1.0, 1.0, float(d)]).astype(np.float32) for d in det])
    R_ref = np.einsum('bij,bjk,bkl->bil', U, D, Vt)
    obj_ref = np.einsum('bij,bji->b', Bm, R_ref)
    assert np.all(obj <= obj_ref + 5e-4), (obj, obj_ref)

    print("KERNEL_OK")
</pallas_src>

<mosaic_0001>
module attributes {stable_mosaic.version = 11 : i64} {
  func.func @_rotmat_sdp_kernel(%arg0: i32, %arg1: memref<9x8x128xf32, #tpu.memory_space<vmem>>, %arg2: memref<9x8x128xf32, #tpu.memory_space<vmem>>) attributes {dimension_semantics = [#tpu.dimension_semantics<parallel>], iteration_bounds = array<i64: 1>, scalar_prefetch = 0 : i64, scratch_operands = 0 : i64, tpu.core_type = #tpu.core_type<tc>, window_params = [{transform_indices = @transform_0, window_bounds = array<i64: 9, 8, 128>}, {transform_indices = @transform_1, window_bounds = array<i64: 9, 8, 128>}]} {
    %c0 = arith.constant 0 : index
    %c0_0 = arith.constant 0 : index
    %c0_1 = arith.constant 0 : index
    %0 = vector.load %arg1[%c0, %c0_0, %c0_1] : memref<9x8x128xf32, #tpu.memory_space<vmem>>, vector<9x8x128xf32>
    %1 = vector.extract_strided_slice %0 {offsets = [0, 0, 0], sizes = [1, 8, 128], strides = [1, 1, 1]} : vector<9x8x128xf32> to vector<1x8x128xf32>
    %2 = vector.shape_cast %1 : vector<1x8x128xf32> to vector<8x128xf32>
    %3 = vector.extract_strided_slice %0 {offsets = [1, 0, 0], sizes = [1, 8, 128], strides = [1, 1, 1]} : vector<9x8x128xf32> to vector<1x8x128xf32>
    %4 = vector.shape_cast %3 : vector<1x8x128xf32> to vector<8x128xf32>
    %5 = vector.extract_strided_slice %0 {offsets = [2, 0, 0], sizes = [1, 8, 128], strides = [1, 1, 1]} : vector<9x8x128xf32> to vector<1x8x128xf32>
    %6 = vector.shape_cast %5 : vector<1x8x128xf32> to vector<8x128xf32>
    %7 = vector.extract_strided_slice %0 {offsets = [3, 0, 0], sizes = [1, 8, 128], strides = [1, 1, 1]} : vector<9x8x128xf32> to vector<1x8x128xf32>
    %8 = vector.shape_cast %7 : vector<1x8x128xf32> to vector<8x128xf32>
    %9 = vector.extract_strided_slice %0 {offsets = [4, 0, 0], sizes = [1, 8, 128], strides = [1, 1, 1]} : vector<9x8x128xf32> to vector<1x8x128xf32>
    %10 = vector.shape_cast %9 : vector<1x8x128xf32> to vector<8x128xf32>
    %11 = vector.extract_strided_slice %0 {offsets = [5, 0, 0], sizes = [1, 8, 128], strides = [1, 1, 1]} : vector<9x8x128xf32> to vector<1x8x128xf32>
    %12 = vector.shape_cast %11 : vector<1x8x128xf32> to vector<8x128xf32>
    %13 = vector.extract_strided_slice %0 {offsets = [6, 0, 0], sizes = [1, 8, 128], strides = [1, 1, 1]} : vector<9x8x128xf32> to vector<1x8x128xf32>
    %14 = vector.shape_cast %13 : vector<1x8x128xf32> to vector<8x128xf32>
    %15 = vector.extract_strided_slice %0 {offsets = [7, 0, 0], sizes = [1, 8, 128], strides = [1, 1, 1]} : vector<9x8x128xf32> to vector<1x8x128xf32>
    %16 = vector.shape_cast %15 : vector<1x8x128xf32> to vector<8x128xf32>
    %17 = vector.extract_strided_slice %0 {offsets = [8, 0, 0], sizes = [1, 8, 128], strides = [1, 1, 1]} : vector<9x8x128xf32> to vector<1x8x128xf32>
    %18 = vector.shape_cast %17 : vector<1x8x128xf32> to vector<8x128xf32>
    %19 = arith.addf %2, %10 : vector<8x128xf32>
    %20 = arith.addf %19, %18 : vector<8x128xf32>
    %cst = arith.constant 0.000000e+00 : f32
    %21 = vector.broadcast %cst : f32 to vector<8x128xf32>
    %22 = arith.subf %21, %20 : vector<8x128xf32>
    %23 = arith.subf %16, %12 : vector<8x128xf32>
    %24 = arith.subf %6, %14 : vector<8x128xf32>
    %25 = arith.subf %8, %4 : vector<8x128xf32>
    %cst_2 = arith.constant 0.000000e+00 : f32
    %26 = vector.broadcast %cst_2 : f32 to vector<8x128xf32>
    %27 = arith.subf %26, %2 : vector<8x128xf32>
    %28 = arith.addf %27, %10 : vector<8x128xf32>
    %29 = arith.addf %28, %18 : vector<8x128xf32>
    %30 = arith.addf %8, %4 : vector<8x128xf32>
    %cst_3 = arith.constant 0.000000e+00 : f32
    %31 = vector.broadcast %cst_3 : f32 to vector<8x128xf32>
    %32 = arith.subf %31, %30 : vector<8x128xf32>
    %33 = arith.addf %14, %6 : vector<8x128xf32>
    %cst_4 = arith.constant 0.000000e+00 : f32
    %34 = vector.broadcast %cst_4 : f32 to vector<8x128xf32>
    %35 = arith.subf %34, %33 : vector<8x128xf32>
    %36 = arith.subf %2, %10 : vector<8x128xf32>
    %37 = arith.addf %36, %18 : vector<8x128xf32>
    %38 = arith.addf %16, %12 : vector<8x128xf32>
    %cst_5 = arith.constant 0.000000e+00 : f32
    %39 = vector.broadcast %cst_5 : f32 to vector<8x128xf32>
    %40 = arith.subf %39, %38 : vector<8x128xf32>
    %41 = arith.addf %2, %10 : vector<8x128xf32>
    %42 = arith.subf %41, %18 : vector<8x128xf32>
    %43 = math.absf %23 : vector<8x128xf32>
    %44 = math.absf %24 : vector<8x128xf32>
    %45 = math.absf %25 : vector<8x128xf32>
    %46 = math.absf %32 : vector<8x128xf32>
    %47 = math.absf %35 : vector<8x128xf32>
    %48 = math.absf %40 : vector<8x128xf32>
    %49 = arith.addf %43, %44 : vector<8x128xf32>
    %50 = arith.addf %49, %45 : vector<8x128xf32>
    %51 = arith.subf %22, %50 : vector<8x128xf32>
    %52 = arith.addf %43, %46 : vector<8x128xf32>
    %53 = arith.addf %52, %47 : vector<8x128xf32>
    %54 = arith.subf %29, %53 : vector<8x128xf32>
    %55 = arith.minimumf %51, %54 : vector<8x128xf32>
    %56 = arith.addf %44, %46 : vector<8x128xf32>
    %57 = arith.addf %56, %48 : vector<8x128xf32>
    %58 = arith.subf %37, %57 : vector<8x128xf32>
    %59 = arith.addf %45, %47 : vector<8x128xf32>
    %60 = arith.addf %59, %48 : vector<8x128xf32>
    %61 = arith.subf %42, %60 : vector<8x128xf32>
    %62 = arith.minimumf %58, %61 : vector<8x128xf32>
    %63 = arith.minimumf %55, %62 : vector<8x128xf32>
    %cst_6 = arith.constant 0.000000e+00 : f32
    %64 = vector.broadcast %cst_6 : f32 to vector<8x128xf32>
    %65 = arith.subf %64, %63 : vector<8x128xf32>
    %cst_7 = arith.constant 0.000000e+00 : f32
    %66 = vector.broadcast %cst_7 : f32 to vector<8x128xf32>
    %67 = arith.maximumf %65, %66 : vector<8x128xf32>
    %68 = arith.addf %22, %67 : vector<8x128xf32>
    %69 = arith.addf %29, %67 : vector<8x128xf32>
    %70 = arith.addf %68, %69 : vector<8x128xf32>
    %71 = arith.addf %37, %67 : vector<8x128xf32>
    %72 = arith.addf %70, %71 : vector<8x128xf32>
    %73 = arith.addf %42, %67 : vector<8x128xf32>
    %74 = arith.addf %72, %73 : vector<8x128xf32>
    %cst_8 = arith.constant 1.000000e-30 : f32
    %75 = vector.broadcast %cst_8 : f32 to vector<8x128xf32>
    %76 = arith.addf %74, %75 : vector<8x128xf32>
    %77 = tpu.reciprocal %76 {approx = true} : vector<8x128xf32> -> vector<8x128xf32>
    %78 = arith.addf %22, %67 : vector<8x128xf32>
    %79 = arith.addf %29, %67 : vector<8x128xf32>
    %80 = arith.addf %37, %67 : vector<8x128xf32>
    %81 = arith.addf %42, %67 : vector<8x128xf32>
    %82 = arith.mulf %78, %77 : vector<8x128xf32>
    %83 = arith.mulf %23, %77 : vector<8x128xf32>
    %84 = arith.mulf %24, %77 : vector<8x128xf32>
    %85 = arith.mulf %25, %77 : vector<8x128xf32>
    %86 = arith.mulf %79, %77 : vector<8x128xf32>
    %87 = arith.mulf %32, %77 : vector<8x128xf32>
    %88 = arith.mulf %35, %77 : vector<8x128xf32>
    %89 = arith.mulf %80, %77 : vector<8x128xf32>
    %90 = arith.mulf %40, %77 : vector<8x128xf32>
    %91 = arith.mulf %81, %77 : vector<8x128xf32>
    %92 = arith.mulf %83, %83 : vector<8x128xf32>
    %93 = arith.mulf %84, %84 : vector<8x128xf32>
    %94 = arith.mulf %85, %85 : vector<8x128xf32>
    %95 = arith.mulf %87, %87 : vector<8x128xf32>
    %96 = arith.mulf %88, %88 : vector<8x128xf32>
    %97 = arith.mulf %90, %90 : vector<8x128xf32>
    %98 = arith.mulf %82, %82 : vector<8x128xf32>
    %99 = arith.addf %98, %92 : vector<8x128xf32>
    %100 = arith.addf %99, %93 : vector<8x128xf32>
    %101 = arith.addf %100, %94 : vector<8x128xf32>
    %102 = arith.mulf %82, %83 : vector<8x128xf32>
    %103 = arith.mulf %83, %86 : vector<8x128xf32>
    %104 = arith.addf %102, %103 : vector<8x128xf32>
    %105 = arith.mulf %84, %87 : vector<8x128xf32>
    %106 = arith.addf %104, %105 : vector<8x128xf32>
    %107 = arith.mulf %85, %88 : vector<8x128xf32>
    %108 = arith.addf %106, %107 : vector<8x128xf32>
    %109 = arith.mulf %82, %84 : vector<8x128xf32>
    %110 = arith.mulf %83, %87 : vector<8x128xf32>
    %111 = arith.addf %109, %110 : vector<8x128xf32>
    %112 = arith.mulf %84, %89 : vector<8x128xf32>
    %113 = arith.addf %111, %112 : vector<8x128xf32>
    %114 = arith.mulf %85, %90 : vector<8x128xf32>
    %115 = arith.addf %113, %114 : vector<8x128xf32>
    %116 = arith.mulf %82, %85 : vector<8x128xf32>
    %117 = arith.mulf %83, %88 : vector<8x128xf32>
    %118 = arith.addf %116, %117 : vector<8x128xf32>
    %119 = arith.mulf %84, %90 : vector<8x128xf32>
    %120 = arith.addf %118, %119 : vector<8x128xf32>
    %121 = arith.mulf %85, %91 : vector<8x128xf32>
    %122 = arith.addf %120, %121 : vector<8x128xf32>
    %123 = arith.mulf %86, %86 : vector<8x128xf32>
    %124 = arith.addf %92, %123 : vector<8x128xf32>
    %125 = arith.addf %124, %95 : vector<8x128xf32>
    %126 = arith.addf %125, %96 : vector<8x128xf32>
    %127 = arith.mulf %83, %84 : vector<8x128xf32>
    %128 = arith.mulf %86, %87 : vector<8x128xf32>
    %129 = arith.addf %127, %128 : vector<8x128xf32>
    %130 = arith.mulf %87, %89 : vector<8x128xf32>
    %131 = arith.addf %129, %130 : vector<8x128xf32>
    %132 = arith.mulf %88, %90 : vector<8x128xf32>
    %133 = arith.addf %131, %132 : vector<8x128xf32>
    %134 = arith.mulf %83, %85 : vector<8x128xf32>
    %135 = arith.mulf %86, %88 : vector<8x128xf32>
    %136 = arith.addf %134, %135 : vector<8x128xf32>
    %137 = arith.mulf %87, %90 : vector<8x128xf32>
    %138 = arith.addf %136, %137 : vector<8x128xf32>
    %139 = arith.mulf %88, %91 : vector<8x128xf32>
    %140 = arith.addf %138, %139 : vector<8x128xf32>
    %141 = arith.addf %93, %95 : vector<8x128xf32>
    %142 = arith.mulf %89, %89 : vector<8x128xf32>
    %143 = arith.addf %141, %142 : vector<8x128xf32>
    %144 = arith.addf %143, %97 : vector<8x128xf32>
    %145 = arith.mulf %84, %85 : vector<8x128xf32>
    %146 = arith.mulf %87, %88 : vector<8x128xf32>
    %147 = arith.addf %145, %146 : vector<8x128xf32>
    %148 = arith.mulf %89, %90 : vector<8x128xf32>
    %149 = arith.addf %147, %148 : vector<8x128xf32>
    %150 = arith.mulf %90, %91 : vector<8x128xf32>
    %151 = arith.addf %149, %150 : vector<8x128xf32>
    %152 = arith.addf %94, %96 : vector<8x128xf32>
    %153 = arith.addf %152, %97 : vector<8x128xf32>
    %154 = arith.mulf %91, %91 : vector<8x128xf32>
    %155 = arith.addf %153, %154 : vector<8x128xf32>
    %156 = arith.addf %101, %126 : vector<8x128xf32>
    %157 = arith.addf %156, %144 : vector<8x128xf32>
    %158 = arith.addf %157, %155 : vector<8x128xf32>
    %cst_9 = arith.constant 1.000000e-30 : f32
    %159 = vector.broadcast %cst_9 : f32 to vector<8x128xf32>
    %160 = arith.addf %158, %159 : vector<8x128xf32>
    %161 = tpu.reciprocal %160 {approx = true} : vector<8x128xf32> -> vector<8x128xf32>
    %162 = arith.mulf %101, %161 : vector<8x128xf32>
    %163 = arith.mulf %108, %161 : vector<8x128xf32>
    %164 = arith.mulf %115, %161 : vector<8x128xf32>
    %165 = arith.mulf %122, %161 : vector<8x128xf32>
    %166 = arith.mulf %126, %161 : vector<8x128xf32>
    %167 = arith.mulf %133, %161 : vector<8x128xf32>
    %168 = arith.mulf %140, %161 : vector<8x128xf32>
    %169 = arith.mulf %144, %161 : vector<8x128xf32>
    %170 = arith.mulf %151, %161 : vector<8x128xf32>
    %171 = arith.mulf %155, %161 : vector<8x128xf32>
    %172 = arith.mulf %163, %163 : vector<8x128xf32>
    %173 = arith.mulf %164, %164 : vector<8x128xf32>
    %174 = arith.mulf %165, %165 : vector<8x128xf32>
    %175 = arith.mulf %167, %167 : vector<8x128xf32>
    %176 = arith.mulf %168, %168 : vector<8x128xf32>
    %177 = arith.mulf %170, %170 : vector<8x128xf32>
    %178 = arith.mulf %162, %162 : vector<8x128xf32>
    %179 = arith.addf %178, %172 : vector<8x128xf32>
    %180 = arith.addf %179, %173 : vector<8x128xf32>
    %181 = arith.addf %180, %174 : vector<8x128xf32>
    %182 = arith.mulf %162, %163 : vector<8x128xf32>
    %183 = arith.mulf %163, %166 : vector<8x128xf32>
    %184 = arith.addf %182, %183 : vector<8x128xf32>
    %185 = arith.mulf %164, %167 : vector<8x128xf32>
    %186 = arith.addf %184, %185 : vector<8x128xf32>
    %187 = arith.mulf %165, %168 : vector<8x128xf32>
    %188 = arith.addf %186, %187 : vector<8x128xf32>
    %189 = arith.mulf %162, %164 : vector<8x128xf32>
    %190 = arith.mulf %163, %167 : vector<8x128xf32>
    %191 = arith.addf %189, %190 : vector<8x128xf32>
    %192 = arith.mulf %164, %169 : vector<8x128xf32>
    %193 = arith.addf %191, %192 : vector<8x128xf32>
    %194 = arith.mulf %165, %170 : vector<8x128xf32>
    %195 = arith.addf %193, %194 : vector<8x128xf32>
    %196 = arith.mulf %162, %165 : vector<8x128xf32>
    %197 = arith.mulf %163, %168 : vector<8x128xf32>
    %198 = arith.addf %196, %197 : vector<8x128xf32>
    %199 = arith.mulf %164, %170 : vector<8x128xf32>
    %200 = arith.addf %198, %199 : vector<8x128xf32>
    %201 = arith.mulf %165, %171 : vector<8x128xf32>
    %202 = arith.addf %200, %201 : vector<8x128xf32>
    %203 = arith.mulf %166, %166 : vector<8x128xf32>
    %204 = arith.addf %172, %203 : vector<8x128xf32>
    %205 = arith.addf %204, %175 : vector<8x128xf32>
    %206 = arith.addf %205, %176 : vector<8x128xf32>
    %207 = arith.mulf %163, %164 : vector<8x128xf32>
    %208 = arith.mulf %166, %167 : vector<8x128xf32>
    %209 = arith.addf %207, %208 : vector<8x128xf32>
    %210 = arith.mulf %167, %169 : vector<8x128xf32>
    %211 = arith.addf %209, %210 : vector<8x128xf32>
    %212 = arith.mulf %168, %170 : vector<8x128xf32>
    %213 = arith.addf %211, %212 : vector<8x128xf32>
    %214 = arith.mulf %163, %165 : vector<8x128xf32>
    %215 = arith.mulf %166, %168 : vector<8x128xf32>
    %216 = arith.addf %214, %215 : vector<8x128xf32>
    %217 = arith.mulf %167, %170 : vector<8x128xf32>
    %218 = arith.addf %216, %217 : vector<8x128xf32>
    %219 = arith.mulf %168, %171 : vector<8x128xf32>
    %220 = arith.addf %218, %219 : vector<8x128xf32>
    %221 = arith.addf %173, %175 : vector<8x128xf32>
    %222 = arith.mulf %169, %169 : vector<8x128xf32>
    %223 = arith.addf %221, %222 : vector<8x128xf32>
    %224 = arith.addf %223, %177 : vector<8x128xf32>
    %225 = arith.mulf %164, %165 : vector<8x128xf32>
    %226 = arith.mulf %167, %168 : vector<8x128xf32>
    %227 = arith.addf %225, %226 : vector<8x128xf32>
    %228 = arith.mulf %169, %170 : vector<8x128xf32>
    %229 = arith.addf %227, %228 : vector<8x128xf32>
    %230 = arith.mulf %170, %171 : vector<8x128xf32>
    %231 = arith.addf %229, %230 : vector<8x128xf32>
    %232 = arith.addf %174, %176 : vector<8x128xf32>
    %233 = arith.addf %232, %177 : vector<8x128xf32>
    %234 = arith.mulf %171, %171 : vector<8x128xf32>
    %235 = arith.addf %233, %234 : vector<8x128xf32>
    %236 = arith.addf %181, %206 : vector<8x128xf32>
    %237 = arith.addf %236, %224 : vector<8x128xf32>
    %238 = arith.addf %237, %235 : vector<8x128xf32>
    %cst_10 = arith.constant 1.000000e-30 : f32
    %239 = vector.broadcast %cst_10 : f32 to vector<8x128xf32>
    %240 = arith.addf %238, %239 : vector<8x128xf32>
    %241 = tpu.reciprocal %240 {approx = true} : vector<8x128xf32> -> vector<8x128xf32>
    %242 = arith.mulf %181, %241 : vector<8x128xf32>
    %243 = arith.mulf %188, %241 : vector<8x128xf32>
    %244 = arith.mulf %195, %241 : vector<8x128xf32>
    %245 = arith.mulf %202, %241 : vector<8x128xf32>
    %246 = arith.mulf %206, %241 : vector<8x128xf32>
    %247 = arith.mulf %213, %241 : vector<8x128xf32>
    %248 = arith.mulf %220, %241 : vector<8x128xf32>
    %249 = arith.mulf %224, %241 : vector<8x128xf32>
    %250 = arith.mulf %231, %241 : vector<8x128xf32>
    %251 = arith.mulf %235, %241 : vector<8x128xf32>
    %252 = arith.mulf %243, %243 : vector<8x128xf32>
    %253 = arith.mulf %244, %244 : vector<8x128xf32>
    %254 = arith.mulf %245, %245 : vector<8x128xf32>
    %255 = arith.mulf %247, %247 : vector<8x128xf32>
    %256 = arith.mulf %248, %248 : vector<8x128xf32>
    %257 = arith.mulf %250, %250 : vector<8x128xf32>
    %258 = arith.mulf %242, %242 : vector<8x128xf32>
    %259 = arith.addf %258, %252 : vector<8x128xf32>
    %260 = arith.addf %259, %253 : vector<8x128xf32>
    %261 = arith.addf %260, %254 : vector<8x128xf32>
    %262 = arith.mulf %242, %243 : vector<8x128xf32>
    %263 = arith.mulf %243, %246 : vector<8x128xf32>
    %264 = arith.addf %262, %263 : vector<8x128xf32>
    %265 = arith.mulf %244, %247 : vector<8x128xf32>
    %266 = arith.addf %264, %265 : vector<8x128xf32>
    %267 = arith.mulf %245, %248 : vector<8x128xf32>
    %268 = arith.addf %266, %267 : vector<8x128xf32>
    %269 = arith.mulf %242, %244 : vector<8x128xf32>
    %270 = arith.mulf %243, %247 : vector<8x128xf32>
    %271 = arith.addf %269, %270 : vector<8x128xf32>
    %272 = arith.mulf %244, %249 : vector<8x128xf32>
    %273 = arith.addf %271, %272 : vector<8x128xf32>
    %274 = arith.mulf %245, %250 : vector<8x128xf32>
    %275 = arith.addf %273, %274 : vector<8x128xf32>
    %276 = arith.mulf %242, %245 : vector<8x128xf32>
    %277 = arith.mulf %243, %248 : vector<8x128xf32>
    %278 = arith.addf %276, %277 : vector<8x128xf32>
    %279 = arith.mulf %244, %250 : vector<8x128xf32>
    %280 = arith.addf %278, %279 : vector<8x128xf32>
    %281 = arith.mulf %245, %251 : vector<8x128xf32>
    %282 = arith.addf %280, %281 : vector<8x128xf32>
    %283 = arith.mulf %246, %246 : vector<8x128xf32>
    %284 = arith.addf %252, %283 : vector<8x128xf32>
    %285 = arith.addf %284, %255 : vector<8x128xf32>
    %286 = arith.addf %285, %256 : vector<8x128xf32>
    %287 = arith.mulf %243, %244 : vector<8x128xf32>
    %288 = arith.mulf %246, %247 : vector<8x128xf32>
    %289 = arith.addf %287, %288 : vector<8x128xf32>
    %290 = arith.mulf %247, %249 : vector<8x128xf32>
    %291 = arith.addf %289, %290 : vector<8x128xf32>
    %292 = arith.mulf %248, %250 : vector<8x128xf32>
    %293 = arith.addf %291, %292 : vector<8x128xf32>
    %294 = arith.mulf %243, %245 : vector<8x128xf32>
    %295 = arith.mulf %246, %248 : vector<8x128xf32>
    %296 = arith.addf %294, %295 : vector<8x128xf32>
    %297 = arith.mulf %247, %250 : vector<8x128xf32>
    %298 = arith.addf %296, %297 : vector<8x128xf32>
    %299 = arith.mulf %248, %251 : vector<8x128xf32>
    %300 = arith.addf %298, %299 : vector<8x128xf32>
    %301 = arith.addf %253, %255 : vector<8x128xf32>
    %302 = arith.mulf %249, %249 : vector<8x128xf32>
    %303 = arith.addf %301, %302 : vector<8x128xf32>
    %304 = arith.addf %303, %257 : vector<8x128xf32>
    %305 = arith.mulf %244, %245 : vector<8x128xf32>
    %306 = arith.mulf %247, %248 : vector<8x128xf32>
    %307 = arith.addf %305, %306 : vector<8x128xf32>
    %308 = arith.mulf %249, %250 : vector<8x128xf32>
    %309 = arith.addf %307, %308 : vector<8x128xf32>
    %310 = arith.mulf %250, %251 : vector<8x128xf32>
    %311 = arith.addf %309, %310 : vector<8x128xf32>
    %312 = arith.addf %254, %256 : vector<8x128xf32>
    %313 = arith.addf %312, %257 : vector<8x128xf32>
    %314 = arith.mulf %251, %251 : vector<8x128xf32>
    %315 = arith.addf %313, %314 : vector<8x128xf32>
    %316 = arith.addf %261, %286 : vector<8x128xf32>
    %317 = arith.addf %316, %304 : vector<8x128xf32>
    %318 = arith.addf %317, %315 : vector<8x128xf32>
    %cst_11 = arith.constant 1.000000e-30 : f32
    %319 = vector.broadcast %cst_11 : f32 to vector<8x128xf32>
    %320 = arith.addf %318, %319 : vector<8x128xf32>
    %321 = tpu.reciprocal %320 {approx = true} : vector<8x128xf32> -> vector<8x128xf32>
    %322 = arith.mulf %261, %321 : vector<8x128xf32>
    %323 = arith.mulf %268, %321 : vector<8x128xf32>
    %324 = arith.mulf %275, %321 : vector<8x128xf32>
    %325 = arith.mulf %282, %321 : vector<8x128xf32>
    %326 = arith.mulf %286, %321 : vector<8x128xf32>
    %327 = arith.mulf %293, %321 : vector<8x128xf32>
    %328 = arith.mulf %300, %321 : vector<8x128xf32>
    %329 = arith.mulf %304, %321 : vector<8x128xf32>
    %330 = arith.mulf %311, %321 : vector<8x128xf32>
    %331 = arith.mulf %315, %321 : vector<8x128xf32>
    %332 = arith.mulf %323, %323 : vector<8x128xf32>
    %333 = arith.mulf %324, %324 : vector<8x128xf32>
    %334 = arith.mulf %325, %325 : vector<8x128xf32>
    %335 = arith.mulf %327, %327 : vector<8x128xf32>
    %336 = arith.mulf %328, %328 : vector<8x128xf32>
    %337 = arith.mulf %330, %330 : vector<8x128xf32>
    %338 = arith.mulf %322, %322 : vector<8x128xf32>
    %339 = arith.addf %338, %332 : vector<8x128xf32>
    %340 = arith.addf %339, %333 : vector<8x128xf32>
    %341 = arith.addf %340, %334 : vector<8x128xf32>
    %342 = arith.mulf %322, %323 : vector<8x128xf32>
    %343 = arith.mulf %323, %326 : vector<8x128xf32>
    %344 = arith.addf %342, %343 : vector<8x128xf32>
    %345 = arith.mulf %324, %327 : vector<8x128xf32>
    %346 = arith.addf %344, %345 : vector<8x128xf32>
    %347 = arith.mulf %325, %328 : vector<8x128xf32>
    %348 = arith.addf %346, %347 : vector<8x128xf32>
    %349 = arith.mulf %322, %324 : vector<8x128xf32>
    %350 = arith.mulf %323, %327 : vector<8x128xf32>
    %351 = arith.addf %349, %350 : vector<8x128xf32>
    %352 = arith.mulf %324, %329 : vector<8x128xf32>
    %353 = arith.addf %351, %352 : vector<8x128xf32>
    %354 = arith.mulf %325, %330 : vector<8x128xf32>
    %355 = arith.addf %353, %354 : vector<8x128xf32>
    %356 = arith.mulf %322, %325 : vector<8x128xf32>
    %357 = arith.mulf %323, %328 : vector<8x128xf32>
    %358 = arith.addf %356, %357 : vector<8x128xf32>
    %359 = arith.mulf %324, %330 : vector<8x128xf32>
    %360 = arith.addf %358, %359 : vector<8x128xf32>
    %361 = arith.mulf %325, %331 : vector<8x128xf32>
    %362 = arith.addf %360, %361 : vector<8x128xf32>
    %363 = arith.mulf %326, %326 : vector<8x128xf32>
    %364 = arith.addf %332, %363 : vector<8x128xf32>
    %365 = arith.addf %364, %335 : vector<8x128xf32>
    %366 = arith.addf %365, %336 : vector<8x128xf32>
    %367 = arith.mulf %323, %324 : vector<8x128xf32>
    %368 = arith.mulf %326, %327 : vector<8x128xf32>
    %369 = arith.addf %367, %368 : vector<8x128xf32>
    %370 = arith.mulf %327, %329 : vector<8x128xf32>
    %371 = arith.addf %369, %370 : vector<8x128xf32>
    %372 = arith.mulf %328, %330 : vector<8x128xf32>
    %373 = arith.addf %371, %372 : vector<8x128xf32>
    %374 = arith.mulf %323, %325 : vector<8x128xf32>
    %375 = arith.mulf %326, %328 : vector<8x128xf32>
    %376 = arith.addf %374, %375 : vector<8x128xf32>
    %377 = arith.mulf %327, %330 : vector<8x128xf32>
    %378 = arith.addf %376, %377 : vector<8x128xf32>
    %379 = arith.mulf %328, %331 : vector<8x128xf32>
    %380 = arith.addf %378, %379 : vector<8x128xf32>
    %381 = arith.addf %333, %335 : vector<8x128xf32>
    %382 = arith.mulf %329, %329 : vector<8x128xf32>
    %383 = arith.addf %381, %382 : vector<8x128xf32>
    %384 = arith.addf %383, %337 : vector<8x128xf32>
    %385 = arith.mulf %324, %325 : vector<8x128xf32>
    %386 = arith.mulf %327, %328 : vector<8x128xf32>
    %387 = arith.addf %385, %386 : vector<8x128xf32>
    %388 = arith.mulf %329, %330 : vector<8x128xf32>
    %389 = arith.addf %387, %388 : vector<8x128xf32>
    %390 = arith.mulf %330, %331 : vector<8x128xf32>
    %391 = arith.addf %389, %390 : vector<8x128xf32>
    %392 = arith.addf %334, %336 : vector<8x128xf32>
    %393 = arith.addf %392, %337 : vector<8x128xf32>
    %394 = arith.mulf %331, %331 : vector<8x128xf32>
    %395 = arith.addf %393, %394 : vector<8x128xf32>
    %396 = arith.addf %341, %366 : vector<8x128xf32>
    %397 = arith.addf %396, %384 : vector<8x128xf32>
    %398 = arith.addf %397, %395 : vector<8x128xf32>
    %cst_12 = arith.constant 1.000000e-30 : f32
    %399 = vector.broadcast %cst_12 : f32 to vector<8x128xf32>
    %400 = arith.addf %398, %399 : vector<8x128xf32>
    %401 = tpu.reciprocal %400 {approx = true} : vector<8x128xf32> -> vector<8x128xf32>
    %402 = arith.mulf %341, %401 : vector<8x128xf32>
    %403 = arith.mulf %348, %401 : vector<8x128xf32>
    %404 = arith.mulf %355, %401 : vector<8x128xf32>
    %405 = arith.mulf %362, %401 : vector<8x128xf32>
    %406 = arith.mulf %366, %401 : vector<8x128xf32>
    %407 = arith.mulf %373, %401 : vector<8x128xf32>
    %408 = arith.mulf %380, %401 : vector<8x128xf32>
    %409 = arith.mulf %384, %401 : vector<8x128xf32>
    %410 = arith.mulf %391, %401 : vector<8x128xf32>
    %411 = arith.mulf %395, %401 : vector<8x128xf32>
    %412 = arith.mulf %403, %403 : vector<8x128xf32>
    %413 = arith.mulf %404, %404 : vector<8x128xf32>
    %414 = arith.mulf %405, %405 : vector<8x128xf32>
    %415 = arith.mulf %407, %407 : vector<8x128xf32>
    %416 = arith.mulf %408, %408 : vector<8x128xf32>
    %417 = arith.mulf %410, %410 : vector<8x128xf32>
    %418 = arith.mulf %402, %402 : vector<8x128xf32>
    %419 = arith.addf %418, %412 : vector<8x128xf32>
    %420 = arith.addf %419, %413 : vector<8x128xf32>
    %421 = arith.addf %420, %414 : vector<8x128xf32>
    %422 = arith.mulf %402, %403 : vector<8x128xf32>
    %423 = arith.mulf %403, %406 : vector<8x128xf32>
    %424 = arith.addf %422, %423 : vector<8x128xf32>
    %425 = arith.mulf %404, %407 : vector<8x128xf32>
    %426 = arith.addf %424, %425 : vector<8x128xf32>
    %427 = arith.mulf %405, %408 : vector<8x128xf32>
    %428 = arith.addf %426, %427 : vector<8x128xf32>
    %429 = arith.mulf %402, %404 : vector<8x128xf32>
    %430 = arith.mulf %403, %407 : vector<8x128xf32>
    %431 = arith.addf %429, %430 : vector<8x128xf32>
    %432 = arith.mulf %404, %409 : vector<8x128xf32>
    %433 = arith.addf %431, %432 : vector<8x128xf32>
    %434 = arith.mulf %405, %410 : vector<8x128xf32>
    %435 = arith.addf %433, %434 : vector<8x128xf32>
    %436 = arith.mulf %402, %405 : vector<8x128xf32>
    %437 = arith.mulf %403, %408 : vector<8x128xf32>
    %438 = arith.addf %436, %437 : vector<8x128xf32>
    %439 = arith.mulf %404, %410 : vector<8x128xf32>
    %440 = arith.addf %438, %439 : vector<8x128xf32>
    %441 = arith.mulf %405, %411 : vector<8x128xf32>
    %442 = arith.addf %440, %441 : vector<8x128xf32>
    %443 = arith.mulf %406, %406 : vector<8x128xf32>
    %444 = arith.addf %412, %443 : vector<8x128xf32>
    %445 = arith.addf %444, %415 : vector<8x128xf32>
    %446 = arith.addf %445, %416 : vector<8x128xf32>
    %447 = arith.mulf %403, %404 : vector<8x128xf32>
    %448 = arith.mulf %406, %407 : vector<8x128xf32>
    %449 = arith.addf %447, %448 : vector<8x128xf32>
    %450 = arith.mulf %407, %409 : vector<8x128xf32>
    %451 = arith.addf %449, %450 : vector<8x128xf32>
    %452 = arith.mulf %408, %410 : vector<8x128xf32>
    %453 = arith.addf %451, %452 : vector<8x128xf32>
    %454 = arith.mulf %403, %405 : vector<8x128xf32>
    %455 = arith.mulf %406, %408 : vector<8x128xf32>
    %456 = arith.addf %454, %455 : vector<8x128xf32>
    %457 = arith.mulf %407, %410 : vector<8x128xf32>
    %458 = arith.addf %456, %457 : vector<8x128xf32>
    %459 = arith.mulf %408, %411 : vector<8x128xf32>
    %460 = arith.addf %458, %459 : vector<8x128xf32>
    %461 = arith.addf %413, %415 : vector<8x128xf32>
    %462 = arith.mulf %409, %409 : vector<8x128xf32>
    %463 = arith.addf %461, %462 : vector<8x128xf32>
    %464 = arith.addf %463, %417 : vector<8x128xf32>
    %465 = arith.mulf %404, %405 : vector<8x128xf32>
    %466 = arith.mulf %407, %408 : vector<8x128xf32>
    %467 = arith.addf %465, %466 : vector<8x128xf32>
    %468 = arith.mulf %409, %410 : vector<8x128xf32>
    %469 = arith.addf %467, %468 : vector<8x128xf32>
    %470 = arith.mulf %410, %411 : vector<8x128xf32>
    %471 = arith.addf %469, %470 : vector<8x128xf32>
    %472 = arith.addf %414, %416 : vector<8x128xf32>
    %473 = arith.addf %472, %417 : vector<8x128xf32>
    %474 = arith.mulf %411, %411 : vector<8x128xf32>
    %475 = arith.addf %473, %474 : vector<8x128xf32>
    %476 = arith.addf %421, %446 : vector<8x128xf32>
    %477 = arith.addf %476, %464 : vector<8x128xf32>
    %478 = arith.addf %477, %475 : vector<8x128xf32>
    %cst_13 = arith.constant 1.000000e-30 : f32
    %479 = vector.broadcast %cst_13 : f32 to vector<8x128xf32>
    %480 = arith.addf %478, %479 : vector<8x128xf32>
    %481 = tpu.reciprocal %480 {approx = true} : vector<8x128xf32> -> vector<8x128xf32>
    %482 = arith.mulf %421, %481 : vector<8x128xf32>
    %483 = arith.mulf %428, %481 : vector<8x128xf32>
    %484 = arith.mulf %435, %481 : vector<8x128xf32>
    %485 = arith.mulf %442, %481 : vector<8x128xf32>
    %486 = arith.mulf %446, %481 : vector<8x128xf32>
    %487 = arith.mulf %453, %481 : vector<8x128xf32>
    %488 = arith.mulf %460, %481 : vector<8x128xf32>
    %489 = arith.mulf %464, %481 : vector<8x128xf32>
    %490 = arith.mulf %471, %481 : vector<8x128xf32>
    %491 = arith.mulf %475, %481 : vector<8x128xf32>
    %492 = arith.mulf %483, %483 : vector<8x128xf32>
    %493 = arith.mulf %484, %484 : vector<8x128xf32>
    %494 = arith.mulf %485, %485 : vector<8x128xf32>
    %495 = arith.mulf %487, %487 : vector<8x128xf32>
    %496 = arith.mulf %488, %488 : vector<8x128xf32>
    %497 = arith.mulf %490, %490 : vector<8x128xf32>
    %498 = arith.mulf %482, %482 : vector<8x128xf32>
    %499 = arith.addf %498, %492 : vector<8x128xf32>
    %500 = arith.addf %499, %493 : vector<8x128xf32>
    %501 = arith.addf %500, %494 : vector<8x128xf32>
    %502 = arith.mulf %482, %483 : vector<8x128xf32>
    %503 = arith.mulf %483, %486 : vector<8x128xf32>
    %504 = arith.addf %502, %503 : vector<8x128xf32>
    %505 = arith.mulf %484, %487 : vector<8x128xf32>
    %506 = arith.addf %504, %505 : vector<8x128xf32>
    %507 = arith.mulf %485, %488 : vector<8x128xf32>
    %508 = arith.addf %506, %507 : vector<8x128xf32>
    %509 = arith.mulf %482, %484 : vector<8x128xf32>
    %510 = arith.mulf %483, %487 : vector<8x128xf32>
    %511 = arith.addf %509, %510 : vector<8x128xf32>
    %512 = arith.mulf %484, %489 : vector<8x128xf32>
    %513 = arith.addf %511, %512 : vector<8x128xf32>
    %514 = arith.mulf %485, %490 : vector<8x128xf32>
    %515 = arith.addf %513, %514 : vector<8x128xf32>
    %516 = arith.mulf %482, %485 : vector<8x128xf32>
    %517 = arith.mulf %483, %488 : vector<8x128xf32>
    %518 = arith.addf %516, %517 : vector<8x128xf32>
    %519 = arith.mulf %484, %490 : vector<8x128xf32>
    %520 = arith.addf %518, %519 : vector<8x128xf32>
    %521 = arith.mulf %485, %491 : vector<8x128xf32>
    %522 = arith.addf %520, %521 : vector<8x128xf32>
    %523 = arith.mulf %486, %486 : vector<8x128xf32>
    %524 = arith.addf %492, %523 : vector<8x128xf32>
    %525 = arith.addf %524, %495 : vector<8x128xf32>
    %526 = arith.addf %525, %496 : vector<8x128xf32>
    %527 = arith.mulf %483, %484 : vector<8x128xf32>
    %528 = arith.mulf %486, %487 : vector<8x128xf32>
    %529 = arith.addf %527, %528 : vector<8x128xf32>
    %530 = arith.mulf %487, %489 : vector<8x128xf32>
    %531 = arith.addf %529, %530 : vector<8x128xf32>
    %532 = arith.mulf %488, %490 : vector<8x128xf32>
    %533 = arith.addf %531, %532 : vector<8x128xf32>
    %534 = arith.mulf %483, %485 : vector<8x128xf32>
    %535 = arith.mulf %486, %488 : vector<8x128xf32>
    %536 = arith.addf %534, %535 : vector<8x128xf32>
    %537 = arith.mulf %487, %490 : vector<8x128xf32>
    %538 = arith.addf %536, %537 : vector<8x128xf32>
    %539 = arith.mulf %488, %491 : vector<8x128xf32>
    %540 = arith.addf %538, %539 : vector<8x128xf32>
    %541 = arith.addf %493, %495 : vector<8x128xf32>
    %542 = arith.mulf %489, %489 : vector<8x128xf32>
    %543 = arith.addf %541, %542 : vector<8x128xf32>
    %544 = arith.addf %543, %497 : vector<8x128xf32>
    %545 = arith.mulf %484, %485 : vector<8x128xf32>
    %546 = arith.mulf %487, %488 : vector<8x128xf32>
    %547 = arith.addf %545, %546 : vector<8x128xf32>
    %548 = arith.mulf %489, %490 : vector<8x128xf32>
    %549 = arith.addf %547, %548 : vector<8x128xf32>
    %550 = arith.mulf %490, %491 : vector<8x128xf32>
    %551 = arith.addf %549, %550 : vector<8x128xf32>
    %552 = arith.addf %494, %496 : vector<8x128xf32>
    %553 = arith.addf %552, %497 : vector<8x128xf32>
    %554 = arith.mulf %491, %491 : vector<8x128xf32>
    %555 = arith.addf %553, %554 : vector<8x128xf32>
    %556 = arith.addf %501, %526 : vector<8x128xf32>
    %557 = arith.addf %556, %544 : vector<8x128xf32>
    %558 = arith.addf %557, %555 : vector<8x128xf32>
    %cst_14 = arith.constant 1.000000e-30 : f32
    %559 = vector.broadcast %cst_14 : f32 to vector<8x128xf32>
    %560 = arith.addf %558, %559 : vector<8x128xf32>
    %561 = tpu.reciprocal %560 {approx = true} : vector<8x128xf32> -> vector<8x128xf32>
    %562 = arith.mulf %501, %561 : vector<8x128xf32>
    %563 = arith.mulf %508, %561 : vector<8x128xf32>
    %564 = arith.mulf %515, %561 : vector<8x128xf32>
    %565 = arith.mulf %522, %561 : vector<8x128xf32>
    %566 = arith.mulf %526, %561 : vector<8x128xf32>
    %567 = arith.mulf %533, %561 : vector<8x128xf32>
    %568 = arith.mulf %540, %561 : vector<8x128xf32>
    %569 = arith.mulf %544, %561 : vector<8x128xf32>
    %570 = arith.mulf %551, %561 : vector<8x128xf32>
    %571 = arith.mulf %555, %561 : vector<8x128xf32>
    %572 = arith.mulf %563, %563 : vector<8x128xf32>
    %573 = arith.mulf %564, %564 : vector<8x128xf32>
    %574 = arith.mulf %565, %565 : vector<8x128xf32>
    %575 = arith.mulf %567, %567 : vector<8x128xf32>
    %576 = arith.mulf %568, %568 : vector<8x128xf32>
    %577 = arith.mulf %570, %570 : vector<8x128xf32>
    %578 = arith.mulf %562, %562 : vector<8x128xf32>
    %579 = arith.addf %578, %572 : vector<8x128xf32>
    %580 = arith.addf %579, %573 : vector<8x128xf32>
    %581 = arith.addf %580, %574 : vector<8x128xf32>
    %582 = arith.mulf %562, %563 : vector<8x128xf32>
    %583 = arith.mulf %563, %566 : vector<8x128xf32>
    %584 = arith.addf %582, %583 : vector<8x128xf32>
    %585 = arith.mulf %564, %567 : vector<8x128xf32>
    %586 = arith.addf %584, %585 : vector<8x128xf32>
    %587 = arith.mulf %565, %568 : vector<8x128xf32>
    %588 = arith.addf %586, %587 : vector<8x128xf32>
    %589 = arith.mulf %562, %564 : vector<8x128xf32>
    %590 = arith.mulf %563, %567 : vector<8x128xf32>
    %591 = arith.addf %589, %590 : vector<8x128xf32>
    %592 = arith.mulf %564, %569 : vector<8x128xf32>
    %593 = arith.addf %591, %592 : vector<8x128xf32>
    %594 = arith.mulf %565, %570 : vector<8x128xf32>
    %595 = arith.addf %593, %594 : vector<8x128xf32>
    %596 = arith.mulf %562, %565 : vector<8x128xf32>
    %597 = arith.mulf %563, %568 : vector<8x128xf32>
    %598 = arith.addf %596, %597 : vector<8x128xf32>
    %599 = arith.mulf %564, %570 : vector<8x128xf32>
    %600 = arith.addf %598, %599 : vector<8x128xf32>
    %601 = arith.mulf %565, %571 : vector<8x128xf32>
    %602 = arith.addf %600, %601 : vector<8x128xf32>
    %603 = arith.mulf %566, %566 : vector<8x128xf32>
    %604 = arith.addf %572, %603 : vector<8x128xf32>
    %605 = arith.addf %604, %575 : vector<8x128xf32>
    %606 = arith.addf %605, %576 : vector<8x128xf32>
    %607 = arith.mulf %563, %564 : vector<8x128xf32>
    %608 = arith.mulf %566, %567 : vector<8x128xf32>
    %609 = arith.addf %607, %608 : vector<8x128xf32>
    %610 = arith.mulf %567, %569 : vector<8x128xf32>
    %611 = arith.addf %609, %610 : vector<8x128xf32>
    %612 = arith.mulf %568, %570 : vector<8x128xf32>
    %613 = arith.addf %611, %612 : vector<8x128xf32>
    %614 = arith.mulf %563, %565 : vector<8x128xf32>
    %615 = arith.mulf %566, %568 : vector<8x128xf32>
    %616 = arith.addf %614, %615 : vector<8x128xf32>
    %617 = arith.mulf %567, %570 : vector<8x128xf32>
    %618 = arith.addf %616, %617 : vector<8x128xf32>
    %619 = arith.mulf %568, %571 : vector<8x128xf32>
    %620 = arith.addf %618, %619 : vector<8x128xf32>
    %621 = arith.addf %573, %575 : vector<8x128xf32>
    %622 = arith.mulf %569, %569 : vector<8x128xf32>
    %623 = arith.addf %621, %622 : vector<8x128xf32>
    %624 = arith.addf %623, %577 : vector<8x128xf32>
    %625 = arith.mulf %564, %565 : vector<8x128xf32>
    %626 = arith.mulf %567, %568 : vector<8x128xf32>
    %627 = arith.addf %625, %626 : vector<8x128xf32>
    %628 = arith.mulf %569, %570 : vector<8x128xf32>
    %629 = arith.addf %627, %628 : vector<8x128xf32>
    %630 = arith.mulf %570, %571 : vector<8x128xf32>
    %631 = arith.addf %629, %630 : vector<8x128xf32>
    %632 = arith.addf %574, %576 : vector<8x128xf32>
    %633 = arith.addf %632, %577 : vector<8x128xf32>
    %634 = arith.mulf %571, %571 : vector<8x128xf32>
    %635 = arith.addf %633, %634 : vector<8x128xf32>
    %636 = arith.addf %581, %606 : vector<8x128xf32>
    %637 = arith.addf %636, %624 : vector<8x128xf32>
    %638 = arith.addf %637, %635 : vector<8x128xf32>
    %cst_15 = arith.constant 1.000000e-30 : f32
    %639 = vector.broadcast %cst_15 : f32 to vector<8x128xf32>
    %640 = arith.addf %638, %639 : vector<8x128xf32>
    %641 = tpu.reciprocal %640 {approx = true} : vector<8x128xf32> -> vector<8x128xf32>
    %642 = arith.mulf %581, %641 : vector<8x128xf32>
    %643 = arith.mulf %588, %641 : vector<8x128xf32>
    %644 = arith.mulf %595, %641 : vector<8x128xf32>
    %645 = arith.mulf %602, %641 : vector<8x128xf32>
    %646 = arith.mulf %606, %641 : vector<8x128xf32>
    %647 = arith.mulf %613, %641 : vector<8x128xf32>
    %648 = arith.mulf %620, %641 : vector<8x128xf32>
    %649 = arith.mulf %624, %641 : vector<8x128xf32>
    %650 = arith.mulf %631, %641 : vector<8x128xf32>
    %651 = arith.mulf %635, %641 : vector<8x128xf32>
    %652 = arith.mulf %643, %643 : vector<8x128xf32>
    %653 = arith.mulf %644, %644 : vector<8x128xf32>
    %654 = arith.mulf %645, %645 : vector<8x128xf32>
    %655 = arith.mulf %647, %647 : vector<8x128xf32>
    %656 = arith.mulf %648, %648 : vector<8x128xf32>
    %657 = arith.mulf %650, %650 : vector<8x128xf32>
    %658 = arith.mulf %642, %642 : vector<8x128xf32>
    %659 = arith.addf %658, %652 : vector<8x128xf32>
    %660 = arith.addf %659, %653 : vector<8x128xf32>
    %661 = arith.addf %660, %654 : vector<8x128xf32>
    %662 = arith.mulf %642, %643 : vector<8x128xf32>
    %663 = arith.mulf %643, %646 : vector<8x128xf32>
    %664 = arith.addf %662, %663 : vector<8x128xf32>
    %665 = arith.mulf %644, %647 : vector<8x128xf32>
    %666 = arith.addf %664, %665 : vector<8x128xf32>
    %667 = arith.mulf %645, %648 : vector<8x128xf32>
    %668 = arith.addf %666, %667 : vector<8x128xf32>
    %669 = arith.mulf %642, %644 : vector<8x128xf32>
    %670 = arith.mulf %643, %647 : vector<8x128xf32>
    %671 = arith.addf %669, %670 : vector<8x128xf32>
    %672 = arith.mulf %644, %649 : vector<8x128xf32>
    %673 = arith.addf %671, %672 : vector<8x128xf32>
    %674 = arith.mulf %645, %650 : vector<8x128xf32>
    %675 = arith.addf %673, %674 : vector<8x128xf32>
    %676 = arith.mulf %642, %645 : vector<8x128xf32>
    %677 = arith.mulf %643, %648 : vector<8x128xf32>
    %678 = arith.addf %676, %677 : vector<8x128xf32>
    %679 = arith.mulf %644, %650 : vector<8x128xf32>
    %680 = arith.addf %678, %679 : vector<8x128xf32>
    %681 = arith.mulf %645, %651 : vector<8x128xf32>
    %682 = arith.addf %680, %681 : vector<8x128xf32>
    %683 = arith.mulf %646, %646 : vector<8x128xf32>
    %684 = arith.addf %652, %683 : vector<8x128xf32>
    %685 = arith.addf %684, %655 : vector<8x128xf32>
    %686 = arith.addf %685, %656 : vector<8x128xf32>
    %687 = arith.mulf %643, %644 : vector<8x128xf32>
    %688 = arith.mulf %646, %647 : vector<8x128xf32>
    %689 = arith.addf %687, %688 : vector<8x128xf32>
    %690 = arith.mulf %647, %649 : vector<8x128xf32>
    %691 = arith.addf %689, %690 : vector<8x128xf32>
    %692 = arith.mulf %648, %650 : vector<8x128xf32>
    %693 = arith.addf %691, %692 : vector<8x128xf32>
    %694 = arith.mulf %643, %645 : vector<8x128xf32>
    %695 = arith.mulf %646, %648 : vector<8x128xf32>
    %696 = arith.addf %694, %695 : vector<8x128xf32>
    %697 = arith.mulf %647, %650 : vector<8x128xf32>
    %698 = arith.addf %696, %697 : vector<8x128xf32>
    %699 = arith.mulf %648, %651 : vector<8x128xf32>
    %700 = arith.addf %698, %699 : vector<8x128xf32>
    %701 = arith.addf %653, %655 : vector<8x128xf32>
    %702 = arith.mulf %649, %649 : vector<8x128xf32>
    %703 = arith.addf %701, %702 : vector<8x128xf32>
    %704 = arith.addf %703, %657 : vector<8x128xf32>
    %705 = arith.mulf %644, %645 : vector<8x128xf32>
    %706 = arith.mulf %647, %648 : vector<8x128xf32>
    %707 = arith.addf %705, %706 : vector<8x128xf32>
    %708 = arith.mulf %649, %650 : vector<8x128xf32>
    %709 = arith.addf %707, %708 : vector<8x128xf32>
    %710 = arith.mulf %650, %651 : vector<8x128xf32>
    %711 = arith.addf %709, %710 : vector<8x128xf32>
    %712 = arith.addf %654, %656 : vector<8x128xf32>
    %713 = arith.addf %712, %657 : vector<8x128xf32>
    %714 = arith.mulf %651, %651 : vector<8x128xf32>
    %715 = arith.addf %713, %714 : vector<8x128xf32>
    %716 = arith.addf %661, %686 : vector<8x128xf32>
    %717 = arith.addf %716, %704 : vector<8x128xf32>
    %718 = arith.addf %717, %715 : vector<8x128xf32>
    %cst_16 = arith.constant 1.000000e-30 : f32
    %719 = vector.broadcast %cst_16 : f32 to vector<8x128xf32>
    %720 = arith.addf %718, %719 : vector<8x128xf32>
    %721 = tpu.reciprocal %720 {approx = true} : vector<8x128xf32> -> vector<8x128xf32>
    %722 = arith.mulf %661, %721 : vector<8x128xf32>
    %723 = arith.mulf %668, %721 : vector<8x128xf32>
    %724 = arith.mulf %675, %721 : vector<8x128xf32>
    %725 = arith.mulf %682, %721 : vector<8x128xf32>
    %726 = arith.mulf %686, %721 : vector<8x128xf32>
    %727 = arith.mulf %693, %721 : vector<8x128xf32>
    %728 = arith.mulf %700, %721 : vector<8x128xf32>
    %729 = arith.mulf %704, %721 : vector<8x128xf32>
    %730 = arith.mulf %711, %721 : vector<8x128xf32>
    %731 = arith.mulf %715, %721 : vector<8x128xf32>
    %732 = arith.mulf %723, %723 : vector<8x128xf32>
    %733 = arith.mulf %724, %724 : vector<8x128xf32>
    %734 = arith.mulf %725, %725 : vector<8x128xf32>
    %735 = arith.mulf %727, %727 : vector<8x128xf32>
    %736 = arith.mulf %728, %728 : vector<8x128xf32>
    %737 = arith.mulf %730, %730 : vector<8x128xf32>
    %738 = arith.mulf %722, %722 : vector<8x128xf32>
    %739 = arith.addf %738, %732 : vector<8x128xf32>
    %740 = arith.addf %739, %733 : vector<8x128xf32>
    %741 = arith.addf %740, %734 : vector<8x128xf32>
    %742 = arith.mulf %722, %723 : vector<8x128xf32>
    %743 = arith.mulf %723, %726 : vector<8x128xf32>
    %744 = arith.addf %742, %743 : vector<8x128xf32>
    %745 = arith.mulf %724, %727 : vector<8x128xf32>
    %746 = arith.addf %744, %745 : vector<8x128xf32>
    %747 = arith.mulf %725, %728 : vector<8x128xf32>
    %748 = arith.addf %746, %747 : vector<8x128xf32>
    %749 = arith.mulf %722, %724 : vector<8x128xf32>
    %750 = arith.mulf %723, %727 : vector<8x128xf32>
    %751 = arith.addf %749, %750 : vector<8x128xf32>
    %752 = arith.mulf %724, %729 : vector<8x128xf32>
    %753 = arith.addf %751, %752 : vector<8x128xf32>
    %754 = arith.mulf %725, %730 : vector<8x128xf32>
    %755 = arith.addf %753, %754 : vector<8x128xf32>
    %756 = arith.mulf %722, %725 : vector<8x128xf32>
    %757 = arith.mulf %723, %728 : vector<8x128xf32>
    %758 = arith.addf %756, %757 : vector<8x128xf32>
    %759 = arith.mulf %724, %730 : vector<8x128xf32>
    %760 = arith.addf %758, %759 : vector<8x128xf32>
    %761 = arith.mulf %725, %731 : vector<8x128xf32>
    %762 = arith.addf %760, %761 : vector<8x128xf32>
    %763 = arith.mulf %726, %726 : vector<8x128xf32>
    %764 = arith.addf %732, %763 : vector<8x128xf32>
    %765 = arith.addf %764, %735 : vector<8x128xf32>
    %766 = arith.addf %765, %736 : vector<8x128xf32>
    %767 = arith.mulf %723, %724 : vector<8x128xf32>
    %768 = arith.mulf %726, %727 : vector<8x128xf32>
    %769 = arith.addf %767, %768 : vector<8x128xf32>
    %770 = arith.mulf %727, %729 : vector<8x128xf32>
    %771 = arith.addf %769, %770 : vector<8x128xf32>
    %772 = arith.mulf %728, %730 : vector<8x128xf32>
    %773 = arith.addf %771, %772 : vector<8x128xf32>
    %774 = arith.mulf %723, %725 : vector<8x128xf32>
    %775 = arith.mulf %726, %728 : vector<8x128xf32>
    %776 = arith.addf %774, %775 : vector<8x128xf32>
    %777 = arith.mulf %727, %730 : vector<8x128xf32>
    %778 = arith.addf %776, %777 : vector<8x128xf32>
    %779 = arith.mulf %728, %731 : vector<8x128xf32>
    %780 = arith.addf %778, %779 : vector<8x128xf32>
    %781 = arith.addf %733, %735 : vector<8x128xf32>
    %782 = arith.mulf %729, %729 : vector<8x128xf32>
    %783 = arith.addf %781, %782 : vector<8x128xf32>
    %784 = arith.addf %783, %737 : vector<8x128xf32>
    %785 = arith.mulf %724, %725 : vector<8x128xf32>
    %786 = arith.mulf %727, %728 : vector<8x128xf32>
    %787 = arith.addf %785, %786 : vector<8x128xf32>
    %788 = arith.mulf %729, %730 : vector<8x128xf32>
    %789 = arith.addf %787, %788 : vector<8x128xf32>
    %790 = arith.mulf %730, %731 : vector<8x128xf32>
    %791 = arith.addf %789, %790 : vector<8x128xf32>
    %792 = arith.addf %734, %736 : vector<8x128xf32>
    %793 = arith.addf %792, %737 : vector<8x128xf32>
    %794 = arith.mulf %731, %731 : vector<8x128xf32>
    %795 = arith.addf %793, %794 : vector<8x128xf32>
    %796 = arith.addf %741, %766 : vector<8x128xf32>
    %797 = arith.addf %796, %784 : vector<8x128xf32>
    %798 = arith.addf %797, %795 : vector<8x128xf32>
    %cst_17 = arith.constant 1.000000e-30 : f32
    %799 = vector.broadcast %cst_17 : f32 to vector<8x128xf32>
    %800 = arith.addf %798, %799 : vector<8x128xf32>
    %801 = tpu.reciprocal %800 {approx = true} : vector<8x128xf32> -> vector<8x128xf32>
    %802 = arith.mulf %741, %801 : vector<8x128xf32>
    %803 = arith.mulf %748, %801 : vector<8x128xf32>
    %804 = arith.mulf %755, %801 : vector<8x128xf32>
    %805 = arith.mulf %762, %801 : vector<8x128xf32>
    %806 = arith.mulf %766, %801 : vector<8x128xf32>
    %807 = arith.mulf %773, %801 : vector<8x128xf32>
    %808 = arith.mulf %780, %801 : vector<8x128xf32>
    %809 = arith.mulf %784, %801 : vector<8x128xf32>
    %810 = arith.mulf %791, %801 : vector<8x128xf32>
    %811 = arith.mulf %795, %801 : vector<8x128xf32>
    %812 = arith.mulf %803, %803 : vector<8x128xf32>
    %813 = arith.mulf %804, %804 : vector<8x128xf32>
    %814 = arith.mulf %805, %805 : vector<8x128xf32>
    %815 = arith.mulf %807, %807 : vector<8x128xf32>
    %816 = arith.mulf %808, %808 : vector<8x128xf32>
    %817 = arith.mulf %810, %810 : vector<8x128xf32>
    %818 = arith.mulf %802, %802 : vector<8x128xf32>
    %819 = arith.addf %818, %812 : vector<8x128xf32>
    %820 = arith.addf %819, %813 : vector<8x128xf32>
    %821 = arith.addf %820, %814 : vector<8x128xf32>
    %822 = arith.mulf %802, %803 : vector<8x128xf32>
    %823 = arith.mulf %803, %806 : vector<8x128xf32>
    %824 = arith.addf %822, %823 : vector<8x128xf32>
    %825 = arith.mulf %804, %807 : vector<8x128xf32>
    %826 = arith.addf %824, %825 : vector<8x128xf32>
    %827 = arith.mulf %805, %808 : vector<8x128xf32>
    %828 = arith.addf %826, %827 : vector<8x128xf32>
    %829 = arith.mulf %802, %804 : vector<8x128xf32>
    %830 = arith.mulf %803, %807 : vector<8x128xf32>
    %831 = arith.addf %829, %830 : vector<8x128xf32>
    %832 = arith.mulf %804, %809 : vector<8x128xf32>
    %833 = arith.addf %831, %832 : vector<8x128xf32>
    %834 = arith.mulf %805, %810 : vector<8x128xf32>
    %835 = arith.addf %833, %834 : vector<8x128xf32>
    %836 = arith.mulf %802, %805 : vector<8x128xf32>
    %837 = arith.mulf %803, %808 : vector<8x128xf32>
    %838 = arith.addf %836, %837 : vector<8x128xf32>
    %839 = arith.mulf %804, %810 : vector<8x128xf32>
    %840 = arith.addf %838, %839 : vector<8x128xf32>
    %841 = arith.mulf %805, %811 : vector<8x128xf32>
    %842 = arith.addf %840, %841 : vector<8x128xf32>
    %843 = arith.mulf %806, %806 : vector<8x128xf32>
    %844 = arith.addf %812, %843 : vector<8x128xf32>
    %845 = arith.addf %844, %815 : vector<8x128xf32>
    %846 = arith.addf %845, %816 : vector<8x128xf32>
    %847 = arith.mulf %803, %804 : vector<8x128xf32>
    %848 = arith.mulf %806, %807 : vector<8x128xf32>
    %849 = arith.addf %847, %848 : vector<8x128xf32>
    %850 = arith.mulf %807, %809 : vector<8x128xf32>
    %851 = arith.addf %849, %850 : vector<8x128xf32>
    %852 = arith.mulf %808, %810 : vector<8x128xf32>
    %853 = arith.addf %851, %852 : vector<8x128xf32>
    %854 = arith.mulf %803, %805 : vector<8x128xf32>
    %855 = arith.mulf %806, %808 : vector<8x128xf32>
    %856 = arith.addf %854, %855 : vector<8x128xf32>
    %857 = arith.mulf %807, %810 : vector<8x128xf32>
    %858 = arith.addf %856, %857 : vector<8x128xf32>
    %859 = arith.mulf %808, %811 : vector<8x128xf32>
    %860 = arith.addf %858, %859 : vector<8x128xf32>
    %861 = arith.addf %813, %815 : vector<8x128xf32>
    %862 = arith.mulf %809, %809 : vector<8x128xf32>
    %863 = arith.addf %861, %862 : vector<8x128xf32>
    %864 = arith.addf %863, %817 : vector<8x128xf32>
    %865 = arith.mulf %804, %805 : vector<8x128xf32>
    %866 = arith.mulf %807, %808 : vector<8x128xf32>
    %867 = arith.addf %865, %866 : vector<8x128xf32>
    %868 = arith.mulf %809, %810 : vector<8x128xf32>
    %869 = arith.addf %867, %868 : vector<8x128xf32>
    %870 = arith.mulf %810, %811 : vector<8x128xf32>
    %871 = arith.addf %869, %870 : vector<8x128xf32>
    %872 = arith.addf %814, %816 : vector<8x128xf32>
    %873 = arith.addf %872, %817 : vector<8x128xf32>
    %874 = arith.mulf %811, %811 : vector<8x128xf32>
    %875 = arith.addf %873, %874 : vector<8x128xf32>
    %876 = arith.addf %821, %846 : vector<8x128xf32>
    %877 = arith.addf %876, %864 : vector<8x128xf32>
    %878 = arith.addf %877, %875 : vector<8x128xf32>
    %cst_18 = arith.constant 1.000000e-30 : f32
    %879 = vector.broadcast %cst_18 : f32 to vector<8x128xf32>
    %880 = arith.addf %878, %879 : vector<8x128xf32>
    %881 = tpu.reciprocal %880 {approx = true} : vector<8x128xf32> -> vector<8x128xf32>
    %882 = arith.mulf %821, %881 : vector<8x128xf32>
    %883 = arith.mulf %828, %881 : vector<8x128xf32>
    %884 = arith.mulf %835, %881 : vector<8x128xf32>
    %885 = arith.mulf %842, %881 : vector<8x128xf32>
    %886 = arith.mulf %846, %881 : vector<8x128xf32>
    %887 = arith.mulf %853, %881 : vector<8x128xf32>
    %888 = arith.mulf %860, %881 : vector<8x128xf32>
    %889 = arith.mulf %864, %881 : vector<8x128xf32>
    %890 = arith.mulf %871, %881 : vector<8x128xf32>
    %891 = arith.mulf %875, %881 : vector<8x128xf32>
    %892 = arith.mulf %883, %883 : vector<8x128xf32>
    %893 = arith.mulf %884, %884 : vector<8x128xf32>
    %894 = arith.mulf %885, %885 : vector<8x128xf32>
    %895 = arith.mulf %887, %887 : vector<8x128xf32>
    %896 = arith.mulf %888, %888 : vector<8x128xf32>
    %897 = arith.mulf %890, %890 : vector<8x128xf32>
    %898 = arith.mulf %882, %882 : vector<8x128xf32>
    %899 = arith.addf %898, %892 : vector<8x128xf32>
    %900 = arith.addf %899, %893 : vector<8x128xf32>
    %901 = arith.addf %900, %894 : vector<8x128xf32>
    %902 = arith.mulf %882, %883 : vector<8x128xf32>
    %903 = arith.mulf %883, %886 : vector<8x128xf32>
    %904 = arith.addf %902, %903 : vector<8x128xf32>
    %905 = arith.mulf %884, %887 : vector<8x128xf32>
    %906 = arith.addf %904, %905 : vector<8x128xf32>
    %907 = arith.mulf %885, %888 : vector<8x128xf32>
    %908 = arith.addf %906, %907 : vector<8x128xf32>
    %909 = arith.mulf %882, %884 : vector<8x128xf32>
    %910 = arith.mulf %883, %887 : vector<8x128xf32>
    %911 = arith.addf %909, %910 : vector<8x128xf32>
    %912 = arith.mulf %884, %889 : vector<8x128xf32>
    %913 = arith.addf %911, %912 : vector<8x128xf32>
    %914 = arith.mulf %885, %890 : vector<8x128xf32>
    %915 = arith.addf %913, %914 : vector<8x128xf32>
    %916 = arith.mulf %882, %885 : vector<8x128xf32>
    %917 = arith.mulf %883, %888 : vector<8x128xf32>
    %918 = arith.addf %916, %917 : vector<8x128xf32>
    %919 = arith.mulf %884, %890 : vector<8x128xf32>
    %920 = arith.addf %918, %919 : vector<8x128xf32>
    %921 = arith.mulf %885, %891 : vector<8x128xf32>
    %922 = arith.addf %920, %921 : vector<8x128xf32>
    %923 = arith.mulf %886, %886 : vector<8x128xf32>
    %924 = arith.addf %892, %923 : vector<8x128xf32>
    %925 = arith.addf %924, %895 : vector<8x128xf32>
    %926 = arith.addf %925, %896 : vector<8x128xf32>
    %927 = arith.mulf %883, %884 : vector<8x128xf32>
    %928 = arith.mulf %886, %887 : vector<8x128xf32>
    %929 = arith.addf %927, %928 : vector<8x128xf32>
    %930 = arith.mulf %887, %889 : vector<8x128xf32>
    %931 = arith.addf %929, %930 : vector<8x128xf32>
    %932 = arith.mulf %888, %890 : vector<8x128xf32>
    %933 = arith.addf %931, %932 : vector<8x128xf32>
    %934 = arith.mulf %883, %885 : vector<8x128xf32>
    %935 = arith.mulf %886, %888 : vector<8x128xf32>
    %936 = arith.addf %934, %935 : vector<8x128xf32>
    %937 = arith.mulf %887, %890 : vector<8x128xf32>
    %938 = arith.addf %936, %937 : vector<8x128xf32>
    %939 = arith.mulf %888, %891 : vector<8x128xf32>
    %940 = arith.addf %938, %939 : vector<8x128xf32>
    %941 = arith.addf %893, %895 : vector<8x128xf32>
    %942 = arith.mulf %889, %889 : vector<8x128xf32>
    %943 = arith.addf %941, %942 : vector<8x128xf32>
    %944 = arith.addf %943, %897 : vector<8x128xf32>
    %945 = arith.mulf %884, %885 : vector<8x128xf32>
    %946 = arith.mulf %887, %888 : vector<8x128xf32>
    %947 = arith.addf %945, %946 : vector<8x128xf32>
    %948 = arith.mulf %889, %890 : vector<8x128xf32>
    %949 = arith.addf %947, %948 : vector<8x128xf32>
    %950 = arith.mulf %890, %891 : vector<8x128xf32>
    %951 = arith.addf %949, %950 : vector<8x128xf32>
    %952 = arith.addf %894, %896 : vector<8x128xf32>
    %953 = arith.addf %952, %897 : vector<8x128xf32>
    %954 = arith.mulf %891, %891 : vector<8x128xf32>
    %955 = arith.addf %953, %954 : vector<8x128xf32>
    %956 = arith.addf %901, %926 : vector<8x128xf32>
    %957 = arith.addf %956, %944 : vector<8x128xf32>
    %958 = arith.addf %957, %955 : vector<8x128xf32>
    %cst_19 = arith.constant 1.000000e-30 : f32
    %959 = vector.broadcast %cst_19 : f32 to vector<8x128xf32>
    %960 = arith.addf %958, %959 : vector<8x128xf32>
    %961 = tpu.reciprocal %960 {approx = true} : vector<8x128xf32> -> vector<8x128xf32>
    %962 = arith.mulf %901, %961 : vector<8x128xf32>
    %963 = arith.mulf %908, %961 : vector<8x128xf32>
    %964 = arith.mulf %915, %961 : vector<8x128xf32>
    %965 = arith.mulf %922, %961 : vector<8x128xf32>
    %966 = arith.mulf %926, %961 : vector<8x128xf32>
    %967 = arith.mulf %933, %961 : vector<8x128xf32>
    %968 = arith.mulf %940, %961 : vector<8x128xf32>
    %969 = arith.mulf %944, %961 : vector<8x128xf32>
    %970 = arith.mulf %951, %961 : vector<8x128xf32>
    %971 = arith.mulf %955, %961 : vector<8x128xf32>
    %972 = arith.mulf %963, %963 : vector<8x128xf32>
    %973 = arith.mulf %964, %964 : vector<8x128xf32>
    %974 = arith.mulf %965, %965 : vector<8x128xf32>
    %975 = arith.mulf %967, %967 : vector<8x128xf32>
    %976 = arith.mulf %968, %968 : vector<8x128xf32>
    %977 = arith.mulf %970, %970 : vector<8x128xf32>
    %978 = arith.mulf %962, %962 : vector<8x128xf32>
    %979 = arith.addf %978, %972 : vector<8x128xf32>
    %980 = arith.addf %979, %973 : vector<8x128xf32>
    %981 = arith.addf %980, %974 : vector<8x128xf32>
    %982 = arith.mulf %962, %963 : vector<8x128xf32>
    %983 = arith.mulf %963, %966 : vector<8x128xf32>
    %984 = arith.addf %982, %983 : vector<8x128xf32>
    %985 = arith.mulf %964, %967 : vector<8x128xf32>
    %986 = arith.addf %984, %985 : vector<8x128xf32>
    %987 = arith.mulf %965, %968 : vector<8x128xf32>
    %988 = arith.addf %986, %987 : vector<8x128xf32>
    %989 = arith.mulf %962, %964 : vector<8x128xf32>
    %990 = arith.mulf %963, %967 : vector<8x128xf32>
    %991 = arith.addf %989, %990 : vector<8x128xf32>
    %992 = arith.mulf %964, %969 : vector<8x128xf32>
    %993 = arith.addf %991, %992 : vector<8x128xf32>
    %994 = arith.mulf %965, %970 : vector<8x128xf32>
    %995 = arith.addf %993, %994 : vector<8x128xf32>
    %996 = arith.mulf %962, %965 : vector<8x128xf32>
    %997 = arith.mulf %963, %968 : vector<8x128xf32>
    %998 = arith.addf %996, %997 : vector<8x128xf32>
    %999 = arith.mulf %964, %970 : vector<8x128xf32>
    %1000 = arith.addf %998, %999 : vector<8x128xf32>
    %1001 = arith.mulf %965, %971 : vector<8x128xf32>
    %1002 = arith.addf %1000, %1001 : vector<8x128xf32>
    %1003 = arith.mulf %966, %966 : vector<8x128xf32>
    %1004 = arith.addf %972, %1003 : vector<8x128xf32>
    %1005 = arith.addf %1004, %975 : vector<8x128xf32>
    %1006 = arith.addf %1005, %976 : vector<8x128xf32>
    %1007 = arith.mulf %963, %964 : vector<8x128xf32>
    %1008 = arith.mulf %966, %967 : vector<8x128xf32>
    %1009 = arith.addf %1007, %1008 : vector<8x128xf32>
    %1010 = arith.mulf %967, %969 : vector<8x128xf32>
    %1011 = arith.addf %1009, %1010 : vector<8x128xf32>
    %1012 = arith.mulf %968, %970 : vector<8x128xf32>
    %1013 = arith.addf %1011, %1012 : vector<8x128xf32>
    %1014 = arith.mulf %963, %965 : vector<8x128xf32>
    %1015 = arith.mulf %966, %968 : vector<8x128xf32>
    %1016 = arith.addf %1014, %1015 : vector<8x128xf32>
    %1017 = arith.mulf %967, %970 : vector<8x128xf32>
    %1018 = arith.addf %1016, %1017 : vector<8x128xf32>
    %1019 = arith.mulf %968, %971 : vector<8x128xf32>
    %1020 = arith.addf %1018, %1019 : vector<8x128xf32>
    %1021 = arith.addf %973, %975 : vector<8x128xf32>
    %1022 = arith.mulf %969, %969 : vector<8x128xf32>
    %1023 = arith.addf %1021, %1022 : vector<8x128xf32>
    %1024 = arith.addf %1023, %977 : vector<8x128xf32>
    %1025 = arith.mulf %964, %965 : vector<8x128xf32>
    %1026 = arith.mulf %967, %968 : vector<8x128xf32>
    %1027 = arith.addf %1025, %1026 : vector<8x128xf32>
    %1028 = arith.mulf %969, %970 : vector<8x128xf32>
    %1029 = arith.addf %1027, %1028 : vector<8x128xf32>
    %1030 = arith.mulf %970, %971 : vector<8x128xf32>
    %1031 = arith.addf %1029, %1030 : vector<8x128xf32>
    %1032 = arith.addf %974, %976 : vector<8x128xf32>
    %1033 = arith.addf %1032, %977 : vector<8x128xf32>
    %1034 = arith.mulf %971, %971 : vector<8x128xf32>
    %1035 = arith.addf %1033, %1034 : vector<8x128xf32>
    %1036 = arith.addf %981, %1006 : vector<8x128xf32>
    %1037 = arith.addf %1036, %1024 : vector<8x128xf32>
    %1038 = arith.addf %1037, %1035 : vector<8x128xf32>
    %cst_20 = arith.constant 1.000000e-30 : f32
    %1039 = vector.broadcast %cst_20 : f32 to vector<8x128xf32>
    %1040 = arith.addf %1038, %1039 : vector<8x128xf32>
    %1041 = tpu.reciprocal %1040 {approx = true} : vector<8x128xf32> -> vector<8x128xf32>
    %1042 = arith.mulf %981, %1041 : vector<8x128xf32>
    %1043 = arith.mulf %988, %1041 : vector<8x128xf32>
    %1044 = arith.mulf %995, %1041 : vector<8x128xf32>
    %1045 = arith.mulf %1002, %1041 : vector<8x128xf32>
    %1046 = arith.mulf %1006, %1041 : vector<8x128xf32>
    %1047 = arith.mulf %1013, %1041 : vector<8x128xf32>
    %1048 = arith.mulf %1020, %1041 : vector<8x128xf32>
    %1049 = arith.mulf %1024, %1041 : vector<8x128xf32>
    %1050 = arith.mulf %1031, %1041 : vector<8x128xf32>
    %1051 = arith.mulf %1035, %1041 : vector<8x128xf32>
    %1052 = arith.cmpf oge, %1042, %1046 : vector<8x128xf32>
    %1053 = arith.select %1052, %1042, %1043 : vector<8x128xi1>, vector<8x128xf32>
    %1054 = arith.select %1052, %1043, %1046 : vector<8x128xi1>, vector<8x128xf32>
    %1055 = arith.select %1052, %1044, %1047 : vector<8x128xi1>, vector<8x128xf32>
    %1056 = arith.select %1052, %1045, %1048 : vector<8x128xi1>, vector<8x128xf32>
    %1057 = arith.select %1052, %1042, %1046 : vector<8x128xi1>, vector<8x128xf32>
    %1058 = arith.cmpf oge, %1049, %1051 : vector<8x128xf32>
    %1059 = arith.select %1058, %1044, %1045 : vector<8x128xi1>, vector<8x128xf32>
    %1060 = arith.select %1058, %1047, %1048 : vector<8x128xi1>, vector<8x128xf32>
    %1061 = arith.select %1058, %1049, %1050 : vector<8x128xi1>, vector<8x128xf32>
    %1062 = arith.select %1058, %1050, %1051 : vector<8x128xi1>, vector<8x128xf32>
    %1063 = arith.select %1058, %1049, %1051 : vector<8x128xi1>, vector<8x128xf32>
    %1064 = arith.cmpf oge, %1057, %1063 : vector<8x128xf32>
    %1065 = arith.select %1064, %1053, %1059 : vector<8x128xi1>, vector<8x128xf32>
    %1066 = arith.select %1064, %1054, %1060 : vector<8x128xi1>, vector<8x128xf32>
    %1067 = arith.select %1064, %1055, %1061 : vector<8x128xi1>, vector<8x128xf32>
    %1068 = arith.select %1064, %1056, %1062 : vector<8x128xi1>, vector<8x128xf32>
    %1069 = arith.mulf %1042, %1065 : vector<8x128xf32>
    %1070 = arith.mulf %1043, %1066 : vector<8x128xf32>
    %1071 = arith.addf %1069, %1070 : vector<8x128xf32>
    %1072 = arith.mulf %1044, %1067 : vector<8x128xf32>
    %1073 = arith.addf %1071, %1072 : vector<8x128xf32>
    %1074 = arith.mulf %1045, %1068 : vector<8x128xf32>
    %1075 = arith.addf %1073, %1074 : vector<8x128xf32>
    %1076 = arith.mulf %1043, %1065 : vector<8x128xf32>
    %1077 = arith.mulf %1046, %1066 : vector<8x128xf32>
    %1078 = arith.addf %1076, %1077 : vector<8x128xf32>
    %1079 = arith.mulf %1047, %1067 : vector<8x128xf32>
    %1080 = arith.addf %1078, %1079 : vector<8x128xf32>
    %1081 = arith.mulf %1048, %1068 : vector<8x128xf32>
    %1082 = arith.addf %1080, %1081 : vector<8x128xf32>
    %1083 = arith.mulf %1044, %1065 : vector<8x128xf32>
    %1084 = arith.mulf %1047, %1066 : vector<8x128xf32>
    %1085 = arith.addf %1083, %1084 : vector<8x128xf32>
    %1086 = arith.mulf %1049, %1067 : vector<8x128xf32>
    %1087 = arith.addf %1085, %1086 : vector<8x128xf32>
    %1088 = arith.mulf %1050, %1068 : vector<8x128xf32>
    %1089 = arith.addf %1087, %1088 : vector<8x128xf32>
    %1090 = arith.mulf %1045, %1065 : vector<8x128xf32>
    %1091 = arith.mulf %1048, %1066 : vector<8x128xf32>
    %1092 = arith.addf %1090, %1091 : vector<8x128xf32>
    %1093 = arith.mulf %1050, %1067 : vector<8x128xf32>
    %1094 = arith.addf %1092, %1093 : vector<8x128xf32>
    %1095 = arith.mulf %1051, %1068 : vector<8x128xf32>
    %1096 = arith.addf %1094, %1095 : vector<8x128xf32>
    %1097 = arith.mulf %1042, %1075 : vector<8x128xf32>
    %1098 = arith.mulf %1043, %1082 : vector<8x128xf32>
    %1099 = arith.addf %1097, %1098 : vector<8x128xf32>
    %1100 = arith.mulf %1044, %1089 : vector<8x128xf32>
    %1101 = arith.addf %1099, %1100 : vector<8x128xf32>
    %1102 = arith.mulf %1045, %1096 : vector<8x128xf32>
    %1103 = arith.addf %1101, %1102 : vector<8x128xf32>
    %1104 = arith.mulf %1043, %1075 : vector<8x128xf32>
    %1105 = arith.mulf %1046, %1082 : vector<8x128xf32>
    %1106 = arith.addf %1104, %1105 : vector<8x128xf32>
    %1107 = arith.mulf %1047, %1089 : vector<8x128xf32>
    %1108 = arith.addf %1106, %1107 : vector<8x128xf32>
    %1109 = arith.mulf %1048, %1096 : vector<8x128xf32>
    %1110 = arith.addf %1108, %1109 : vector<8x128xf32>
    %1111 = arith.mulf %1044, %1075 : vector<8x128xf32>
    %1112 = arith.mulf %1047, %1082 : vector<8x128xf32>
    %1113 = arith.addf %1111, %1112 : vector<8x128xf32>
    %1114 = arith.mulf %1049, %1089 : vector<8x128xf32>
    %1115 = arith.addf %1113, %1114 : vector<8x128xf32>
    %1116 = arith.mulf %1050, %1096 : vector<8x128xf32>
    %1117 = arith.addf %1115, %1116 : vector<8x128xf32>
    %1118 = arith.mulf %1045, %1075 : vector<8x128xf32>
    %1119 = arith.mulf %1048, %1082 : vector<8x128xf32>
    %1120 = arith.addf %1118, %1119 : vector<8x128xf32>
    %1121 = arith.mulf %1050, %1089 : vector<8x128xf32>
    %1122 = arith.addf %1120, %1121 : vector<8x128xf32>
    %1123 = arith.mulf %1051, %1096 : vector<8x128xf32>
    %1124 = arith.addf %1122, %1123 : vector<8x128xf32>
    %cst_21 = arith.constant 9.99999996E-13 : f32
    %1125 = vector.broadcast %cst_21 : f32 to vector<8x128xf32>
    %1126 = arith.addf %1103, %1125 : vector<8x128xf32>
    %1127 = arith.mulf %1126, %1126 : vector<8x128xf32>
    %1128 = arith.mulf %1110, %1110 : vector<8x128xf32>
    %1129 = arith.addf %1127, %1128 : vector<8x128xf32>
    %1130 = arith.mulf %1117, %1117 : vector<8x128xf32>
    %1131 = arith.addf %1129, %1130 : vector<8x128xf32>
    %1132 = arith.mulf %1124, %1124 : vector<8x128xf32>
    %1133 = arith.addf %1131, %1132 : vector<8x128xf32>
    %cst_22 = arith.constant 1.000000e-30 : f32
    %1134 = vector.broadcast %cst_22 : f32 to vector<8x128xf32>
    %1135 = arith.addf %1133, %1134 : vector<8x128xf32>
    %1136 = math.rsqrt %1135 : vector<8x128xf32>
    %1137 = arith.mulf %1126, %1136 : vector<8x128xf32>
    %1138 = arith.mulf %1110, %1136 : vector<8x128xf32>
    %1139 = arith.mulf %1117, %1136 : vector<8x128xf32>
    %1140 = arith.mulf %1124, %1136 : vector<8x128xf32>
    %1141 = arith.mulf %1137, %1137 : vector<8x128xf32>
    %1142 = arith.mulf %1138, %1138 : vector<8x128xf32>
    %1143 = arith.mulf %1139, %1139 : vector<8x128xf32>
    %1144 = arith.mulf %1140, %1140 : vector<8x128xf32>
    %1145 = arith.mulf %1137, %1138 : vector<8x128xf32>
    %1146 = arith.mulf %1137, %1139 : vector<8x128xf32>
    %1147 = arith.mulf %1137, %1140 : vector<8x128xf32>
    %1148 = arith.mulf %1138, %1139 : vector<8x128xf32>
    %1149 = arith.mulf %1138, %1140 : vector<8x128xf32>
    %1150 = arith.mulf %1139, %1140 : vector<8x128xf32>
    %1151 = arith.addf %1141, %1142 : vector<8x128xf32>
    %1152 = arith.subf %1151, %1143 : vector<8x128xf32>
    %1153 = arith.subf %1152, %1144 : vector<8x128xf32>
    %c0_23 = arith.constant 0 : index
    %c0_24 = arith.constant 0 : index
    %c0_25 = arith.constant 0 : index
    %1154 = vector.load %arg2[%c0_23, %c0_24, %c0_25] : memref<9x8x128xf32, #tpu.memory_space<vmem>>, vector<1x8x128xf32>
    %1155 = vector.shape_cast %1154 : vector<1x8x128xf32> to vector<8x128xf32>
    %1156 = vector.shape_cast %1153 : vector<8x128xf32> to vector<1x8x128xf32>
    tpu.vector_store %arg2[%c0_23, %c0_24, %c0_25], %1156 {strides = array<i32>} : memref<9x8x128xf32, #tpu.memory_space<vmem>>, vector<1x8x128xf32>,
    %1157 = arith.subf %1148, %1147 : vector<8x128xf32>
    %cst_26 = arith.constant 2.000000e+00 : f32
    %1158 = vector.broadcast %cst_26 : f32 to vector<8x128xf32>
    %1159 = arith.mulf %1158, %1157 : vector<8x128xf32>
    %c1 = arith.constant 1 : index
    %c0_27 = arith.constant 0 : index
    %c0_28 = arith.constant 0 : index
    %1160 = vector.load %arg2[%c1, %c0_27, %c0_28] : memref<9x8x128xf32, #tpu.memory_space<vmem>>, vector<1x8x128xf32>
    %1161 = vector.shape_cast %1160 : vector<1x8x128xf32> to vector<8x128xf32>
    %1162 = vector.shape_cast %1159 : vector<8x128xf32> to vector<1x8x128xf32>
    tpu.vector_store %arg2[%c1, %c0_27, %c0_28], %1162 {strides = array<i32>} : memref<9x8x128xf32, #tpu.memory_space<vmem>>, vector<1x8x128xf32>,
    %1163 = arith.addf %1149, %1146 : vector<8x128xf32>
    %cst_29 = arith.constant 2.000000e+00 : f32
    %1164 = vector.broadcast %cst_29 : f32 to vector<8x128xf32>
    %1165 = arith.mulf %1164, %1163 : vector<8x128xf32>
    %c2 = arith.constant 2 : index
    %c0_30 = arith.constant 0 : index
    %c0_31 = arith.constant 0 : index
    %1166 = vector.load %arg2[%c2, %c0_30, %c0_31] : memref<9x8x128xf32, #tpu.memory_space<vmem>>, vector<1x8x128xf32>
    %1167 = vector.shape_cast %1166 : vector<1x8x128xf32> to vector<8x128xf32>
    %1168 = vector.shape_cast %1165 : vector<8x128xf32> to vector<1x8x128xf32>
    tpu.vector_store %arg2[%c2, %c0_30, %c0_31], %1168 {strides = array<i32>} : memref<9x8x128xf32, #tpu.memory_space<vmem>>, vector<1x8x128xf32>,
    %1169 = arith.addf %1148, %1147 : vector<8x128xf32>
    %cst_32 = arith.constant 2.000000e+00 : f32
    %1170 = vector.broadcast %cst_32 : f32 to vector<8x128xf32>
    %1171 = arith.mulf %1170, %1169 : vector<8x128xf32>
    %c3 = arith.constant 3 : index
    %c0_33 = arith.constant 0 : index
    %c0_34 = arith.constant 0 : index
    %1172 = vector.load %arg2[%c3, %c0_33, %c0_34] : memref<9x8x128xf32, #tpu.memory_space<vmem>>, vector<1x8x128xf32>
    %1173 = vector.shape_cast %1172 : vector<1x8x128xf32> to vector<8x128xf32>
    %1174 = vector.shape_cast %1171 : vector<8x128xf32> to vector<1x8x128xf32>
    tpu.vector_store %arg2[%c3, %c0_33, %c0_34], %1174 {strides = array<i32>} : memref<9x8x128xf32, #tpu.memory_space<vmem>>, vector<1x8x128xf32>,
    %1175 = arith.subf %1141, %1142 : vector<8x128xf32>
    %1176 = arith.addf %1175, %1143 : vector<8x128xf32>
    %1177 = arith.subf %1176, %1144 : vector<8x128xf32>
    %c4 = arith.constant 4 : index
    %c0_35 = arith.constant 0 : index
    %c0_36 = arith.constant 0 : index
    %1178 = vector.load %arg2[%c4, %c0_35, %c0_36] : memref<9x8x128xf32, #tpu.memory_space<vmem>>, vector<1x8x128xf32>
    %1179 = vector.shape_cast %1178 : vector<1x8x128xf32> to vector<8x128xf32>
    %1180 = vector.shape_cast %1177 : vector<8x128xf32> to vector<1x8x128xf32>
    tpu.vector_store %arg2[%c4, %c0_35, %c0_36], %1180 {strides = array<i32>} : memref<9x8x128xf32, #tpu.memory_space<vmem>>, vector<1x8x128xf32>,
    %1181 = arith.subf %1150, %1145 : vector<8x128xf32>
    %cst_37 = arith.constant 2.000000e+00 : f32
    %1182 = vector.broadcast %cst_37 : f32 to vector<8x128xf32>
    %1183 = arith.mulf %1182, %1181 : vector<8x128xf32>
    %c5 = arith.constant 5 : index
    %c0_38 = arith.constant 0 : index
    %c0_39 = arith.constant 0 : index
    %1184 = vector.load %arg2[%c5, %c0_38, %c0_39] : memref<9x8x128xf32, #tpu.memory_space<vmem>>, vector<1x8x128xf32>
    %1185 = vector.shape_cast %1184 : vector<1x8x128xf32> to vector<8x128xf32>
    %1186 = vector.shape_cast %1183 : vector<8x128xf32> to vector<1x8x128xf32>
    tpu.vector_store %arg2[%c5, %c0_38, %c0_39], %1186 {strides = array<i32>} : memref<9x8x128xf32, #tpu.memory_space<vmem>>, vector<1x8x128xf32>,
    %1187 = arith.subf %1149, %1146 : vector<8x128xf32>
    %cst_40 = arith.constant 2.000000e+00 : f32
    %1188 = vector.broadcast %cst_40 : f32 to vector<8x128xf32>
    %1189 = arith.mulf %1188, %1187 : vector<8x128xf32>
    %c6 = arith.constant 6 : index
    %c0_41 = arith.constant 0 : index
    %c0_42 = arith.constant 0 : index
    %1190 = vector.load %arg2[%c6, %c0_41, %c0_42] : memref<9x8x128xf32, #tpu.memory_space<vmem>>, vector<1x8x128xf32>
    %1191 = vector.shape_cast %1190 : vector<1x8x128xf32> to vector<8x128xf32>
    %1192 = vector.shape_cast %1189 : vector<8x128xf32> to vector<1x8x128xf32>
    tpu.vector_store %arg2[%c6, %c0_41, %c0_42], %1192 {strides = array<i32>} : memref<9x8x128xf32, #tpu.memory_space<vmem>>, vector<1x8x128xf32>,
    %1193 = arith.addf %1150, %1145 : vector<8x128xf32>
    %cst_43 = arith.constant 2.000000e+00 : f32
    %1194 = vector.broadcast %cst_43 : f32 to vector<8x128xf32>
    %1195 = arith.mulf %1194, %1193 : vector<8x128xf32>
    %c7 = arith.constant 7 : index
    %c0_44 = arith.constant 0 : index
    %c0_45 = arith.constant 0 : index
    %1196 = vector.load %arg2[%c7, %c0_44, %c0_45] : memref<9x8x128xf32, #tpu.memory_space<vmem>>, vector<1x8x128xf32>
    %1197 = vector.shape_cast %1196 : vector<1x8x128xf32> to vector<8x128xf32>
    %1198 = vector.shape_cast %1195 : vector<8x128xf32> to vector<1x8x128xf32>
    tpu.vector_store %arg2[%c7, %c0_44, %c0_45], %1198 {strides = array<i32>} : memref<9x8x128xf32, #tpu.memory_space<vmem>>, vector<1x8x128xf32>,
    %1199 = arith.subf %1141, %1142 : vector<8x128xf32>
    %1200 = arith.subf %1199, %1143 : vector<8x128xf32>
    %1201 = arith.addf %1200, %1144 : vector<8x128xf32>
    %c8 = arith.constant 8 : index
    %c0_46 = arith.constant 0 : index
    %c0_47 = arith.constant 0 : index
    %1202 = vector.load %arg2[%c8, %c0_46, %c0_47] : memref<9x8x128xf32, #tpu.memory_space<vmem>>, vector<1x8x128xf32>
    %1203 = vector.shape_cast %1202 : vector<1x8x128xf32> to vector<8x128xf32>
    %1204 = vector.shape_cast %1201 : vector<8x128xf32> to vector<1x8x128xf32>
    tpu.vector_store %arg2[%c8, %c0_46, %c0_47], %1204 {strides = array<i32>} : memref<9x8x128xf32, #tpu.memory_space<vmem>>, vector<1x8x128xf32>,
    return
  }
  func.func @transform_0(%arg0: i32) -> (i32, i32, i32) {
    %c0_i32 = arith.constant 0 : i32
    %c0_i32_0 = arith.constant 0 : i32
    %c0_i32_1 = arith.constant 0 : i32
    return %c0_i32, %arg0, %c0_i32_0 : i32, i32, i32
  }
  func.func @transform_1(%arg0: i32) -> (i32, i32, i32) {
    %c0_i32 = arith.constant 0 : i32
    %c0_i32_0 = arith.constant 0 : i32
    %c0_i32_1 = arith.constant 0 : i32
    return %c0_i32, %arg0, %c0_i32_0 : i32, i32, i32
  }
}

</mosaic_0001>

<bundles_post_ra>
// kernel: tpu_custom_call.1
= control target key start
LH: loop header
LB: loop body
LE: loop exit
PB: predicated region body
PF: predicated region fallthrough
CT: control target
= control target key end

     0   :  { %6 = vsyncpa [#allocation3], 0  ;;  %s1558_s0 = inlined_call_operand.hbm [shape: f32[9,8,128], index: 0, kind: input, shape index: {}]   ;;  %s1559_s1 = inlined_call_operand.hbm [shape: f32[9,8,128], index: 1, kind: output, shape index: {}]  }
   0x1   :  { %7 = vsyncpa [#allocation4], 0  ;;  %s1271_s6 = smov [#allocation2]   ;;  %s1223_s10 = scalar_lea.hbm %s1558_s0, 1152 }
   0x2   :  { %s13_s7 = sshll.u32 %s1271_s6, 4  ;;  %p1224_p0 = scmp.ne.s32.totalorder %s1558_s0, %s1223_s10  ;;  %s14_s7 = int_to_ptr.vmem [resolvable:$true] %s13_s7 }
   0x3   :  { %p1227_p1 = scmp.lt.u32.totalorder %s1223_s10, %s1558_s0 }
   0x5   :  { %p1229_p2 = pnand %p1227_p1, %p1224_p0 }
   0x7   :  { %1232 = shalt.err (!%p1229_p2)
}
   0x8   :  { %s1233_s15 = scalar_lea.vmem %s14_s7, 1152  ;;  %p1238_p4 = scmp.lt.s32.totalorder %s14_s7, %s14_s7 }
   0x9   :  { %p1234_p3 = scmp.ne.s32.totalorder %s14_s7, %s1233_s15  ;;  %p1239_p5 = scmp.lt.s32.totalorder %s1233_s15, %s1233_s15 }
   0xb   :  { %p1240_p6 = por %p1239_p5, %p1238_p4 }
   0xd   :  { %p1241_p7 = pnand %p1240_p6, %p1234_p3 }
   0xf   :  { %1244 = shalt.err (!%p1241_p7)
}
  0x10   :  { %s1272_s16 = smov 128   ;;  %s1273_s17 = smov 8  }
  0x11   :  { %19 = dma.hbm_to_vmem [thread:$0]  %s1558_s0, 1152, %s14_s7, [#allocation3], %s1272_s16, %s1272_s16, %s1273_s17  }
  0x12   :  { %1267 = dma.done.wait [#allocation3], 1152  }
  0x13   :  { %1268 = vsyncadd [#allocation3], 4294966144  ;;  %v23_v0 = vld [vmem:[#allocation2] sm:$0xff]  ;;  %v24_v1 = vld [vmem:[#allocation2 + $0x8] sm:$0xff]  ;;  %s1274_s0 = smov [#allocation5]  }
  0x14   :  { %v25_v2 = vld [vmem:[#allocation2 + $0x10] sm:$0xff]  ;;  %v26_v3 = vld [vmem:[#allocation2 + $0x18] sm:$0xff]  ;;  %v27_v4 = vld [vmem:[#allocation2 + $0x20] sm:$0xff]  ;;  %v38_v6 = vsub.f32 0.0, %v23_v0  ;;  %s1179_s20 = sshll.u32 %s1274_s0, 4  ;;  %s1180_s20 = int_to_ptr.vmem [resolvable:$true] %s1179_s20 }
  0x15   :  { %v28_v5 = vld [vmem:[#allocation2 + $0x28] sm:$0xff]  ;;  %v29_v7 = vld [vmem:[#allocation2 + $0x30] sm:$0xff]  ;;  %v30_v8 = vld [vmem:[#allocation2 + $0x38] sm:$0xff]  ;;  %v32_v10 = vadd.f32 %v27_v4, %v23_v0  ;;  %v37_v11 = vsub.f32 %v26_v3, %v24_v1  ;;  %v41_v12 = vadd.f32 %v26_v3, %v24_v1  ;;  %v45_v16 = vsub.f32 %v23_v0, %v27_v4  ;;  %s1245_s21 = scalar_lea.vmem %s1180_s20, 1152  ;;  %p1250_p9 = scmp.lt.s32.totalorder %s1180_s20, %s1180_s20 }
  0x16   :  { %v31_v9 = vld [vmem:[#allocation2 + $0x40] sm:$0xff]  ;;  %v35_v13 = vsub.f32 %v30_v8, %v28_v5  ;;  %v36_v14 = vsub.f32 %v25_v2, %v29_v7  ;;  %v43_v15 = vadd.f32 %v29_v7, %v25_v2  ;;  %v39_v18 = vadd.f32 %v38_v6, %v27_v4  ;;  %p1246_p8 = scmp.ne.s32.totalorder %s1180_s20, %s1245_s21  ;;  %p1251_p10 = scmp.lt.s32.totalorder %s1245_s21, %s1245_s21 }
  0x17   :  { %v33_v17 = vadd.f32 %v32_v10, %v31_v9  ;;  %v42_v19 = vsub.f32 0.0, %v41_v12  ;;  %v47_v20 = vadd.f32 %v30_v8, %v28_v5  ;;  %v52_v25 = vand.u32 2147483647, %v37_v11 }
  0x18   :  { %v44_v21 = vsub.f32 0.0, %v43_v15  ;;  %v50_v22 = vand.u32 2147483647, %v35_v13  ;;  %v51_v24 = vand.u32 2147483647, %v36_v14  ;;  %v46_v26 = vadd.f32 %v45_v16, %v31_v9  ;;  %p1252_p11 = por %p1251_p10, %p1250_p9 }
  0x19   :  { %v48_v23 = vsub.f32 0.0, %v47_v20  ;;  %v53_v27 = vand.u32 2147483647, %v42_v19  ;;  %v34_v29 = vsub.f32 0.0, %v33_v17  ;;  %v40_v30 = vadd.f32 %v39_v18, %v31_v9 }
  0x1a   :  { %v54_v28 = vand.u32 2147483647, %v44_v21  ;;  %v56_v32 = vadd.f32 %v51_v24, %v50_v22  ;;  %v49_v33 = vsub.f32 %v32_v10, %v31_v9  ;;  %p1253_p12 = pnand %p1252_p11, %p1246_p8 }
  0x1b   :  { %v55_v31 = vand.u32 2147483647, %v48_v23  ;;  %v59_v34 = vadd.f32 %v53_v27, %v50_v22  ;;  %v63_v35 = vadd.f32 %v53_v27, %v51_v24 }
  0x1c   :  { %v66_v36 = vadd.f32 %v54_v28, %v52_v25  ;;  %v57_v37 = vadd.f32 %v56_v32, %v52_v25 }
  0x1d   :  { %v60_v38 = vadd.f32 %v59_v34, %v54_v28  ;;  %v64_v39 = vadd.f32 %v63_v35, %v55_v31 }
  0x1e   :  { %v67_v40 = vadd.f32 %v66_v36, %v55_v31  ;;  %v58_v41 = vsub.f32 %v34_v29, %v57_v37 }
  0x1f   :  { %v61_v42 = vsub.f32 %v40_v30, %v60_v38  ;;  %v65_v43 = vsub.f32 %v46_v26, %v64_v39 }
  0x20   :  { %v68_v44 = vsub.f32 %v49_v33, %v67_v40 }
  0x21   :  { %v62_v45 = vmin.f32 %v58_v41, %v61_v42 }
  0x22   :  { %v69_v46 = vmin.f32 %v65_v43, %v68_v44 }
  0x24   :  { %v70_v47 = vmin.f32 %v62_v45, %v69_v46 }
  0x26   :  { %v71_v48 = vsub.f32 0.0, %v70_v47 }
  0x28   :  { %v72_v49 = vmax.f32 %v71_v48, 0.0 }
  0x2a   :  { %v73_v50 = vadd.f32 %v72_v49, %v34_v29  ;;  %v74_v51 = vadd.f32 %v72_v49, %v40_v30  ;;  %v76_v52 = vadd.f32 %v72_v49, %v46_v26  ;;  %v78_v54 = vadd.f32 %v72_v49, %v49_v33 }
  0x2c   :  { %v75_v53 = vadd.f32 %v74_v51, %v73_v50 }
  0x2e   :  { %v77_v55 = vadd.f32 %v76_v52, %v75_v53 }
  0x30   :  { %v79_v56 = vadd.f32 %v78_v54, %v77_v55 }
  0x32   :  { %v80_v57 = vadd.f32 1e-30, %v79_v56 }
  0x34   :  { %1195 = vrcp.f32 %v80_v57 }
  0x3e   :  { %v1196_v58 = vpop.eup %1195 }
  0x3f   :  { %v82_v59 = vmul.f32 %v1196_v58, %v73_v50  ;;  %v83_v60 = vmul.f32 %v1196_v58, %v35_v13  ;;  %v84_v61 = vmul.f32 %v1196_v58, %v36_v14  ;;  %v86_v0 = vmul.f32 %v1196_v58, %v74_v51 }
  0x40   :  { %v87_v1 = vmul.f32 %v1196_v58, %v42_v19  ;;  %v85_v2 = vmul.f32 %v1196_v58, %v37_v11  ;;  %v88_v5 = vmul.f32 %v1196_v58, %v44_v21  ;;  %v89_v8 = vmul.f32 %v1196_v58, %v76_v52 }
  0x41   :  { %v92_v62 = vmul.f32 %v83_v60, %v83_v60  ;;  %v98_v63 = vmul.f32 %v82_v59, %v82_v59  ;;  %v93_v3 = vmul.f32 %v84_v61, %v84_v61  ;;  %v123_v7 = vmul.f32 %v86_v0, %v86_v0 }
  0x42   :  { %v95_v6 = vmul.f32 %v87_v1, %v87_v1  ;;  %v1300_v9 = vmul.f32 %v1196_v58, %v48_v23  ;;  %v94_v10 = vmul.f32 %v85_v2, %v85_v2  ;;  %v96_v15 = vmul.f32 %v88_v5, %v88_v5 }
  0x43   :  { %v99_v4 = vadd.f32 %v98_v63, %v92_v62  ;;  %v124_v16 = vadd.f32 %v123_v7, %v92_v62  ;;  %v91_v17 = vmul.f32 %v1196_v58, %v78_v54  ;;  %v142_v11 = vmul.f32 %v89_v8, %v89_v8 }
  0x44   :  { %v97_v14 = vmul.f32 %v1300_v9, %v1300_v9  ;;  %v141_v19 = vadd.f32 %v95_v6, %v93_v3  ;;  %v152_v21 = vadd.f32 %v96_v15, %v94_v10  ;;  %v102_v29 = vmul.f32 %v83_v60, %v82_v59 }
  0x45   :  { %v100_v12 = vadd.f32 %v99_v4, %v93_v3  ;;  %v125_v13 = vadd.f32 %v124_v16, %v95_v6  ;;  %v154_v24 = vmul.f32 %v91_v17, %v91_v17  ;;  %v103_v30 = vmul.f32 %v86_v0, %v83_v60 }
  0x46   :  { %v143_v22 = vadd.f32 %v142_v11, %v141_v19  ;;  %v153_v26 = vadd.f32 %v152_v21, %v97_v14  ;;  %v109_v31 = vmul.f32 %v84_v61, %v82_v59  ;;  %v110_v32 = vmul.f32 %v87_v1, %v83_v60 }
  0x47   :  { %v101_v18 = vadd.f32 %v100_v12, %v94_v10  ;;  %v126_v20 = vadd.f32 %v125_v13, %v96_v15  ;;  %v105_v34 = vmul.f32 %v87_v1, %v84_v61  ;;  %v104_v36 = vadd.f32 %v103_v30, %v102_v29 }
  0x48   :  { %v1304_v25 = vadd.f32 %v143_v22, %v97_v14  ;;  %v1307_v28 = vadd.f32 %v154_v24, %v153_v26  ;;  %v112_v37 = vmul.f32 %v89_v8, %v84_v61  ;;  %v127_v38 = vmul.f32 %v84_v61, %v83_v60 }
  0x49   :  { %v156_v23 = vadd.f32 %v126_v20, %v101_v18  ;;  %v128_v39 = vmul.f32 %v87_v1, %v86_v0  ;;  %v111_v40 = vadd.f32 %v110_v32, %v109_v31  ;;  %v116_v41 = vmul.f32 %v85_v2, %v82_v59 }
  0x4a   :  { %v117_v42 = vmul.f32 %v88_v5, %v83_v60  ;;  %v134_v43 = vmul.f32 %v85_v2, %v83_v60  ;;  %v135_v44 = vmul.f32 %v88_v5, %v86_v0  ;;  %v107_v45 = vmul.f32 %v88_v5, %v85_v2 }
  0x4b   :  { %v157_v27 = vadd.f32 %v156_v23, %v1304_v25  ;;  %v114_v46 = vmul.f32 %v1300_v9, %v85_v2  ;;  %v106_v47 = vadd.f32 %v105_v34, %v104_v36  ;;  %v119_v48 = vmul.f32 %v1300_v9, %v84_v61 }
  0x4c   :  { %v129_v49 = vadd.f32 %v128_v39, %v127_v38  ;;  %v130_v50 = vmul.f32 %v89_v8, %v87_v1  ;;  %v113_v51 = vadd.f32 %v112_v37, %v111_v40  ;;  %v118_v52 = vadd.f32 %v117_v42, %v116_v41 }
  0x4d   :  { %v158_v33 = vadd.f32 %v157_v27, %v1307_v28  ;;  %v145_v53 = vmul.f32 %v85_v2, %v84_v61  ;;  %v146_v54 = vmul.f32 %v88_v5, %v87_v1  ;;  %v136_v55 = vadd.f32 %v135_v44, %v134_v43 }
  0x4e   :  { %v137_v56 = vmul.f32 %v1300_v9, %v87_v1  ;;  %v108_v57 = vadd.f32 %v107_v45, %v106_v47  ;;  %v121_v58 = vmul.f32 %v91_v17, %v85_v2  ;;  %v131_v59 = vadd.f32 %v130_v50, %v129_v49 }
  0x4f   :  { %v159_v35 = vadd.f32 1e-30, %v158_v33  ;;  %v132_v60 = vmul.f32 %v1300_v9, %v88_v5  ;;  %v115_v62 = vadd.f32 %v114_v46, %v113_v51  ;;  %v120_v63 = vadd.f32 %v119_v48, %v118_v52 }
  0x50   :  { %v147_v0 = vadd.f32 %v146_v54, %v145_v53  ;;  %v148_v3 = vmul.f32 %v1300_v9, %v89_v8  ;;  %v138_v4 = vadd.f32 %v137_v56, %v136_v55  ;;  %v139_v6 = vmul.f32 %v91_v17, %v88_v5 }
  0x51   :  { %1197 = vrcp.f32 %v159_v35  ;;  %v133_v10 = vadd.f32 %v132_v60, %v131_v59  ;;  %v122_v15 = vadd.f32 %v121_v58, %v120_v63  ;;  %v150_v1 = vmul.f32 %v91_v17, %v1300_v9 }
  0x52   :  { %v149_v16 = vadd.f32 %v148_v3, %v147_v0  ;;  %v140_v2 = vadd.f32 %v139_v6, %v138_v4 }
  0x54   :  { %v151_v21 = vadd.f32 %v150_v1, %v149_v16 }
  0x5b   :  { %v1198_v7 = vpop.eup %1197 }
  0x5c   :  { %v161_v12 = vmul.f32 %v1198_v7, %v101_v18  ;;  %v162_v61 = vmul.f32 %v1198_v7, %v108_v57  ;;  %v163_v13 = vmul.f32 %v1198_v7, %v115_v62  ;;  %v165_v11 = vmul.f32 %v1198_v7, %v126_v20 }
  0x5d   :  { %v166_v22 = vmul.f32 %v1198_v7, %v133_v10  ;;  %v164_v24 = vmul.f32 %v1198_v7, %v122_v15  ;;  %v167_v26 = vmul.f32 %v1198_v7, %v140_v2  ;;  %v168_v18 = vmul.f32 %v1198_v7, %v1304_v25 }
  0x5e   :  { %v171_v14 = vmul.f32 %v162_v61, %v162_v61  ;;  %v177_v19 = vmul.f32 %v161_v12, %v161_v12  ;;  %v172_v23 = vmul.f32 %v163_v13, %v163_v13  ;;  %v202_v27 = vmul.f32 %v165_v11, %v165_v11 }
  0x5f   :  { %v174_v5 = vmul.f32 %v166_v22, %v166_v22  ;;  %v1317_v29 = vmul.f32 %v1198_v7, %v151_v21  ;;  %v173_v30 = vmul.f32 %v164_v24, %v164_v24  ;;  %v175_v9 = vmul.f32 %v167_v26, %v167_v26 }
  0x60   :  { %v178_v8 = vadd.f32 %v177_v19, %v171_v14  ;;  %v203_v17 = vadd.f32 %v202_v27, %v171_v14  ;;  %v170_v32 = vmul.f32 %v1198_v7, %v1307_v28  ;;  %v221_v36 = vmul.f32 %v168_v18, %v168_v18 }
  0x61   :  { %v176_v20 = vmul.f32 %v1317_v29, %v1317_v29  ;;  %v220_v35 = vadd.f32 %v174_v5, %v172_v23  ;;  %v231_v39 = vadd.f32 %v175_v9, %v173_v30  ;;  %v181_v28 = vmul.f32 %v162_v61, %v161_v12 }
  0x62   :  { %v179_v31 = vadd.f32 %v178_v8, %v172_v23  ;;  %v204_v33 = vadd.f32 %v203_v17, %v174_v5  ;;  %v233_v40 = vmul.f32 %v170_v32, %v170_v32  ;;  %v182_v45 = vmul.f32 %v165_v11, %v162_v61 }
  0x63   :  { %v222_v38 = vadd.f32 %v221_v36, %v220_v35  ;;  %v232_v42 = vadd.f32 %v231_v39, %v176_v20  ;;  %v188_v46 = vmul.f32 %v163_v13, %v161_v12  ;;  %v189_v47 = vmul.f32 %v166_v22, %v162_v61 }
  0x64   :  { %v180_v34 = vadd.f32 %v179_v31, %v173_v30  ;;  %v205_v37 = vadd.f32 %v204_v33, %v175_v9  ;;  %v184_v49 = vmul.f32 %v166_v22, %v163_v13  ;;  %v183_v51 = vadd.f32 %v182_v45, %v181_v28 }
  0x65   :  { %v1322_v25 = vadd.f32 %v222_v38, %v176_v20  ;;  %v1325_v44 = vadd.f32 %v233_v40, %v232_v42  ;;  %v191_v52 = vmul.f32 %v168_v18, %v163_v13  ;;  %v206_v53 = vmul.f32 %v163_v13, %v162_v61 }
  0x66   :  { %v235_v41 = vadd.f32 %v205_v37, %v180_v34  ;;  %v207_v54 = vmul.f32 %v166_v22, %v165_v11  ;;  %v190_v55 = vadd.f32 %v189_v47, %v188_v46  ;;  %v195_v56 = vmul.f32 %v164_v24, %v161_v12 }
  0x67   :  { %v196_v57 = vmul.f32 %v167_v26, %v162_v61  ;;  %v213_v58 = vmul.f32 %v164_v24, %v162_v61  ;;  %v214_v59 = vmul.f32 %v167_v26, %v165_v11  ;;  %v186_v60 = vmul.f32 %v167_v26, %v164_v24 }
  0x68   :  { %v236_v43 = vadd.f32 %v235_v41, %v1322_v25  ;;  %v193_v62 = vmul.f32 %v1317_v29, %v164_v24  ;;  %v185_v63 = vadd.f32 %v184_v49, %v183_v51  ;;  %v198_v0 = vmul.f32 %v1317_v29, %v163_v13 }
  0x69   :  { %v208_v3 = vadd.f32 %v207_v54, %v206_v53  ;;  %v209_v4 = vmul.f32 %v168_v18, %v166_v22  ;;  %v192_v6 = vadd.f32 %v191_v52, %v190_v55  ;;  %v197_v7 = vadd.f32 %v196_v57, %v195_v56 }
  0x6a   :  { %v237_v48 = vadd.f32 %v236_v43, %v1325_v44  ;;  %v224_v10 = vmul.f32 %v164_v24, %v163_v13  ;;  %v225_v15 = vmul.f32 %v167_v26, %v166_v22  ;;  %v215_v16 = vadd.f32 %v214_v59, %v213_v58 }
  0x6b   :  { %v216_v1 = vmul.f32 %v1317_v29, %v166_v22  ;;  %v187_v12 = vadd.f32 %v186_v60, %v185_v63  ;;  %v200_v2 = vmul.f32 %v170_v32, %v164_v24  ;;  %v210_v14 = vadd.f32 %v209_v4, %v208_v3 }
  0x6c   :  { %v238_v50 = vadd.f32 1e-30, %v237_v48  ;;  %v211_v61 = vmul.f32 %v1317_v29, %v167_v26  ;;  %v194_v19 = vadd.f32 %v193_v62, %v192_v6  ;;  %v199_v11 = vadd.f32 %v198_v0, %v197_v7 }
  0x6d   :  { %v226_v21 = vadd.f32 %v225_v15, %v224_v10  ;;  %v227_v23 = vmul.f32 %v1317_v29, %v168_v18  ;;  %v217_v8 = vadd.f32 %v216_v1, %v215_v16  ;;  %v218_v5 = vmul.f32 %v170_v32, %v167_v26 }
  0x6e   :  { %1199 = vrcp.f32 %v238_v50  ;;  %v212_v30 = vadd.f32 %v211_v61, %v210_v14  ;;  %v201_v9 = vadd.f32 %v200_v2, %v199_v11  ;;  %v229_v22 = vmul.f32 %v170_v32, %v1317_v29 }
  0x6f   :  { %v228_v17 = vadd.f32 %v227_v23, %v226_v21  ;;  %v219_v24 = vadd.f32 %v218_v5, %v217_v8 }
  0x71   :  { %v230_v39 = vadd.f32 %v229_v22, %v228_v17 }
  0x78   :  { %v1200_v27 = vpop.eup %1199 }
  0x79   :  { %v240_v31 = vmul.f32 %v1200_v27, %v180_v34  ;;  %v241_v13 = vmul.f32 %v1200_v27, %v187_v12  ;;  %v242_v33 = vmul.f32 %v1200_v27, %v194_v19  ;;  %v244_v36 = vmul.f32 %v1200_v27, %v205_v37 }
  0x7a   :  { %v245_v38 = vmul.f32 %v1200_v27, %v212_v30  ;;  %v243_v40 = vmul.f32 %v1200_v27, %v201_v9  ;;  %v246_v42 = vmul.f32 %v1200_v27, %v219_v24  ;;  %v247_v34 = vmul.f32 %v1200_v27, %v1322_v25 }
  0x7b   :  { %v250_v20 = vmul.f32 %v241_v13, %v241_v13  ;;  %v256_v35 = vmul.f32 %v240_v31, %v240_v31  ;;  %v251_v41 = vmul.f32 %v242_v33, %v242_v33  ;;  %v281_v43 = vmul.f32 %v244_v36, %v244_v36 }
  0x7c   :  { %v253_v26 = vmul.f32 %v245_v38, %v245_v38  ;;  %v1335_v28 = vmul.f32 %v1200_v27, %v230_v39  ;;  %v252_v45 = vmul.f32 %v243_v40, %v243_v40  ;;  %v254_v29 = vmul.f32 %v246_v42, %v246_v42 }
  0x7d   :  { %v257_v18 = vadd.f32 %v256_v35, %v250_v20  ;;  %v282_v32 = vadd.f32 %v281_v43, %v250_v20  ;;  %v249_v47 = vmul.f32 %v1200_v27, %v1325_v44  ;;  %v300_v51 = vmul.f32 %v247_v34, %v247_v34 }
  0x7e   :  { %v255_v37 = vmul.f32 %v1335_v28, %v1335_v28  ;;  %v299_v50 = vadd.f32 %v253_v26, %v251_v41  ;;  %v310_v54 = vadd.f32 %v254_v29, %v252_v45  ;;  %v260_v44 = vmul.f32 %v241_v13, %v240_v31 }
  0x7f   :  { %v258_v46 = vadd.f32 %v257_v18, %v251_v41  ;;  %v283_v48 = vadd.f32 %v282_v32, %v253_v26  ;;  %v312_v55 = vmul.f32 %v249_v47, %v249_v47  ;;  %v261_v60 = vmul.f32 %v244_v36, %v241_v13 }
  0x80   :  { %v301_v53 = vadd.f32 %v300_v51, %v299_v50  ;;  %v311_v57 = vadd.f32 %v310_v54, %v255_v37  ;;  %v267_v62 = vmul.f32 %v242_v33, %v240_v31  ;;  %v268_v63 = vmul.f32 %v245_v38, %v241_v13 }
  0x81   :  { %v259_v49 = vadd.f32 %v258_v46, %v252_v45  ;;  %v284_v52 = vadd.f32 %v283_v48, %v254_v29  ;;  %v263_v3 = vmul.f32 %v245_v38, %v242_v33  ;;  %v262_v6 = vadd.f32 %v261_v60, %v260_v44 }
  0x82   :  { %v1340_v25 = vadd.f32 %v301_v53, %v255_v37  ;;  %v1343_v59 = vadd.f32 %v312_v55, %v311_v57  ;;  %v270_v7 = vmul.f32 %v247_v34, %v242_v33  ;;  %v285_v10 = vmul.f32 %v242_v33, %v241_v13 }
  0x83   :  { %v314_v56 = vadd.f32 %v284_v52, %v259_v49  ;;  %v286_v15 = vmul.f32 %v245_v38, %v244_v36  ;;  %v269_v16 = vadd.f32 %v268_v63, %v267_v62  ;;  %v274_v1 = vmul.f32 %v243_v40, %v240_v31 }
  0x84   :  { %v275_v12 = vmul.f32 %v246_v42, %v241_v13  ;;  %v292_v2 = vmul.f32 %v243_v40, %v241_v13  ;;  %v293_v14 = vmul.f32 %v246_v42, %v244_v36  ;;  %v265_v61 = vmul.f32 %v246_v42, %v243_v40 }
  0x85   :  { %v315_v58 = vadd.f32 %v314_v56, %v1340_v25  ;;  %v272_v19 = vmul.f32 %v1335_v28, %v243_v40  ;;  %v264_v11 = vadd.f32 %v263_v3, %v262_v6  ;;  %v277_v21 = vmul.f32 %v1335_v28, %v242_v33 }
  0x86   :  { %v287_v23 = vadd.f32 %v286_v15, %v285_v10  ;;  %v288_v8 = vmul.f32 %v247_v34, %v245_v38  ;;  %v271_v5 = vadd.f32 %v270_v7, %v269_v16  ;;  %v276_v27 = vadd.f32 %v275_v12, %v274_v1 }
  0x87   :  { %v316_v0 = vadd.f32 %v315_v58, %v1343_v59  ;;  %v303_v30 = vmul.f32 %v243_v40, %v242_v33  ;;  %v304_v9 = vmul.f32 %v246_v42, %v245_v38  ;;  %v294_v17 = vadd.f32 %v293_v14, %v292_v2 }
  0x88   :  { %v295_v22 = vmul.f32 %v1335_v28, %v245_v38  ;;  %v266_v31 = vadd.f32 %v265_v61, %v264_v11  ;;  %v279_v24 = vmul.f32 %v249_v47, %v243_v40  ;;  %v289_v20 = vadd.f32 %v288_v8, %v287_v23 }
  0x89   :  { %v317_v4 = vadd.f32 1e-30, %v316_v0  ;;  %v290_v13 = vmul.f32 %v1335_v28, %v246_v42  ;;  %v273_v35 = vadd.f32 %v272_v19, %v271_v5  ;;  %v278_v36 = vadd.f32 %v277_v21, %v276_v27 }
  0x8a   :  { %v305_v39 = vadd.f32 %v304_v9, %v303_v30  ;;  %v306_v41 = vmul.f32 %v1335_v28, %v247_v34  ;;  %v296_v18 = vadd.f32 %v295_v22, %v294_v17  ;;  %v297_v26 = vmul.f32 %v249_v47, %v246_v42 }
  0x8b   :  { %1201 = vrcp.f32 %v317_v4  ;;  %v291_v45 = vadd.f32 %v290_v13, %v289_v20  ;;  %v280_v29 = vadd.f32 %v279_v24, %v278_v36  ;;  %v308_v38 = vmul.f32 %v249_v47, %v1335_v28 }
  0x8c   :  { %v307_v32 = vadd.f32 %v306_v41, %v305_v39  ;;  %v298_v40 = vadd.f32 %v297_v26, %v296_v18 }
  0x8e   :  { %v309_v54 = vadd.f32 %v308_v38, %v307_v32 }
  0x95   :  { %v1202_v43 = vpop.eup %1201 }
  0x96   :  { %v319_v46 = vmul.f32 %v1202_v43, %v259_v49  ;;  %v320_v33 = vmul.f32 %v1202_v43, %v266_v31  ;;  %v321_v48 = vmul.f32 %v1202_v43, %v273_v35  ;;  %v323_v51 = vmul.f32 %v1202_v43, %v284_v52 }
  0x97   :  { %v324_v53 = vmul.f32 %v1202_v43, %v291_v45  ;;  %v322_v55 = vmul.f32 %v1202_v43, %v280_v29  ;;  %v325_v57 = vmul.f32 %v1202_v43, %v298_v40  ;;  %v326_v49 = vmul.f32 %v1202_v43, %v1340_v25 }
  0x98   :  { %v329_v37 = vmul.f32 %v320_v33, %v320_v33  ;;  %v335_v50 = vmul.f32 %v319_v46, %v319_v46  ;;  %v330_v56 = vmul.f32 %v321_v48, %v321_v48  ;;  %v360_v58 = vmul.f32 %v323_v51, %v323_v51 }
  0x99   :  { %v332_v42 = vmul.f32 %v324_v53, %v324_v53  ;;  %v1353_v44 = vmul.f32 %v1202_v43, %v309_v54  ;;  %v331_v60 = vmul.f32 %v322_v55, %v322_v55  ;;  %v333_v28 = vmul.f32 %v325_v57, %v325_v57 }
  0x9a   :  { %v336_v34 = vadd.f32 %v335_v50, %v329_v37  ;;  %v361_v47 = vadd.f32 %v360_v58, %v329_v37  ;;  %v328_v63 = vmul.f32 %v1202_v43, %v1343_v59  ;;  %v379_v6 = vmul.f32 %v326_v49, %v326_v49 }
  0x9b   :  { %v334_v52 = vmul.f32 %v1353_v44, %v1353_v44  ;;  %v378_v4 = vadd.f32 %v332_v42, %v330_v56  ;;  %v389_v15 = vadd.f32 %v333_v28, %v331_v60  ;;  %v339_v59 = vmul.f32 %v320_v33, %v319_v46 }
  0x9c   :  { %v337_v62 = vadd.f32 %v336_v34, %v330_v56  ;;  %v362_v0 = vadd.f32 %v361_v47, %v332_v42  ;;  %v391_v16 = vmul.f32 %v328_v63, %v328_v63  ;;  %v340_v61 = vmul.f32 %v323_v51, %v320_v33 }
  0x9d   :  { %v380_v10 = vadd.f32 %v379_v6, %v378_v4  ;;  %v390_v12 = vadd.f32 %v389_v15, %v334_v52  ;;  %v346_v19 = vmul.f32 %v321_v48, %v319_v46  ;;  %v347_v11 = vmul.f32 %v324_v53, %v320_v33 }
  0x9e   :  { %v338_v3 = vadd.f32 %v337_v62, %v331_v60  ;;  %v363_v7 = vadd.f32 %v362_v0, %v333_v28  ;;  %v342_v23 = vmul.f32 %v324_v53, %v321_v48  ;;  %v341_v5 = vadd.f32 %v340_v61, %v339_v59 }
  0x9f   :  { %v1358_v25 = vadd.f32 %v380_v10, %v334_v52  ;;  %v1361_v14 = vadd.f32 %v391_v16, %v390_v12  ;;  %v349_v27 = vmul.f32 %v326_v49, %v321_v48  ;;  %v364_v30 = vmul.f32 %v321_v48, %v320_v33 }
  0xa0   :  { %v393_v1 = vadd.f32 %v363_v7, %v338_v3  ;;  %v365_v9 = vmul.f32 %v324_v53, %v323_v51  ;;  %v348_v17 = vadd.f32 %v347_v11, %v346_v19  ;;  %v353_v22 = vmul.f32 %v322_v55, %v319_v46 }
  0xa1   :  { %v354_v31 = vmul.f32 %v325_v57, %v320_v33  ;;  %v371_v24 = vmul.f32 %v322_v55, %v320_v33  ;;  %v372_v20 = vmul.f32 %v325_v57, %v323_v51  ;;  %v344_v13 = vmul.f32 %v325_v57, %v322_v55 }
  0xa2   :  { %v394_v2 = vadd.f32 %v393_v1, %v1358_v25  ;;  %v351_v35 = vmul.f32 %v1353_v44, %v322_v55  ;;  %v343_v36 = vadd.f32 %v342_v23, %v341_v5  ;;  %v356_v39 = vmul.f32 %v1353_v44, %v321_v48 }
  0xa3   :  { %v366_v41 = vadd.f32 %v365_v9, %v364_v30  ;;  %v367_v18 = vmul.f32 %v326_v49, %v324_v53  ;;  %v350_v26 = vadd.f32 %v349_v27, %v348_v17  ;;  %v355_v43 = vadd.f32 %v354_v31, %v353_v22 }
  0xa4   :  { %v395_v21 = vadd.f32 %v394_v2, %v1361_v14  ;;  %v382_v45 = vmul.f32 %v322_v55, %v321_v48  ;;  %v383_v29 = vmul.f32 %v325_v57, %v324_v53  ;;  %v373_v32 = vadd.f32 %v372_v20, %v371_v24 }
  0xa5   :  { %v374_v38 = vmul.f32 %v1353_v44, %v324_v53  ;;  %v345_v46 = vadd.f32 %v344_v13, %v343_v36  ;;  %v358_v40 = vmul.f32 %v328_v63, %v322_v55  ;;  %v368_v37 = vadd.f32 %v367_v18, %v366_v41 }
  0xa6   :  { %v396_v8 = vadd.f32 1e-30, %v395_v21  ;;  %v369_v33 = vmul.f32 %v1353_v44, %v325_v57  ;;  %v352_v50 = vadd.f32 %v351_v35, %v350_v26  ;;  %v357_v51 = vadd.f32 %v356_v39, %v355_v43 }
  0xa7   :  { %v384_v54 = vadd.f32 %v383_v29, %v382_v45  ;;  %v385_v56 = vmul.f32 %v1353_v44, %v326_v49  ;;  %v375_v34 = vadd.f32 %v374_v38, %v373_v32  ;;  %v376_v42 = vmul.f32 %v328_v63, %v325_v57 }
  0xa8   :  { %1203 = vrcp.f32 %v396_v8  ;;  %v370_v60 = vadd.f32 %v369_v33, %v368_v37  ;;  %v359_v28 = vadd.f32 %v358_v40, %v357_v51  ;;  %v387_v53 = vmul.f32 %v328_v63, %v1353_v44 }
  0xa9   :  { %v386_v47 = vadd.f32 %v385_v56, %v384_v54  ;;  %v377_v55 = vadd.f32 %v376_v42, %v375_v34 }
  0xab   :  { %v388_v15 = vadd.f32 %v387_v53, %v386_v47 }
  0xb2   :  { %v1204_v58 = vpop.eup %1203 }
  0xb3   :  { %v398_v62 = vmul.f32 %v1204_v58, %v338_v3  ;;  %v399_v48 = vmul.f32 %v1204_v58, %v345_v46  ;;  %v400_v0 = vmul.f32 %v1204_v58, %v352_v50  ;;  %v402_v6 = vmul.f32 %v1204_v58, %v363_v7 }
  0xb4   :  { %v403_v10 = vmul.f32 %v1204_v58, %v370_v60  ;;  %v401_v16 = vmul.f32 %v1204_v58, %v359_v28  ;;  %v404_v12 = vmul.f32 %v1204_v58, %v377_v55  ;;  %v405_v3 = vmul.f32 %v1204_v58, %v1358_v25 }
  0xb5   :  { %v408_v52 = vmul.f32 %v399_v48, %v399_v48  ;;  %v414_v4 = vmul.f32 %v398_v62, %v398_v62  ;;  %v409_v1 = vmul.f32 %v400_v0, %v400_v0  ;;  %v439_v2 = vmul.f32 %v402_v6, %v402_v6 }
  0xb6   :  { %v411_v57 = vmul.f32 %v403_v10, %v403_v10  ;;  %v1371_v59 = vmul.f32 %v1204_v58, %v388_v15  ;;  %v410_v61 = vmul.f32 %v401_v16, %v401_v16  ;;  %v412_v44 = vmul.f32 %v404_v12, %v404_v12 }
  0xb7   :  { %v415_v49 = vadd.f32 %v414_v4, %v408_v52  ;;  %v440_v63 = vadd.f32 %v439_v2, %v408_v52  ;;  %v407_v11 = vmul.f32 %v1204_v58, %v1361_v14  ;;  %v458_v5 = vmul.f32 %v405_v3, %v405_v3 }
  0xb8   :  { %v413_v7 = vmul.f32 %v1371_v59, %v1371_v59  ;;  %v457_v8 = vadd.f32 %v411_v57, %v409_v1  ;;  %v468_v9 = vadd.f32 %v412_v44, %v410_v61  ;;  %v418_v14 = vmul.f32 %v399_v48, %v398_v62 }
  0xb9   :  { %v416_v19 = vadd.f32 %v415_v49, %v409_v1  ;;  %v441_v21 = vadd.f32 %v440_v63, %v411_v57  ;;  %v470_v17 = vmul.f32 %v407_v11, %v407_v11  ;;  %v419_v13 = vmul.f32 %v402_v6, %v399_v48 }
  0xba   :  { %v459_v30 = vadd.f32 %v458_v5, %v457_v8  ;;  %v469_v31 = vadd.f32 %v468_v9, %v413_v7  ;;  %v425_v35 = vmul.f32 %v400_v0, %v398_v62  ;;  %v426_v36 = vmul.f32 %v403_v10, %v399_v48 }
  0xbb   :  { %v417_v23 = vadd.f32 %v416_v19, %v410_v61  ;;  %v442_v27 = vadd.f32 %v441_v21, %v412_v44  ;;  %v421_v41 = vmul.f32 %v403_v10, %v400_v0  ;;  %v420_v26 = vadd.f32 %v419_v13, %v418_v14 }
  0xbc   :  { %v1376_v25 = vadd.f32 %v459_v30, %v413_v7  ;;  %v1379_v20 = vadd.f32 %v470_v17, %v469_v31  ;;  %v428_v43 = vmul.f32 %v405_v3, %v400_v0  ;;  %v443_v45 = vmul.f32 %v400_v0, %v399_v48 }
  0xbd   :  { %v472_v22 = vadd.f32 %v442_v27, %v417_v23  ;;  %v444_v29 = vmul.f32 %v403_v10, %v402_v6  ;;  %v427_v32 = vadd.f32 %v426_v36, %v425_v35  ;;  %v432_v38 = vmul.f32 %v401_v16, %v398_v62 }
  0xbe   :  { %v433_v46 = vmul.f32 %v404_v12, %v399_v48  ;;  %v450_v40 = vmul.f32 %v401_v16, %v399_v48  ;;  %v451_v37 = vmul.f32 %v404_v12, %v402_v6  ;;  %v423_v33 = vmul.f32 %v404_v12, %v401_v16 }
  0xbf   :  { %v473_v24 = vadd.f32 %v472_v22, %v1376_v25  ;;  %v430_v50 = vmul.f32 %v1371_v59, %v401_v16  ;;  %v422_v51 = vadd.f32 %v421_v41, %v420_v26  ;;  %v435_v54 = vmul.f32 %v1371_v59, %v400_v0 }
  0xc0   :  { %v445_v56 = vadd.f32 %v444_v29, %v443_v45  ;;  %v446_v34 = vmul.f32 %v405_v3, %v403_v10  ;;  %v429_v42 = vadd.f32 %v428_v43, %v427_v32  ;;  %v434_v58 = vadd.f32 %v433_v46, %v432_v38 }
  0xc1   :  { %v474_v39 = vadd.f32 %v473_v24, %v1379_v20  ;;  %v461_v60 = vmul.f32 %v401_v16, %v400_v0  ;;  %v462_v28 = vmul.f32 %v404_v12, %v403_v10  ;;  %v452_v47 = vadd.f32 %v451_v37, %v450_v40 }
  0xc2   :  { %v453_v53 = vmul.f32 %v1371_v59, %v403_v10  ;;  %v424_v62 = vadd.f32 %v423_v33, %v422_v51  ;;  %v437_v55 = vmul.f32 %v407_v11, %v401_v16  ;;  %v447_v52 = vadd.f32 %v446_v34, %v445_v56 }
  0xc3   :  { %v475_v18 = vadd.f32 1e-30, %v474_v39  ;;  %v448_v48 = vmul.f32 %v1371_v59, %v404_v12  ;;  %v431_v4 = vadd.f32 %v430_v50, %v429_v42  ;;  %v436_v6 = vadd.f32 %v435_v54, %v434_v58 }
  0xc4   :  { %v463_v15 = vadd.f32 %v462_v28, %v461_v60  ;;  %v464_v1 = vmul.f32 %v1371_v59, %v405_v3  ;;  %v454_v49 = vadd.f32 %v453_v53, %v452_v47  ;;  %v455_v57 = vmul.f32 %v407_v11, %v404_v12 }
  0xc5   :  { %1205 = vrcp.f32 %v475_v18  ;;  %v449_v61 = vadd.f32 %v448_v48, %v447_v52  ;;  %v438_v44 = vadd.f32 %v437_v55, %v436_v6  ;;  %v466_v10 = vmul.f32 %v407_v11, %v1371_v59 }
  0xc6   :  { %v465_v63 = vadd.f32 %v464_v1, %v463_v15  ;;  %v456_v16 = vadd.f32 %v455_v57, %v454_v49 }
  0xc8   :  { %v467_v9 = vadd.f32 %v466_v10, %v465_v63 }
  0xcf   :  { %v1206_v2 = vpop.eup %1205 }
  0xd0   :  { %v477_v19 = vmul.f32 %v1206_v2, %v417_v23  ;;  %v478_v0 = vmul.f32 %v1206_v2, %v424_v62  ;;  %v479_v21 = vmul.f32 %v1206_v2, %v431_v4  ;;  %v481_v5 = vmul.f32 %v1206_v2, %v442_v27 }
  0xd1   :  { %v482_v30 = vmul.f32 %v1206_v2, %v449_v61  ;;  %v480_v17 = vmul.f32 %v1206_v2, %v438_v44  ;;  %v483_v31 = vmul.f32 %v1206_v2, %v456_v16  ;;  %v484_v23 = vmul.f32 %v1206_v2, %v1376_v25 }
  0xd2   :  { %v487_v7 = vmul.f32 %v478_v0, %v478_v0  ;;  %v493_v8 = vmul.f32 %v477_v19, %v477_v19  ;;  %v488_v22 = vmul.f32 %v479_v21, %v479_v21  ;;  %v518_v24 = vmul.f32 %v481_v5, %v481_v5 }
  0xd3   :  { %v490_v12 = vmul.f32 %v482_v30, %v482_v30  ;;  %v1389_v14 = vmul.f32 %v1206_v2, %v467_v9  ;;  %v489_v13 = vmul.f32 %v480_v17, %v480_v17  ;;  %v491_v59 = vmul.f32 %v483_v31, %v483_v31 }
  0xd4   :  { %v494_v3 = vadd.f32 %v493_v8, %v487_v7  ;;  %v519_v11 = vadd.f32 %v518_v24, %v487_v7  ;;  %v486_v36 = vmul.f32 %v1206_v2, %v1379_v20  ;;  %v537_v26 = vmul.f32 %v484_v23, %v484_v23 }
  0xd5   :  { %v492_v27 = vmul.f32 %v1389_v14, %v1389_v14  ;;  %v536_v18 = vadd.f32 %v490_v12, %v488_v22  ;;  %v547_v29 = vadd.f32 %v491_v59, %v489_v13  ;;  %v497_v20 = vmul.f32 %v478_v0, %v477_v19 }
  0xd6   :  { %v495_v35 = vadd.f32 %v494_v3, %v488_v22  ;;  %v520_v39 = vadd.f32 %v519_v11, %v490_v12  ;;  %v549_v32 = vmul.f32 %v486_v36, %v486_v36  ;;  %v498_v33 = vmul.f32 %v481_v5, %v478_v0 }
  0xd7   :  { %v538_v45 = vadd.f32 %v537_v26, %v536_v18  ;;  %v548_v46 = vadd.f32 %v547_v29, %v492_v27  ;;  %v504_v50 = vmul.f32 %v479_v21, %v477_v19  ;;  %v505_v51 = vmul.f32 %v482_v30, %v478_v0 }
  0xd8   :  { %v496_v41 = vadd.f32 %v495_v35, %v489_v13  ;;  %v521_v43 = vadd.f32 %v520_v39, %v491_v59  ;;  %v500_v56 = vmul.f32 %v482_v30, %v479_v21  ;;  %v499_v42 = vadd.f32 %v498_v33, %v497_v20 }
  0xd9   :  { %v1394_v25 = vadd.f32 %v538_v45, %v492_v27  ;;  %v1397_v37 = vadd.f32 %v549_v32, %v548_v46  ;;  %v507_v58 = vmul.f32 %v484_v23, %v479_v21  ;;  %v522_v60 = vmul.f32 %v479_v21, %v478_v0 }
  0xda   :  { %v551_v38 = vadd.f32 %v521_v43, %v496_v41  ;;  %v523_v28 = vmul.f32 %v482_v30, %v481_v5  ;;  %v506_v47 = vadd.f32 %v505_v51, %v504_v50  ;;  %v511_v53 = vmul.f32 %v480_v17, %v477_v19 }
  0xdb   :  { %v512_v62 = vmul.f32 %v483_v31, %v478_v0  ;;  %v529_v55 = vmul.f32 %v480_v17, %v478_v0  ;;  %v530_v52 = vmul.f32 %v483_v31, %v481_v5  ;;  %v502_v48 = vmul.f32 %v483_v31, %v480_v17 }
  0xdc   :  { %v552_v40 = vadd.f32 %v551_v38, %v1394_v25  ;;  %v509_v4 = vmul.f32 %v1389_v14, %v480_v17  ;;  %v501_v6 = vadd.f32 %v500_v56, %v499_v42  ;;  %v514_v15 = vmul.f32 %v1389_v14, %v479_v21 }
  0xdd   :  { %v524_v1 = vadd.f32 %v523_v28, %v522_v60  ;;  %v525_v49 = vmul.f32 %v484_v23, %v482_v30  ;;  %v508_v57 = vadd.f32 %v507_v58, %v506_v47  ;;  %v513_v2 = vadd.f32 %v512_v62, %v511_v53 }
  0xde   :  { %v553_v54 = vadd.f32 %v552_v40, %v1397_v37  ;;  %v540_v61 = vmul.f32 %v480_v17, %v479_v21  ;;  %v541_v44 = vmul.f32 %v483_v31, %v482_v30  ;;  %v531_v63 = vadd.f32 %v530_v52, %v529_v55 }
  0xdf   :  { %v532_v10 = vmul.f32 %v1389_v14, %v482_v30  ;;  %v503_v19 = vadd.f32 %v502_v48, %v501_v6  ;;  %v516_v16 = vmul.f32 %v486_v36, %v480_v17  ;;  %v526_v7 = vadd.f32 %v525_v49, %v524_v1 }
  0xe0   :  { %v554_v34 = vadd.f32 1e-30, %v553_v54  ;;  %v527_v0 = vmul.f32 %v1389_v14, %v483_v31  ;;  %v510_v8 = vadd.f32 %v509_v4, %v508_v57  ;;  %v515_v5 = vadd.f32 %v514_v15, %v513_v2 }
  0xe1   :  { %v542_v9 = vadd.f32 %v541_v44, %v540_v61  ;;  %v543_v22 = vmul.f32 %v1389_v14, %v484_v23  ;;  %v533_v3 = vadd.f32 %v532_v10, %v531_v63  ;;  %v534_v12 = vmul.f32 %v486_v36, %v483_v31 }
  0xe2   :  { %1207 = vrcp.f32 %v554_v34  ;;  %v528_v13 = vadd.f32 %v527_v0, %v526_v7  ;;  %v517_v59 = vadd.f32 %v516_v16, %v515_v5  ;;  %v545_v30 = vmul.f32 %v486_v36, %v1389_v14 }
  0xe3   :  { %v544_v11 = vadd.f32 %v543_v22, %v542_v9  ;;  %v535_v17 = vadd.f32 %v534_v12, %v533_v3 }
  0xe5   :  { %v546_v29 = vadd.f32 %v545_v30, %v544_v11 }
  0xec   :  { %v1208_v24 = vpop.eup %1207 }
  0xed   :  { %v556_v35 = vmul.f32 %v1208_v24, %v496_v41  ;;  %v557_v21 = vmul.f32 %v1208_v24, %v503_v19  ;;  %v558_v39 = vmul.f32 %v1208_v24, %v510_v8  ;;  %v560_v26 = vmul.f32 %v1208_v24, %v521_v43 }
  0xee   :  { %v561_v45 = vmul.f32 %v1208_v24, %v528_v13  ;;  %v559_v32 = vmul.f32 %v1208_v24, %v517_v59  ;;  %v562_v46 = vmul.f32 %v1208_v24, %v535_v17  ;;  %v563_v41 = vmul.f32 %v1208_v24, %v1394_v25 }
  0xef   :  { %v566_v27 = vmul.f32 %v557_v21, %v557_v21  ;;  %v572_v18 = vmul.f32 %v556_v35, %v556_v35  ;;  %v567_v38 = vmul.f32 %v558_v39, %v558_v39  ;;  %v597_v40 = vmul.f32 %v560_v26, %v560_v26 }
  0xf0   :  { %v569_v31 = vmul.f32 %v561_v45, %v561_v45  ;;  %v1407_v20 = vmul.f32 %v1208_v24, %v546_v29  ;;  %v568_v33 = vmul.f32 %v559_v32, %v559_v32  ;;  %v570_v14 = vmul.f32 %v562_v46, %v562_v46 }
  0xf1   :  { %v573_v23 = vadd.f32 %v572_v18, %v566_v27  ;;  %v598_v36 = vadd.f32 %v597_v40, %v566_v27  ;;  %v565_v51 = vmul.f32 %v1208_v24, %v1397_v37  ;;  %v616_v42 = vmul.f32 %v563_v41, %v563_v41 }
  0xf2   :  { %v571_v43 = vmul.f32 %v1407_v20, %v1407_v20  ;;  %v615_v34 = vadd.f32 %v569_v31, %v567_v38  ;;  %v626_v28 = vadd.f32 %v570_v14, %v568_v33  ;;  %v576_v37 = vmul.f32 %v557_v21, %v556_v35 }
  0xf3   :  { %v574_v50 = vadd.f32 %v573_v23, %v567_v38  ;;  %v599_v54 = vadd.f32 %v598_v36, %v569_v31  ;;  %v628_v47 = vmul.f32 %v565_v51, %v565_v51  ;;  %v577_v48 = vmul.f32 %v560_v26, %v557_v21 }
  0xf4   :  { %v617_v60 = vadd.f32 %v616_v42, %v615_v34  ;;  %v627_v62 = vadd.f32 %v626_v28, %v571_v43  ;;  %v583_v4 = vmul.f32 %v558_v39, %v556_v35  ;;  %v584_v6 = vmul.f32 %v561_v45, %v557_v21 }
  0xf5   :  { %v575_v56 = vadd.f32 %v574_v50, %v568_v33  ;;  %v600_v58 = vadd.f32 %v599_v54, %v570_v14  ;;  %v579_v1 = vmul.f32 %v561_v45, %v558_v39  ;;  %v578_v57 = vadd.f32 %v577_v48, %v576_v37 }
  0xf6   :  { %v1412_v25 = vadd.f32 %v617_v60, %v571_v43  ;;  %v1415_v52 = vadd.f32 %v628_v47, %v627_v62  ;;  %v586_v2 = vmul.f32 %v563_v41, %v558_v39  ;;  %v601_v61 = vmul.f32 %v558_v39, %v557_v21 }
  0xf7   :  { %v630_v53 = vadd.f32 %v600_v58, %v575_v56  ;;  %v602_v44 = vmul.f32 %v561_v45, %v560_v26  ;;  %v585_v63 = vadd.f32 %v584_v6, %v583_v4  ;;  %v590_v10 = vmul.f32 %v559_v32, %v556_v35 }
  0xf8   :  { %v591_v19 = vmul.f32 %v562_v46, %v557_v21  ;;  %v608_v16 = vmul.f32 %v559_v32, %v557_v21  ;;  %v609_v7 = vmul.f32 %v562_v46, %v560_v26  ;;  %v581_v0 = vmul.f32 %v562_v46, %v559_v32 }
  0xf9   :  { %v631_v55 = vadd.f32 %v630_v53, %v1412_v25  ;;  %v588_v8 = vmul.f32 %v1407_v20, %v559_v32  ;;  %v580_v5 = vadd.f32 %v579_v1, %v578_v57  ;;  %v593_v9 = vmul.f32 %v1407_v20, %v558_v39 }
  0xfa   :  { %v603_v22 = vadd.f32 %v602_v44, %v601_v61  ;;  %v604_v3 = vmul.f32 %v563_v41, %v561_v45  ;;  %v587_v12 = vadd.f32 %v586_v2, %v585_v63  ;;  %v592_v24 = vadd.f32 %v591_v19, %v590_v10 }
  0xfb   :  { %v632_v15 = vadd.f32 %v631_v55, %v1415_v52  ;;  %v619_v13 = vmul.f32 %v559_v32, %v558_v39  ;;  %v620_v59 = vmul.f32 %v562_v46, %v561_v45  ;;  %v610_v11 = vadd.f32 %v609_v7, %v608_v16 }
  0xfc   :  { %v611_v30 = vmul.f32 %v1407_v20, %v561_v45  ;;  %v582_v35 = vadd.f32 %v581_v0, %v580_v5  ;;  %v595_v17 = vmul.f32 %v565_v51, %v559_v32  ;;  %v605_v27 = vadd.f32 %v604_v3, %v603_v22 }
  0xfd   :  { %v633_v49 = vadd.f32 1e-30, %v632_v15  ;;  %v606_v21 = vmul.f32 %v1407_v20, %v562_v46  ;;  %v589_v18 = vadd.f32 %v588_v8, %v587_v12  ;;  %v594_v26 = vadd.f32 %v593_v9, %v592_v24 }
  0xfe   :  { %v621_v29 = vadd.f32 %v620_v59, %v619_v13  ;;  %v622_v38 = vmul.f32 %v1407_v20, %v563_v41  ;;  %v612_v23 = vadd.f32 %v611_v30, %v610_v11  ;;  %v613_v31 = vmul.f32 %v565_v51, %v562_v46 }
  0xff   :  { %1209 = vrcp.f32 %v633_v49  ;;  %v607_v33 = vadd.f32 %v606_v21, %v605_v27  ;;  %v596_v14 = vadd.f32 %v595_v17, %v594_v26  ;;  %v624_v45 = vmul.f32 %v565_v51, %v1407_v20 }
 0x100   :  { %v623_v36 = vadd.f32 %v622_v38, %v621_v29  ;;  %v614_v32 = vadd.f32 %v613_v31, %v612_v23 }
 0x102   :  { %v625_v28 = vadd.f32 %v624_v45, %v623_v36 }
 0x109   :  { %v1210_v40 = vpop.eup %1209 }
 0x10a   :  { %v635_v50 = vmul.f32 %v1210_v40, %v575_v56  ;;  %v636_v39 = vmul.f32 %v1210_v40, %v582_v35  ;;  %v637_v54 = vmul.f32 %v1210_v40, %v589_v18  ;;  %v639_v42 = vmul.f32 %v1210_v40, %v600_v58 }
 0x10b   :  { %v640_v60 = vmul.f32 %v1210_v40, %v607_v33  ;;  %v638_v47 = vmul.f32 %v1210_v40, %v596_v14  ;;  %v641_v62 = vmul.f32 %v1210_v40, %v614_v32  ;;  %v642_v56 = vmul.f32 %v1210_v40, %v1412_v25 }
 0x10c   :  { %v645_v43 = vmul.f32 %v636_v39, %v636_v39  ;;  %v651_v34 = vmul.f32 %v635_v50, %v635_v50  ;;  %v646_v53 = vmul.f32 %v637_v54, %v637_v54  ;;  %v676_v55 = vmul.f32 %v639_v42, %v639_v42 }
 0x10d   :  { %v648_v46 = vmul.f32 %v640_v60, %v640_v60  ;;  %v1425_v37 = vmul.f32 %v1210_v40, %v625_v28  ;;  %v647_v48 = vmul.f32 %v638_v47, %v638_v47  ;;  %v649_v20 = vmul.f32 %v641_v62, %v641_v62 }
 0x10e   :  { %v652_v41 = vadd.f32 %v651_v34, %v645_v43  ;;  %v677_v51 = vadd.f32 %v676_v55, %v645_v43  ;;  %v644_v6 = vmul.f32 %v1210_v40, %v1415_v52  ;;  %v695_v57 = vmul.f32 %v642_v56, %v642_v56 }
 0x10f   :  { %v650_v58 = vmul.f32 %v1425_v37, %v1425_v37  ;;  %v694_v49 = vadd.f32 %v648_v46, %v646_v53  ;;  %v705_v44 = vadd.f32 %v649_v20, %v647_v48  ;;  %v655_v52 = vmul.f32 %v636_v39, %v635_v50 }
 0x110   :  { %v653_v4 = vadd.f32 %v652_v41, %v646_v53  ;;  %v678_v15 = vadd.f32 %v677_v51, %v648_v46  ;;  %v707_v63 = vmul.f32 %v644_v6, %v644_v6  ;;  %v656_v0 = vmul.f32 %v639_v42, %v636_v39 }
 0x111   :  { %v696_v61 = vadd.f32 %v695_v57, %v694_v49  ;;  %v706_v19 = vadd.f32 %v705_v44, %v650_v58  ;;  %v662_v8 = vmul.f32 %v637_v54, %v635_v50  ;;  %v663_v5 = vmul.f32 %v640_v60, %v636_v39 }
 0x112   :  { %v654_v1 = vadd.f32 %v653_v4, %v647_v48  ;;  %v679_v2 = vadd.f32 %v678_v15, %v649_v20  ;;  %v658_v22 = vmul.f32 %v640_v60, %v637_v54  ;;  %v657_v12 = vadd.f32 %v656_v0, %v655_v52 }
 0x113   :  { %v1430_v25 = vadd.f32 %v696_v61, %v650_v58  ;;  %v1433_v7 = vadd.f32 %v707_v63, %v706_v19  ;;  %v665_v24 = vmul.f32 %v642_v56, %v637_v54  ;;  %v680_v13 = vmul.f32 %v637_v54, %v636_v39 }
 0x114   :  { %v709_v10 = vadd.f32 %v679_v2, %v654_v1  ;;  %v681_v59 = vmul.f32 %v640_v60, %v639_v42  ;;  %v664_v11 = vadd.f32 %v663_v5, %v662_v8  ;;  %v669_v30 = vmul.f32 %v638_v47, %v635_v50 }
 0x115   :  { %v670_v35 = vmul.f32 %v641_v62, %v636_v39  ;;  %v687_v17 = vmul.f32 %v638_v47, %v636_v39  ;;  %v688_v27 = vmul.f32 %v641_v62, %v639_v42  ;;  %v660_v21 = vmul.f32 %v641_v62, %v638_v47 }
 0x116   :  { %v710_v16 = vadd.f32 %v709_v10, %v1430_v25  ;;  %v667_v18 = vmul.f32 %v1425_v37, %v638_v47  ;;  %v659_v26 = vadd.f32 %v658_v22, %v657_v12  ;;  %v672_v29 = vmul.f32 %v1425_v37, %v637_v54 }
 0x117   :  { %v682_v38 = vadd.f32 %v681_v59, %v680_v13  ;;  %v683_v23 = vmul.f32 %v642_v56, %v640_v60  ;;  %v666_v31 = vadd.f32 %v665_v24, %v664_v11  ;;  %v671_v40 = vadd.f32 %v670_v35, %v669_v30 }
 0x118   :  { %v711_v9 = vadd.f32 %v710_v16, %v1433_v7  ;;  %v698_v33 = vmul.f32 %v638_v47, %v637_v54  ;;  %v699_v14 = vmul.f32 %v641_v62, %v640_v60  ;;  %v689_v36 = vadd.f32 %v688_v27, %v687_v17 }
 0x119   :  { %v690_v45 = vmul.f32 %v1425_v37, %v640_v60  ;;  %v661_v50 = vadd.f32 %v660_v21, %v659_v26  ;;  %v674_v32 = vmul.f32 %v644_v6, %v638_v47  ;;  %v684_v43 = vadd.f32 %v683_v23, %v682_v38 }
 0x11a   :  { %v712_v3 = vadd.f32 1e-30, %v711_v9  ;;  %v685_v39 = vmul.f32 %v1425_v37, %v641_v62  ;;  %v668_v34 = vadd.f32 %v667_v18, %v666_v31  ;;  %v673_v42 = vadd.f32 %v672_v29, %v671_v40 }
 0x11b   :  { %v700_v28 = vadd.f32 %v699_v14, %v698_v33  ;;  %v701_v53 = vmul.f32 %v1425_v37, %v642_v56  ;;  %v691_v41 = vadd.f32 %v690_v45, %v689_v36  ;;  %v692_v46 = vmul.f32 %v644_v6, %v641_v62 }
 0x11c   :  { %1211 = vrcp.f32 %v712_v3  ;;  %v686_v48 = vadd.f32 %v685_v39, %v684_v43  ;;  %v675_v20 = vadd.f32 %v674_v32, %v673_v42  ;;  %v703_v60 = vmul.f32 %v644_v6, %v1425_v37 }
 0x11d   :  { %v702_v51 = vadd.f32 %v701_v53, %v700_v28  ;;  %v693_v47 = vadd.f32 %v692_v46, %v691_v41 }
 0x11f   :  { %v704_v44 = vadd.f32 %v703_v60, %v702_v51 }
 0x126   :  { %v1212_v55 = vpop.eup %1211 }
 0x127   :  { %v714_v4 = vmul.f32 %v1212_v55, %v654_v1  ;;  %v715_v54 = vmul.f32 %v1212_v55, %v661_v50  ;;  %v716_v15 = vmul.f32 %v1212_v55, %v668_v34  ;;  %v718_v57 = vmul.f32 %v1212_v55, %v679_v2 }
 0x128   :  { %v719_v61 = vmul.f32 %v1212_v55, %v686_v48  ;;  %v717_v63 = vmul.f32 %v1212_v55, %v675_v20  ;;  %v720_v19 = vmul.f32 %v1212_v55, %v693_v47  ;;  %v721_v1 = vmul.f32 %v1212_v55, %v1430_v25 }
 0x129   :  { %v724_v58 = vmul.f32 %v715_v54, %v715_v54  ;;  %v730_v49 = vmul.f32 %v714_v4, %v714_v4  ;;  %v725_v10 = vmul.f32 %v716_v15, %v716_v15  ;;  %v755_v16 = vmul.f32 %v718_v57, %v718_v57 }
 0x12a   :  { %v727_v62 = vmul.f32 %v719_v61, %v719_v61  ;;  %v1443_v52 = vmul.f32 %v1212_v55, %v704_v44  ;;  %v726_v0 = vmul.f32 %v717_v63, %v717_v63  ;;  %v728_v37 = vmul.f32 %v720_v19, %v720_v19 }
 0x12b   :  { %v731_v56 = vadd.f32 %v730_v49, %v724_v58  ;;  %v756_v6 = vadd.f32 %v755_v16, %v724_v58  ;;  %v723_v5 = vmul.f32 %v1212_v55, %v1433_v7  ;;  %v774_v12 = vmul.f32 %v721_v1, %v721_v1 }
 0x12c   :  { %v729_v2 = vmul.f32 %v1443_v52, %v1443_v52  ;;  %v773_v3 = vadd.f32 %v727_v62, %v725_v10  ;;  %v784_v59 = vadd.f32 %v728_v37, %v726_v0  ;;  %v734_v7 = vmul.f32 %v715_v54, %v714_v4 }
 0x12d   :  { %v732_v8 = vadd.f32 %v731_v56, %v725_v10  ;;  %v757_v9 = vadd.f32 %v756_v6, %v727_v62  ;;  %v786_v11 = vmul.f32 %v723_v5, %v723_v5  ;;  %v735_v21 = vmul.f32 %v718_v57, %v715_v54 }
 0x12e   :  { %v775_v13 = vadd.f32 %v774_v12, %v773_v3  ;;  %v785_v35 = vadd.f32 %v784_v59, %v729_v2  ;;  %v741_v18 = vmul.f32 %v716_v15, %v714_v4  ;;  %v742_v26 = vmul.f32 %v719_v61, %v715_v54 }
 0x12f   :  { %v733_v22 = vadd.f32 %v732_v8, %v726_v0  ;;  %v758_v24 = vadd.f32 %v757_v9, %v728_v37  ;;  %v737_v38 = vmul.f32 %v719_v61, %v716_v15  ;;  %v736_v31 = vadd.f32 %v735_v21, %v734_v7 }
 0x130   :  { %v1448_v25 = vadd.f32 %v775_v13, %v729_v2  ;;  %v1451_v27 = vadd.f32 %v786_v11, %v785_v35  ;;  %v744_v40 = vmul.f32 %v721_v1, %v716_v15  ;;  %v759_v33 = vmul.f32 %v716_v15, %v715_v54 }
 0x131   :  { %v788_v30 = vadd.f32 %v758_v24, %v733_v22  ;;  %v760_v14 = vmul.f32 %v719_v61, %v718_v57  ;;  %v743_v36 = vadd.f32 %v742_v26, %v741_v18  ;;  %v748_v45 = vmul.f32 %v717_v63, %v714_v4 }
 0x132   :  { %v749_v50 = vmul.f32 %v720_v19, %v715_v54  ;;  %v766_v32 = vmul.f32 %v717_v63, %v715_v54  ;;  %v767_v43 = vmul.f32 %v720_v19, %v718_v57  ;;  %v739_v39 = vmul.f32 %v720_v19, %v717_v63 }
 0x133   :  { %v789_v17 = vadd.f32 %v788_v30, %v1448_v25  ;;  %v746_v34 = vmul.f32 %v1443_v52, %v717_v63  ;;  %v738_v42 = vadd.f32 %v737_v38, %v736_v31  ;;  %v751_v28 = vmul.f32 %v1443_v52, %v716_v15 }
 0x134   :  { %v761_v53 = vadd.f32 %v760_v14, %v759_v33  ;;  %v762_v41 = vmul.f32 %v721_v1, %v719_v61  ;;  %v745_v46 = vadd.f32 %v744_v40, %v743_v36  ;;  %v750_v55 = vadd.f32 %v749_v50, %v748_v45 }
 0x135   :  { %v790_v29 = vadd.f32 %v789_v17, %v1451_v27  ;;  %v777_v48 = vmul.f32 %v717_v63, %v716_v15  ;;  %v778_v20 = vmul.f32 %v720_v19, %v719_v61  ;;  %v768_v51 = vadd.f32 %v767_v43, %v766_v32 }
 0x136   :  { %v769_v60 = vmul.f32 %v1443_v52, %v719_v61  ;;  %v740_v4 = vadd.f32 %v739_v39, %v738_v42  ;;  %v753_v47 = vmul.f32 %v723_v5, %v717_v63  ;;  %v763_v58 = vadd.f32 %v762_v41, %v761_v53 }
 0x137   :  { %v791_v23 = vadd.f32 1e-30, %v790_v29  ;;  %v764_v54 = vmul.f32 %v1443_v52, %v720_v19  ;;  %v747_v49 = vadd.f32 %v746_v34, %v745_v46  ;;  %v752_v57 = vadd.f32 %v751_v28, %v750_v55 }
 0x138   :  { %v779_v44 = vadd.f32 %v778_v20, %v777_v48  ;;  %v780_v10 = vmul.f32 %v1443_v52, %v721_v1  ;;  %v770_v56 = vadd.f32 %v769_v60, %v768_v51  ;;  %v771_v62 = vmul.f32 %v723_v5, %v720_v19 }
 0x139   :  { %1213 = vrcp.f32 %v791_v23  ;;  %v765_v0 = vadd.f32 %v764_v54, %v763_v58  ;;  %v754_v37 = vadd.f32 %v753_v47, %v752_v57  ;;  %v782_v61 = vmul.f32 %v723_v5, %v1443_v52 }
 0x13a   :  { %v781_v6 = vadd.f32 %v780_v10, %v779_v44  ;;  %v772_v63 = vadd.f32 %v771_v62, %v770_v56 }
 0x13c   :  { %v783_v59 = vadd.f32 %v782_v61, %v781_v6 }
 0x143   :  { %v1214_v16 = vpop.eup %1213 }
 0x144   :  { %v793_v8 = vmul.f32 %v1214_v16, %v733_v22  ;;  %v794_v15 = vmul.f32 %v1214_v16, %v740_v4  ;;  %v795_v9 = vmul.f32 %v1214_v16, %v747_v49  ;;  %v797_v12 = vmul.f32 %v1214_v16, %v758_v24 }
 0x145   :  { %v798_v13 = vmul.f32 %v1214_v16, %v765_v0  ;;  %v796_v11 = vmul.f32 %v1214_v16, %v754_v37  ;;  %v799_v35 = vmul.f32 %v1214_v16, %v772_v63  ;;  %v800_v22 = vmul.f32 %v1214_v16, %v1448_v25 }
 0x146   :  { %v803_v2 = vmul.f32 %v794_v15, %v794_v15  ;;  %v809_v3 = vmul.f32 %v793_v8, %v793_v8  ;;  %v804_v30 = vmul.f32 %v795_v9, %v795_v9  ;;  %v834_v17 = vmul.f32 %v797_v12, %v797_v12 }
 0x147   :  { %v806_v19 = vmul.f32 %v798_v13, %v798_v13  ;;  %v1461_v7 = vmul.f32 %v1214_v16, %v783_v59  ;;  %v805_v21 = vmul.f32 %v796_v11, %v796_v11  ;;  %v807_v52 = vmul.f32 %v799_v35, %v799_v35 }
 0x148   :  { %v810_v1 = vadd.f32 %v809_v3, %v803_v2  ;;  %v835_v5 = vadd.f32 %v834_v17, %v803_v2  ;;  %v802_v26 = vmul.f32 %v1214_v16, %v1451_v27  ;;  %v853_v31 = vmul.f32 %v800_v22, %v800_v22 }
 0x149   :  { %v808_v24 = vmul.f32 %v1461_v7, %v1461_v7  ;;  %v852_v23 = vadd.f32 %v806_v19, %v804_v30  ;;  %v863_v14 = vadd.f32 %v807_v52, %v805_v21  ;;  %v813_v27 = vmul.f32 %v794_v15, %v793_v8 }
 0x14a   :  { %v811_v18 = vadd.f32 %v810_v1, %v804_v30  ;;  %v836_v29 = vadd.f32 %v835_v5, %v806_v19  ;;  %v865_v36 = vmul.f32 %v802_v26, %v802_v26  ;;  %v814_v39 = vmul.f32 %v797_v12, %v794_v15 }
 0x14b   :  { %v854_v33 = vadd.f32 %v853_v31, %v852_v23  ;;  %v864_v50 = vadd.f32 %v863_v14, %v808_v24  ;;  %v820_v34 = vmul.f32 %v795_v9, %v793_v8  ;;  %v821_v42 = vmul.f32 %v798_v13, %v794_v15 }
 0x14c   :  { %v812_v38 = vadd.f32 %v811_v18, %v805_v21  ;;  %v837_v40 = vadd.f32 %v836_v29, %v807_v52  ;;  %v816_v53 = vmul.f32 %v798_v13, %v795_v9  ;;  %v815_v46 = vadd.f32 %v814_v39, %v813_v27 }
 0x14d   :  { %v1466_v25 = vadd.f32 %v854_v33, %v808_v24  ;;  %v1469_v43 = vadd.f32 %v865_v36, %v864_v50  ;;  %v823_v55 = vmul.f32 %v800_v22, %v795_v9  ;;  %v838_v48 = vmul.f32 %v795_v9, %v794_v15 }
 0x14e   :  { %v867_v45 = vadd.f32 %v837_v40, %v812_v38  ;;  %v839_v20 = vmul.f32 %v798_v13, %v797_v12  ;;  %v822_v51 = vadd.f32 %v821_v42, %v820_v34  ;;  %v827_v60 = vmul.f32 %v796_v11, %v793_v8 }
 0x14f   :  { %v828_v4 = vmul.f32 %v799_v35, %v794_v15  ;;  %v845_v47 = vmul.f32 %v796_v11, %v794_v15  ;;  %v846_v58 = vmul.f32 %v799_v35, %v797_v12  ;;  %v818_v54 = vmul.f32 %v799_v35, %v796_v11 }
 0x150   :  { %v868_v32 = vadd.f32 %v867_v45, %v1466_v25  ;;  %v825_v49 = vmul.f32 %v1461_v7, %v796_v11  ;;  %v817_v57 = vadd.f32 %v816_v53, %v815_v46  ;;  %v830_v44 = vmul.f32 %v1461_v7, %v795_v9 }
 0x151   :  { %v840_v10 = vadd.f32 %v839_v20, %v838_v48  ;;  %v841_v56 = vmul.f32 %v800_v22, %v798_v13  ;;  %v824_v62 = vadd.f32 %v823_v55, %v822_v51  ;;  %v829_v16 = vadd.f32 %v828_v4, %v827_v60 }
 0x152   :  { %v869_v28 = vadd.f32 %v868_v32, %v1469_v43  ;;  %v856_v0 = vmul.f32 %v796_v11, %v795_v9  ;;  %v857_v37 = vmul.f32 %v799_v35, %v798_v13  ;;  %v847_v6 = vadd.f32 %v846_v58, %v845_v47 }
 0x153   :  { %v848_v61 = vmul.f32 %v1461_v7, %v798_v13  ;;  %v819_v8 = vadd.f32 %v818_v54, %v817_v57  ;;  %v832_v63 = vmul.f32 %v802_v26, %v796_v11  ;;  %v842_v2 = vadd.f32 %v841_v56, %v840_v10 }
 0x154   :  { %v870_v41 = vadd.f32 1e-30, %v869_v28  ;;  %v843_v15 = vmul.f32 %v1461_v7, %v799_v35  ;;  %v826_v3 = vadd.f32 %v825_v49, %v824_v62  ;;  %v831_v12 = vadd.f32 %v830_v44, %v829_v16 }
 0x155   :  { %v858_v59 = vadd.f32 %v857_v37, %v856_v0  ;;  %v859_v30 = vmul.f32 %v1461_v7, %v800_v22  ;;  %v849_v1 = vadd.f32 %v848_v61, %v847_v6  ;;  %v850_v19 = vmul.f32 %v802_v26, %v799_v35 }
 0x156   :  { %1215 = vrcp.f32 %v870_v41  ;;  %v844_v21 = vadd.f32 %v843_v15, %v842_v2  ;;  %v833_v52 = vadd.f32 %v832_v63, %v831_v12  ;;  %v861_v13 = vmul.f32 %v802_v26, %v1461_v7 }
 0x157   :  { %v860_v5 = vadd.f32 %v859_v30, %v858_v59  ;;  %v851_v11 = vadd.f32 %v850_v19, %v849_v1 }
 0x159   :  { %v862_v14 = vadd.f32 %v861_v13, %v860_v5 }
 0x160   :  { %v1216_v17 = vpop.eup %1215 }
 0x161   :  { %v872_v18 = vmul.f32 %v1216_v17, %v812_v38  ;;  %v873_v9 = vmul.f32 %v1216_v17, %v819_v8  ;;  %v874_v29 = vmul.f32 %v1216_v17, %v826_v3  ;;  %v876_v31 = vmul.f32 %v1216_v17, %v837_v40 }
 0x162   :  { %v877_v33 = vmul.f32 %v1216_v17, %v844_v21  ;;  %v875_v36 = vmul.f32 %v1216_v17, %v833_v52  ;;  %v878_v50 = vmul.f32 %v1216_v17, %v851_v11  ;;  %v879_v38 = vmul.f32 %v1216_v17, %v1466_v25 }
 0x163   :  { %v882_v24 = vmul.f32 %v873_v9, %v873_v9  ;;  %v888_v23 = vmul.f32 %v872_v18, %v872_v18  ;;  %v883_v45 = vmul.f32 %v874_v29, %v874_v29  ;;  %v913_v32 = vmul.f32 %v876_v31, %v876_v31 }
 0x164   :  { %v885_v35 = vmul.f32 %v877_v33, %v877_v33  ;;  %v1479_v27 = vmul.f32 %v1216_v17, %v862_v14  ;;  %v884_v39 = vmul.f32 %v875_v36, %v875_v36  ;;  %v886_v7 = vmul.f32 %v878_v50, %v878_v50 }
 0x165   :  { %v889_v22 = vadd.f32 %v888_v23, %v882_v24  ;;  %v914_v26 = vadd.f32 %v913_v32, %v882_v24  ;;  %v881_v42 = vmul.f32 %v1216_v17, %v1469_v43  ;;  %v932_v46 = vmul.f32 %v879_v38, %v879_v38 }
 0x166   :  { %v887_v40 = vmul.f32 %v1479_v27, %v1479_v27  ;;  %v931_v41 = vadd.f32 %v885_v35, %v883_v45  ;;  %v942_v20 = vadd.f32 %v886_v7, %v884_v39  ;;  %v892_v43 = vmul.f32 %v873_v9, %v872_v18 }
 0x167   :  { %v890_v34 = vadd.f32 %v889_v22, %v883_v45  ;;  %v915_v28 = vadd.f32 %v914_v26, %v885_v35  ;;  %v944_v51 = vmul.f32 %v881_v42, %v881_v42  ;;  %v893_v54 = vmul.f32 %v876_v31, %v873_v9 }
 0x168   :  { %v933_v48 = vadd.f32 %v932_v46, %v931_v41  ;;  %v943_v4 = vadd.f32 %v942_v20, %v887_v40  ;;  %v899_v49 = vmul.f32 %v874_v29, %v872_v18  ;;  %v900_v57 = vmul.f32 %v877_v33, %v873_v9 }
 0x169   :  { %v891_v53 = vadd.f32 %v890_v34, %v884_v39  ;;  %v916_v55 = vadd.f32 %v915_v28, %v886_v7  ;;  %v895_v10 = vmul.f32 %v877_v33, %v874_v29  ;;  %v894_v62 = vadd.f32 %v893_v54, %v892_v43 }
 0x16a   :  { %v1484_v25 = vadd.f32 %v933_v48, %v887_v40  ;;  %v1487_v58 = vadd.f32 %v944_v51, %v943_v4  ;;  %v902_v16 = vmul.f32 %v879_v38, %v874_v29  ;;  %v917_v0 = vmul.f32 %v874_v29, %v873_v9 }
 0x16b   :  { %v946_v60 = vadd.f32 %v916_v55, %v891_v53  ;;  %v918_v37 = vmul.f32 %v877_v33, %v876_v31  ;;  %v901_v6 = vadd.f32 %v900_v57, %v899_v49  ;;  %v906_v61 = vmul.f32 %v875_v36, %v872_v18 }
 0x16c   :  { %v907_v8 = vmul.f32 %v878_v50, %v873_v9  ;;  %v924_v63 = vmul.f32 %v875_v36, %v873_v9  ;;  %v925_v2 = vmul.f32 %v878_v50, %v876_v31  ;;  %v897_v15 = vmul.f32 %v878_v50, %v875_v36 }
 0x16d   :  { %v947_v47 = vadd.f32 %v946_v60, %v1484_v25  ;;  %v904_v3 = vmul.f32 %v1479_v27, %v875_v36  ;;  %v896_v12 = vadd.f32 %v895_v10, %v894_v62  ;;  %v909_v59 = vmul.f32 %v1479_v27, %v874_v29 }
 0x16e   :  { %v919_v30 = vadd.f32 %v918_v37, %v917_v0  ;;  %v920_v1 = vmul.f32 %v879_v38, %v877_v33  ;;  %v903_v19 = vadd.f32 %v902_v16, %v901_v6  ;;  %v908_v17 = vadd.f32 %v907_v8, %v906_v61 }
 0x16f   :  { %v948_v44 = vadd.f32 %v947_v47, %v1487_v58  ;;  %v935_v21 = vmul.f32 %v875_v36, %v874_v29  ;;  %v936_v52 = vmul.f32 %v878_v50, %v877_v33  ;;  %v926_v5 = vadd.f32 %v925_v2, %v924_v63 }
 0x170   :  { %v927_v13 = vmul.f32 %v1479_v27, %v877_v33  ;;  %v898_v18 = vadd.f32 %v897_v15, %v896_v12  ;;  %v911_v11 = vmul.f32 %v881_v42, %v875_v36  ;;  %v921_v24 = vadd.f32 %v920_v1, %v919_v30 }
 0x171   :  { %v949_v56 = vadd.f32 1e-30, %v948_v44  ;;  %v922_v9 = vmul.f32 %v1479_v27, %v878_v50  ;;  %v905_v23 = vadd.f32 %v904_v3, %v903_v19  ;;  %v910_v31 = vadd.f32 %v909_v59, %v908_v17 }
 0x172   :  { %v937_v14 = vadd.f32 %v936_v52, %v935_v21  ;;  %v938_v45 = vmul.f32 %v1479_v27, %v879_v38  ;;  %v928_v22 = vadd.f32 %v927_v13, %v926_v5  ;;  %v929_v35 = vmul.f32 %v881_v42, %v878_v50 }
 0x173   :  { %1217 = vrcp.f32 %v949_v56  ;;  %v923_v39 = vadd.f32 %v922_v9, %v921_v24  ;;  %v912_v7 = vadd.f32 %v911_v11, %v910_v31  ;;  %v940_v33 = vmul.f32 %v881_v42, %v1479_v27 }
 0x174   :  { %v939_v26 = vadd.f32 %v938_v45, %v937_v14  ;;  %v930_v36 = vadd.f32 %v929_v35, %v928_v22 }
 0x176   :  { %v941_v20 = vadd.f32 %v940_v33, %v939_v26 }
 0x17d   :  { %v1218_v32 = vpop.eup %1217 }
 0x17e   :  { %v951_v34 = vmul.f32 %v1218_v32, %v891_v53  ;;  %v952_v29 = vmul.f32 %v1218_v32, %v898_v18  ;;  %v953_v28 = vmul.f32 %v1218_v32, %v905_v23  ;;  %v955_v46 = vmul.f32 %v1218_v32, %v916_v55 }
 0x17f   :  { %v956_v48 = vmul.f32 %v1218_v32, %v923_v39  ;;  %v954_v51 = vmul.f32 %v1218_v32, %v912_v7  ;;  %v957_v4 = vmul.f32 %v1218_v32, %v930_v36  ;;  %v958_v53 = vmul.f32 %v1218_v32, %v1484_v25 }
 0x180   :  { %v961_v40 = vmul.f32 %v952_v29, %v952_v29  ;;  %v967_v41 = vmul.f32 %v951_v34, %v951_v34  ;;  %v962_v60 = vmul.f32 %v953_v28, %v953_v28  ;;  %v992_v47 = vmul.f32 %v955_v46, %v955_v46 }
 0x181   :  { %v964_v50 = vmul.f32 %v956_v48, %v956_v48  ;;  %v959_v43 = vmul.f32 %v1218_v32, %v941_v20  ;;  %v963_v54 = vmul.f32 %v954_v51, %v954_v51  ;;  %v965_v57 = vmul.f32 %v957_v4, %v957_v4 }
 0x182   :  { %v968_v38 = vadd.f32 %v967_v41, %v961_v40  ;;  %v993_v27 = vadd.f32 %v992_v47, %v961_v40  ;;  %v960_v42 = vmul.f32 %v1218_v32, %v1487_v58  ;;  %v1011_v62 = vmul.f32 %v958_v53, %v958_v53 }
 0x183   :  { %v966_v10 = vmul.f32 %v959_v43, %v959_v43  ;;  %v1010_v56 = vadd.f32 %v964_v50, %v962_v60  ;;  %v1021_v37 = vadd.f32 %v965_v57, %v963_v54  ;;  %v971_v2 = vmul.f32 %v952_v29, %v951_v34 }
 0x184   :  { %v969_v49 = vadd.f32 %v968_v38, %v962_v60  ;;  %v994_v44 = vadd.f32 %v993_v27, %v964_v50  ;;  %v1023_v6 = vmul.f32 %v960_v42, %v960_v42  ;;  %v972_v3 = vmul.f32 %v955_v46, %v952_v29 }
 0x185   :  { %v1012_v0 = vadd.f32 %v1011_v62, %v1010_v56  ;;  %v1022_v63 = vadd.f32 %v1021_v37, %v966_v10  ;;  %v978_v12 = vmul.f32 %v953_v28, %v951_v34  ;;  %v979_v59 = vmul.f32 %v956_v48, %v952_v29 }
 0x186   :  { %v970_v55 = vadd.f32 %v969_v49, %v963_v54  ;;  %v995_v16 = vadd.f32 %v994_v44, %v965_v57  ;;  %v985_v30 = vmul.f32 %v954_v51, %v951_v34  ;;  %v986_v58 = vmul.f32 %v957_v4, %v952_v29 }
 0x187   :  { %v1013_v61 = vadd.f32 %v1012_v0, %v966_v10  ;;  %v1024_v15 = vadd.f32 %v1023_v6, %v1022_v63  ;;  %v996_v1 = vmul.f32 %v953_v28, %v952_v29  ;;  %v997_v19 = vmul.f32 %v956_v48, %v955_v46 }
 0x188   :  { %v1025_v8 = vadd.f32 %v995_v16, %v970_v55  ;;  %v1003_v21 = vmul.f32 %v954_v51, %v952_v29  ;;  %v1004_v52 = vmul.f32 %v957_v4, %v955_v46  ;;  %v1014_v5 = vmul.f32 %v954_v51, %v953_v28 }
 0x189   :  { %v1015_v13 = vmul.f32 %v957_v4, %v956_v48  ;;  %v974_v18 = vmul.f32 %v956_v48, %v953_v28  ;;  %v973_v24 = vadd.f32 %v972_v3, %v971_v2  ;;  %v980_v9 = vadd.f32 %v979_v59, %v978_v12 }
 0x18a   :  { %v1026_v25 = vadd.f32 %v1025_v8, %v1013_v61  ;;  %v981_v23 = vmul.f32 %v958_v53, %v953_v28  ;;  %v988_v31 = vmul.f32 %v959_v43, %v953_v28  ;;  %v987_v14 = vadd.f32 %v986_v58, %v985_v30 }
 0x18b   :  { %v998_v45 = vadd.f32 %v997_v19, %v996_v1  ;;  %v999_v22 = vmul.f32 %v958_v53, %v956_v48  ;;  %v1005_v35 = vadd.f32 %v1004_v52, %v1003_v21  ;;  %v1006_v32 = vmul.f32 %v959_v43, %v956_v48 }
 0x18c   :  { %v1027_v17 = vadd.f32 %v1026_v25, %v1024_v15  ;;  %v1016_v39 = vadd.f32 %v1015_v13, %v1014_v5  ;;  %v1017_v34 = vmul.f32 %v959_v43, %v958_v53  ;;  %v975_v7 = vadd.f32 %v974_v18, %v973_v24 }
 0x18d   :  { %v976_v26 = vmul.f32 %v957_v4, %v954_v51  ;;  %v983_v29 = vmul.f32 %v959_v43, %v954_v51  ;;  %v990_v33 = vmul.f32 %v960_v42, %v954_v51  ;;  %v982_v36 = vadd.f32 %v981_v23, %v980_v9 }
 0x18e   :  { %v1028_v11 = vadd.f32 1e-30, %v1027_v17  ;;  %v989_v40 = vadd.f32 %v988_v31, %v987_v14  ;;  %v1001_v41 = vmul.f32 %v959_v43, %v957_v4  ;;  %v1008_v46 = vmul.f32 %v960_v42, %v957_v4 }
 0x18f   :  { %v1000_v20 = vadd.f32 %v999_v22, %v998_v45  ;;  %v1007_v60 = vadd.f32 %v1006_v32, %v1005_v35  ;;  %v1018_v38 = vadd.f32 %v1017_v34, %v1016_v39  ;;  %v1019_v28 = vmul.f32 %v960_v42, %v959_v43 }
 0x190   :  { %1219 = vrcp.f32 %v1028_v11  ;;  %v977_v50 = vadd.f32 %v976_v26, %v975_v7  ;;  %v984_v47 = vadd.f32 %v983_v29, %v982_v36  ;;  %v991_v54 = vadd.f32 %v990_v33, %v989_v40 }
 0x191   :  { %v1002_v49 = vadd.f32 %v1001_v41, %v1000_v20  ;;  %v1009_v57 = vadd.f32 %v1008_v46, %v1007_v60  ;;  %v1020_v48 = vadd.f32 %v1019_v28, %v1018_v38 }
 0x19a   :  { %v1220_v27 = vpop.eup %1219 }
 0x19b   :  { %v1030_v53 = vmul.f32 %v1220_v27, %v970_v55  ;;  %v1031_v44 = vmul.f32 %v1220_v27, %v977_v50  ;;  %v1032_v10 = vmul.f32 %v1220_v27, %v984_v47  ;;  %v1498_v56 = vmul.f32 %v1220_v27, %v991_v54 }
 0x19c   :  { %v1034_v51 = vmul.f32 %v1220_v27, %v995_v16  ;;  %v1037_v62 = vmul.f32 %v1220_v27, %v1013_v61  ;;  %v1035_v0 = vmul.f32 %v1220_v27, %v1002_v49  ;;  %v1500_v4 = vmul.f32 %v1220_v27, %v1009_v57 }
 0x19d   :  { %v1502_v37 = vmul.f32 %v1220_v27, %v1020_v48  ;;  %v1504_v43 = vmul.f32 %v1220_v27, %v1024_v15 }
 0x19e   :  { %vm1506_vm0 = vcmp.ge.f32.partialorder %v1030_v53, %v1034_v51 }
 0x19f   :  { %v1041_v55 = vsel %vm1506_vm0, %v1030_v53, %v1031_v44  ;;  %v1042_v6 = vsel %vm1506_vm0, %v1031_v44, %v1034_v51  ;;  %v1043_v16 = vsel %vm1506_vm0, %v1032_v10, %v1035_v0  ;;  %v1044_v61 = vsel %vm1506_vm0, %v1498_v56, %v1500_v4 }
 0x1a0   :  { %v1045_v8 = vsel %vm1506_vm0, %v1030_v53, %v1034_v51  ;;  %vm1046_vm1 = vcmp.ge.f32.partialorder %v1037_v62, %v1504_v43 }
 0x1a1   :  { %v1047_v63 = vsel %vm1046_vm1, %v1032_v10, %v1498_v56  ;;  %v1048_v25 = vsel %vm1046_vm1, %v1035_v0, %v1500_v4  ;;  %v1049_v2 = vsel %vm1046_vm1, %v1037_v62, %v1502_v37  ;;  %v1050_v15 = vsel %vm1046_vm1, %v1502_v37, %v1504_v43 }
 0x1a2   :  { %v1051_v3 = vsel %vm1046_vm1, %v1037_v62, %v1504_v43 }
 0x1a3   :  { %vm1052_vm2 = vcmp.ge.f32.partialorder %v1045_v8, %v1051_v3 }
 0x1a4   :  { %v1053_v12 = vsel %vm1052_vm2, %v1041_v55, %v1047_v63  ;;  %v1054_v59 = vsel %vm1052_vm2, %v1042_v6, %v1048_v25  ;;  %v1055_v30 = vsel %vm1052_vm2, %v1043_v16, %v1049_v2  ;;  %v1056_v58 = vsel %vm1052_vm2, %v1044_v61, %v1050_v15 }
 0x1a5   :  { %v1057_v1 = vmul.f32 %v1053_v12, %v1030_v53  ;;  %v1058_v19 = vmul.f32 %v1054_v59, %v1031_v44  ;;  %v1060_v17 = vmul.f32 %v1055_v30, %v1032_v10  ;;  %v1062_v21 = vmul.f32 %v1056_v58, %v1498_v56 }
 0x1a6   :  { %v1064_v52 = vmul.f32 %v1053_v12, %v1031_v44  ;;  %v1065_v5 = vmul.f32 %v1054_v59, %v1034_v51  ;;  %v1067_v13 = vmul.f32 %v1055_v30, %v1035_v0  ;;  %v1071_v11 = vmul.f32 %v1053_v12, %v1032_v10 }
 0x1a7   :  { %v1059_v18 = vadd.f32 %v1058_v19, %v1057_v1  ;;  %v1072_v24 = vmul.f32 %v1054_v59, %v1035_v0  ;;  %v1074_v9 = vmul.f32 %v1055_v30, %v1037_v62  ;;  %v1069_v31 = vmul.f32 %v1056_v58, %v1500_v4 }
 0x1a8   :  { %v1066_v23 = vadd.f32 %v1065_v5, %v1064_v52  ;;  %v1078_v14 = vmul.f32 %v1053_v12, %v1498_v56  ;;  %v1079_v45 = vmul.f32 %v1054_v59, %v1500_v4  ;;  %v1076_v32 = vmul.f32 %v1056_v58, %v1502_v37 }
 0x1a9   :  { %v1061_v22 = vadd.f32 %v1060_v17, %v1059_v18  ;;  %v1073_v35 = vadd.f32 %v1072_v24, %v1071_v11  ;;  %v1081_v39 = vmul.f32 %v1055_v30, %v1502_v37  ;;  %v1083_v26 = vmul.f32 %v1056_v58, %v1504_v43 }
 0x1aa   :  { %v1068_v34 = vadd.f32 %v1067_v13, %v1066_v23  ;;  %v1080_v7 = vadd.f32 %v1079_v45, %v1078_v14 }
 0x1ab   :  { %v1063_v29 = vadd.f32 %v1062_v21, %v1061_v22  ;;  %v1075_v33 = vadd.f32 %v1074_v9, %v1073_v35 }
 0x1ac   :  { %v1070_v36 = vadd.f32 %v1069_v31, %v1068_v34  ;;  %v1082_v40 = vadd.f32 %v1081_v39, %v1080_v7 }
 0x1ad   :  { %v1077_v41 = vadd.f32 %v1076_v32, %v1075_v33  ;;  %v1085_v46 = vmul.f32 %v1063_v29, %v1030_v53  ;;  %v1092_v20 = vmul.f32 %v1063_v29, %v1031_v44  ;;  %v1099_v60 = vmul.f32 %v1063_v29, %v1032_v10 }
 0x1ae   :  { %v1084_v38 = vadd.f32 %v1083_v26, %v1082_v40  ;;  %v1086_v28 = vmul.f32 %v1070_v36, %v1031_v44  ;;  %v1093_v50 = vmul.f32 %v1070_v36, %v1034_v51  ;;  %v1100_v47 = vmul.f32 %v1070_v36, %v1035_v0 }
 0x1af   :  { %v1088_v54 = vmul.f32 %v1077_v41, %v1032_v10  ;;  %v1095_v49 = vmul.f32 %v1077_v41, %v1035_v0  ;;  %v1102_v57 = vmul.f32 %v1077_v41, %v1037_v62  ;;  %v1106_v48 = vmul.f32 %v1063_v29, %v1498_v56 }
 0x1b0   :  { %v1087_v27 = vadd.f32 %v1086_v28, %v1085_v46  ;;  %v1090_v42 = vmul.f32 %v1084_v38, %v1498_v56  ;;  %v1094_v55 = vadd.f32 %v1093_v50, %v1092_v20  ;;  %v1097_v6 = vmul.f32 %v1084_v38, %v1500_v4 }
 0x1b1   :  { %v1101_v16 = vadd.f32 %v1100_v47, %v1099_v60  ;;  %v1104_v53 = vmul.f32 %v1084_v38, %v1502_v37  ;;  %v1107_v61 = vmul.f32 %v1070_v36, %v1500_v4  ;;  %v1109_v44 = vmul.f32 %v1077_v41, %v1502_v37 }
 0x1b2   :  { %v1089_v51 = vadd.f32 %v1088_v54, %v1087_v27  ;;  %v1096_v8 = vadd.f32 %v1095_v49, %v1094_v55  ;;  %v1111_v62 = vmul.f32 %v1084_v38, %v1504_v43 }
 0x1b3   :  { %v1103_v10 = vadd.f32 %v1102_v57, %v1101_v16  ;;  %v1108_v0 = vadd.f32 %v1107_v61, %v1106_v48 }
 0x1b4   :  { %v1091_v63 = vadd.f32 %v1090_v42, %v1089_v51  ;;  %v1098_v25 = vadd.f32 %v1097_v6, %v1096_v8 }
 0x1b5   :  { %v1105_v2 = vadd.f32 %v1104_v53, %v1103_v10  ;;  %v1110_v56 = vadd.f32 %v1109_v44, %v1108_v0 }
 0x1b6   :  { %v1113_v15 = vadd.f32 1e-12, %v1091_v63  ;;  %v1115_v3 = vmul.f32 %v1098_v25, %v1098_v25 }
 0x1b7   :  { %v1112_v12 = vadd.f32 %v1111_v62, %v1110_v56  ;;  %v1117_v30 = vmul.f32 %v1105_v2, %v1105_v2 }
 0x1b8   :  { %v1114_v59 = vmul.f32 %v1113_v15, %v1113_v15 }
 0x1b9   :  { %v1119_v1 = vmul.f32 %v1112_v12, %v1112_v12 }
 0x1ba   :  { %v1116_v58 = vadd.f32 %v1115_v3, %v1114_v59 }
 0x1bc   :  { %v1118_v4 = vadd.f32 %v1117_v30, %v1116_v58 }
 0x1be   :  { %v1120_v19 = vadd.f32 %v1119_v1, %v1118_v4 }
 0x1c0   :  { %v1121_v37 = vadd.f32 1e-30, %v1120_v19 }
 0x1c2   :  { %1221 = vrsqrt.f32 %v1121_v37 }
 0x1cc   :  { %v1222_v17 = vpop.eup %1221 }
 0x1cd   :  { %v1123_v21 = vmul.f32 %v1222_v17, %v1113_v15  ;;  %v1124_v52 = vmul.f32 %v1222_v17, %v1098_v25  ;;  %v1125_v5 = vmul.f32 %v1222_v17, %v1105_v2  ;;  %v1126_v43 = vmul.f32 %v1222_v17, %v1112_v12 }
 0x1cf   :  { %v1127_v13 = vmul.f32 %v1123_v21, %v1123_v21  ;;  %v1128_v18 = vmul.f32 %v1124_v52, %v1124_v52  ;;  %v1129_v11 = vmul.f32 %v1125_v5, %v1125_v5  ;;  %v1130_v24 = vmul.f32 %v1126_v43, %v1126_v43 }
 0x1d0   :  { %v1131_v9 = vmul.f32 %v1124_v52, %v1123_v21  ;;  %v1132_v23 = vmul.f32 %v1125_v5, %v1123_v21  ;;  %v1133_v31 = vmul.f32 %v1126_v43, %v1123_v21  ;;  %v1134_v14 = vmul.f32 %v1125_v5, %v1124_v52 }
 0x1d1   :  { %v1135_v45 = vmul.f32 %v1126_v43, %v1124_v52  ;;  %v1136_v22 = vmul.f32 %v1126_v43, %v1125_v5  ;;  %v1137_v35 = vadd.f32 %v1128_v18, %v1127_v13  ;;  %v1153_v32 = vsub.f32 %v1127_v13, %v1128_v18 }
 0x1d2   :  { %v1141_v39 = vsub.f32 %v1134_v14, %v1133_v31  ;;  %v1149_v34 = vadd.f32 %v1134_v14, %v1133_v31 }
 0x1d3   :  { %v1138_v7 = vsub.f32 %v1137_v35, %v1129_v11  ;;  %v1145_v26 = vadd.f32 %v1135_v45, %v1132_v23  ;;  %v1154_v29 = vadd.f32 %v1153_v32, %v1129_v11  ;;  %v1158_v33 = vsub.f32 %v1136_v22, %v1131_v9 }
 0x1d4   :  { %v1142_v36 = vmul.f32 2.0, %v1141_v39  ;;  %v1150_v40 = vmul.f32 2.0, %v1149_v34  ;;  %v1162_v41 = vsub.f32 %v1135_v45, %v1132_v23  ;;  %v1166_v46 = vadd.f32 %v1136_v22, %v1131_v9 }
 0x1d5   :  { %v1139_v20 = vsub.f32 %v1138_v7, %v1130_v24  ;;  %v1146_v60 = vmul.f32 2.0, %v1145_v26  ;;  %v1155_v38 = vsub.f32 %v1154_v29, %v1130_v24  ;;  %v1159_v28 = vmul.f32 2.0, %v1158_v33 }
 0x1d6   :  { %1144 = vst [vmem:[#allocation5 + $0x8] sm:$0xff] %v1142_v36  ;;  %1152 = vst [vmem:[#allocation5 + $0x18] sm:$0xff] %v1150_v40  ;;  %v1163_v50 = vmul.f32 2.0, %v1162_v41  ;;  %v1167_v47 = vmul.f32 2.0, %v1166_v46  ;;  %v1170_v54 = vsub.f32 %v1153_v32, %v1129_v11 }
 0x1d7   :  { %1140 = vst [vmem:[#allocation5] sm:$0xff] %v1139_v20  ;;  %1148 = vst [vmem:[#allocation5 + $0x10] sm:$0xff] %v1146_v60 }
 0x1d8   :  { %1157 = vst [vmem:[#allocation5 + $0x20] sm:$0xff] %v1155_v38  ;;  %1161 = vst [vmem:[#allocation5 + $0x28] sm:$0xff] %v1159_v28  ;;  %v1171_v49 = vadd.f32 %v1170_v54, %v1130_v24 }
 0x1d9   :  { %1165 = vst [vmem:[#allocation5 + $0x30] sm:$0xff] %v1163_v50  ;;  %1169 = vst [vmem:[#allocation5 + $0x38] sm:$0xff] %v1167_v47 }
 0x1da   :  { %1173 = vst [vmem:[#allocation5 + $0x40] sm:$0xff] %v1171_v49 }
 0x1db   :  { %1256 = shalt.err (!%p1253_p12)
}
 0x1dc   :  { %s1257_s24 = scalar_lea.hbm %s1559_s1, 1152 }
 0x1dd   :  { %p1258_p13 = scmp.ne.s32.totalorder %s1559_s1, %s1257_s24  ;;  %p1261_p0 = scmp.lt.u32.totalorder %s1257_s24, %s1559_s1 }
 0x1df   :  { %p1263_p1 = pnand %p1261_p0, %p1258_p13 }
 0x1e1   :  { %1266 = shalt.err (!%p1263_p1)
}
 0x1e2   :  { %1185 = dma.vmem_to_hbm [thread:$0]  %s1180_s20, 1152, %s1559_s1, [#allocation4], %s1272_s16, %s1272_s16, %s1273_s17  }
 0x1e3   :  { %1269 = dma.done.wait [#allocation4], 1152  }
 0x1e4   :  { %1270 = vsyncadd [#allocation4], 4294966144 }
 0x1e5   :  { %1189 = vsyncpa [#allocation3], 1 }
 0x1e6   :  { %1190 = vsyncpa [#allocation4], 1 }

</bundles_post_ra>
